<compile_context>
chip_gen: v7x
topology: tpu7x:2x2x1
jax: 0.10.0
libtpu: 0.0.40
codegen_flags: <defaults>
</compile_context>

<pallas_src>
import functools

import jax
import jax.numpy as jnp
import numpy as np
from jax import lax
from jax.experimental import pallas as pl
from jax.experimental.pallas import tpu as pltpu

EPS = 1e-5


def _resblocks_kernel(x_ref, w_ref, o_ref, pad_ref):
    """One residual block for one batch element per grid step.

    x_ref   : (1, H, W, C)       input image (NHWC), constant across blk axis
    w_ref   : (1, 2, 3, 3C, C)   this block's two convs, dy-grouped taps
    o_ref   : (1, H, W, C)       VMEM-resident running activation / output
    pad_ref : (H+2, W+2, C)      persistent zero-padded activation scratch
    """
    H, W, C = x_ref.shape[1], x_ref.shape[2], x_ref.shape[3]
    blk = pl.program_id(1)
    inv_n = 1.0 / float(H * W)

    @pl.when(blk == 0)
    def _():
        # Zero the padded scratch (its halo stays zero forever after) and seed
        # the resident activation from the input image, once per batch element.
        pad_ref[...] = jnp.zeros_like(pad_ref)
        o_ref[0] = x_ref[0]

    w = w_ref[0]  # (2, 3, 3C, C), already in the matmul compute dtype (bf16)

    def conv3x3_in(conv_idx, act_hwc):
        # Write only the interior of the persistent padded buffer (cast to the
        # matmul compute dtype); the zero halo is never rebuilt.
        pad_ref[pl.ds(1, H), pl.ds(1, W), :] = act_hwc.astype(pad_ref.dtype)
        xp = pad_ref[...]                                        # (H+2, W+2, C)
        # Build the 3 dx-shifted views ONCE per conv (3 sublane shifts, not 9)
        # and reuse them for every dy.
        xcat = jnp.concatenate(
            [xp[:, 0:W, :], xp[:, 1:W + 1, :], xp[:, 2:W + 2, :]],
            axis=-1)                                             # (H+2, W, 3C)
        # 3 K-fat MXU matmuls (K = 3C), f32 accumulation.
        acc = jnp.dot(xcat[0:H].reshape(H * W, 3 * C), w[conv_idx, 0],
                      preferred_element_type=jnp.float32)
        for dy in range(1, 3):
            acc = acc + jnp.dot(xcat[dy:dy + H].reshape(H * W, 3 * C),
                                w[conv_idx, dy],
                                preferred_element_type=jnp.float32)
        # Single-pass InstanceNorm statistics (f32): var = E[x^2] - mu^2.
        s1 = jnp.sum(acc, axis=0, keepdims=True)
        s2 = jnp.sum(acc * acc, axis=0, keepdims=True)
        mu = s1 * inv_n
        var = jnp.maximum(s2 * inv_n - mu * mu, 0.0)
        return (acc - mu) * lax.rsqrt(var + EPS)                 # (H*W, C) f32

    act = o_ref[0].astype(jnp.float32)                           # residual (f32)
    # Conv2dBlock #1: conv -> IN -> ReLU (conv bias dropped: cancelled by IN).
    h = jnp.maximum(conv3x3_in(0, act), 0.0).reshape(H, W, C)
    # Conv2dBlock #2: conv -> IN (no activation).
    out = conv3x3_in(1, h).reshape(H, W, C)
    # Residual add in f32; result stays resident in VMEM until the batch
    # element changes (single HBM writeback per image).
    o_ref[0] = (act + out).astype(o_ref.dtype)


def resblocks_pallas(x_nhwc, weights, *, num_blocks, compute_dtype=jnp.bfloat16):
    """ResBlocks forward.

    x_nhwc  : (B, H, W, C) float32, NHWC (no layout transposes around the call).
    weights : (num_blocks*2, 9, C, C) float32, tap-major (tap = 3*dy + dx),
              each tap (Cin, Cout).  Conv biases are intentionally NOT taken:
              they are exactly cancelled by the affine-free InstanceNorm that
              follows every conv.
    compute_dtype : dtype of the conv matmul inputs (bf16 by default for MXU
              throughput on v6e/v7x); statistics/ReLU/residual stay f32.
    """
    B, H, W, C = x_nhwc.shape
    L = num_blocks * 2
    assert weights.shape == (L, 9, C, C)

    # Group taps along the contraction dimension once at trace time:
    # (L, 9, Cin, Cout) -> (num_blocks, 2, dy=3, 3*Cin, Cout), dx-major in 3*Cin.
    w_grouped = weights.reshape(num_blocks, 2, 3, 3, C, C)
    w_grouped = w_grouped.reshape(num_blocks, 2, 3, 3 * C, C).astype(compute_dtype)

    out = pl.pallas_call(
        _resblocks_kernel,
        out_shape=jax.ShapeDtypeStruct((B, H, W, C), x_nhwc.dtype),
        grid_spec=pltpu.PrefetchScalarGridSpec(
            num_scalar_prefetch=0,
            grid=(B, num_blocks),
            in_specs=[
                # Input image: constant block index across blk -> one DMA per b.
                pl.BlockSpec((1, H, W, C), lambda b, k: (b, 0, 0, 0)),
                # Only the current residual block's weights are resident; the
                # next block's weights are prefetched behind compute.
                pl.BlockSpec((1, 2, 3, 3 * C, C), lambda b, k: (k, 0, 0, 0, 0)),
            ],
            # Constant block index along blk -> output is the VMEM-resident
            # running activation (accumulator pattern); written back once per b.
            out_specs=pl.BlockSpec((1, H, W, C), lambda b, k: (b, 0, 0, 0)),
            scratch_shapes=[pltpu.VMEM((H + 2, W + 2, C), compute_dtype)],
        ),
        compiler_params=pltpu.CompilerParams(
            dimension_semantics=("parallel", "arbitrary"),
            vmem_limit_bytes=64 * 1024 * 1024,
        ),
    )(x_nhwc, w_grouped)
    return out


def resblocks_reference(x_nchw, weights, biases, *, num_blocks):
    """Pure-JAX reference matching PyTorch semantics (zero pad, conv+bias,
    InstanceNorm2d with biased variance and no affine, ReLU, residual)."""
    C = x_nchw.shape[1]
    y = x_nchw
    for blk in range(num_blocks):
        res = y
        for j, do_act in ((0, True), (1, False)):
            w = weights[2 * blk + j].reshape(3, 3, C, C)      # (kh, kw, Cin, Cout)
            w_oihw = jnp.transpose(w, (3, 2, 0, 1))           # (O, I, kh, kw)
            y = lax.conv_general_dilated(
                y, w_oihw, window_strides=(1, 1), padding=((1, 1), (1, 1)),
                dimension_numbers=("NCHW", "OIHW", "NCHW"))
            y = y + biases[2 * blk + j][None, :, None, None]
            mu = jnp.mean(y, axis=(2, 3), keepdims=True)
            var = jnp.mean((y - mu) ** 2, axis=(2, 3), keepdims=True)
            y = (y - mu) / jnp.sqrt(var + EPS)
            if do_act:
                y = jnp.maximum(y, 0.0)
        y = y + res
    return y


if __name__ == "__main__":
    # ResBlocks(num_blocks=2, dim=4, norm='in', activation='relu',
    # pad_type='zero') on a (2, 4, 16, 16) input (NHWC inside the kernel path).
    num_blocks = 2
    B, C, H, W = 2, 4, 16, 16

    key = jax.random.PRNGKey(0)
    kx, kw, kb = jax.random.split(key, 3)

    x_nhwc = jax.random.normal(kx, (B, H, W, C), dtype=jnp.float32)

    fan_in = C * 3 * 3
    scale = 1.0 / np.sqrt(fan_in)
    # (num_blocks*2, 9, Cin, Cout): tap-major conv weights; biases only feed the
    # reference (the kernel drops them -- exactly cancelled by InstanceNorm).
    weights = scale * jax.random.normal(kw, (num_blocks * 2, 9, C, C), dtype=jnp.float32)
    biases = scale * jax.random.normal(kb, (num_blocks * 2, C), dtype=jnp.float32)

    # Reference in PyTorch NCHW layout (test-only transposes).
    x_nchw = jnp.transpose(x_nhwc, (0, 3, 1, 2))
    ref_nhwc = jnp.transpose(
        resblocks_reference(x_nchw, weights, biases, num_blocks=num_blocks),
        (0, 2, 3, 1))
    ref_nhwc = jax.block_until_ready(ref_nhwc)

    # f32-matmul path: tight correctness check.
    out_f32 = resblocks_pallas(x_nhwc, weights, num_blocks=num_blocks,
                               compute_dtype=jnp.float32)
    out_f32 = jax.block_until_ready(out_f32)
    np.testing.assert_allclose(np.asarray(out_f32), np.asarray(ref_nhwc),
                               rtol=1e-3, atol=1e-3)

    # Default bf16-matmul path: small expected drift vs the f32 reference.
    out_bf16 = resblocks_pallas(x_nhwc, weights, num_blocks=num_blocks)
    out_bf16 = jax.block_until_ready(out_bf16)
    np.testing.assert_allclose(np.asarray(out_bf16), np.asarray(ref_nhwc),
                               rtol=2e-2, atol=5e-2)

    assert out_bf16.shape == (B, H, W, C) and out_bf16.dtype == jnp.float32

    print("KERNEL_OK")
</pallas_src>

<mosaic_0001>
module attributes {stable_mosaic.version = 11 : i64} {
  func.func @_resblocks_kernel(%arg0: i32, %arg1: i32, %arg2: memref<1x16x16x4xf32, #tpu.memory_space<vmem>>, %arg3: memref<1x2x3x12x4xf32, #tpu.memory_space<vmem>>, %arg4: memref<1x16x16x4xf32, #tpu.memory_space<vmem>>, %arg5: memref<18x18x4xf32, #tpu.memory_space<vmem>>) attributes {dimension_semantics = [#tpu.dimension_semantics<parallel>, #tpu.dimension_semantics<arbitrary>], iteration_bounds = array<i64: 2, 2>, scalar_prefetch = 0 : i64, scratch_operands = 1 : i64, tpu.core_type = #tpu.core_type<tc>, window_params = [{transform_indices = @transform_0, window_bounds = array<i64: 1, 16, 16, 4>}, {transform_indices = @transform_1, window_bounds = array<i64: 1, 2, 3, 12, 4>}, {transform_indices = @transform_2, window_bounds = array<i64: 1, 16, 16, 4>}]} {
    %c0_i32 = arith.constant 0 : i32
    %0 = arith.cmpi eq, %arg1, %c0_i32 : i32
    %1 = arith.extui %0 : i1 to i32
    %c0_i32_0 = arith.constant 0 : i32
    %2 = arith.cmpi ne, %1, %c0_i32_0 : i32
    scf.if %2 {
      %cst_42 = arith.constant 0.000000e+00 : f32
      %101 = vector.broadcast %cst_42 : f32 to vector<18x18x4xf32>
      %c0_43 = arith.constant 0 : index
      %c0_44 = arith.constant 0 : index
      %c0_45 = arith.constant 0 : index
      %102 = vector.load %arg5[%c0_43, %c0_44, %c0_45] : memref<18x18x4xf32, #tpu.memory_space<vmem>>, vector<18x18x4xf32>
      tpu.vector_store %arg5[%c0_43, %c0_44, %c0_45], %101 {strides = array<i32>} : memref<18x18x4xf32, #tpu.memory_space<vmem>>, vector<18x18x4xf32>,
      %c0_46 = arith.constant 0 : index
      %c0_47 = arith.constant 0 : index
      %c0_48 = arith.constant 0 : index
      %c0_49 = arith.constant 0 : index
      %103 = vector.load %arg2[%c0_46, %c0_47, %c0_48, %c0_49] : memref<1x16x16x4xf32, #tpu.memory_space<vmem>>, vector<1x16x16x4xf32>
      %104 = vector.shape_cast %103 : vector<1x16x16x4xf32> to vector<16x16x4xf32>
      %c0_50 = arith.constant 0 : index
      %c0_51 = arith.constant 0 : index
      %c0_52 = arith.constant 0 : index
      %c0_53 = arith.constant 0 : index
      %105 = vector.load %arg4[%c0_50, %c0_51, %c0_52, %c0_53] : memref<1x16x16x4xf32, #tpu.memory_space<vmem>>, vector<1x16x16x4xf32>
      %106 = vector.shape_cast %105 : vector<1x16x16x4xf32> to vector<16x16x4xf32>
      %107 = vector.shape_cast %104 : vector<16x16x4xf32> to vector<1x16x16x4xf32>
      tpu.vector_store %arg4[%c0_50, %c0_51, %c0_52, %c0_53], %107 {strides = array<i32>} : memref<1x16x16x4xf32, #tpu.memory_space<vmem>>, vector<1x16x16x4xf32>,
    } else {
    }
    %c0 = arith.constant 0 : index
    %c0_1 = arith.constant 0 : index
    %c0_2 = arith.constant 0 : index
    %c0_3 = arith.constant 0 : index
    %c0_4 = arith.constant 0 : index
    %3 = vector.load %arg3[%c0, %c0_1, %c0_2, %c0_3, %c0_4] : memref<1x2x3x12x4xf32, #tpu.memory_space<vmem>>, vector<1x2x3x12x4xf32>
    %4 = vector.shape_cast %3 : vector<1x2x3x12x4xf32> to vector<2x3x12x4xf32>
    %c0_5 = arith.constant 0 : index
    %c0_6 = arith.constant 0 : index
    %c0_7 = arith.constant 0 : index
    %c0_8 = arith.constant 0 : index
    %5 = vector.load %arg4[%c0_5, %c0_6, %c0_7, %c0_8] : memref<1x16x16x4xf32, #tpu.memory_space<vmem>>, vector<1x16x16x4xf32>
    %6 = vector.shape_cast %5 : vector<1x16x16x4xf32> to vector<16x16x4xf32>
    %c1 = arith.constant 1 : index
    %c1_9 = arith.constant 1 : index
    %c0_10 = arith.constant 0 : index
    %7 = vector.load %arg5[%c1, %c1_9, %c0_10] : memref<18x18x4xf32, #tpu.memory_space<vmem>>, vector<16x16x4xf32>
    tpu.vector_store %arg5[%c1, %c1_9, %c0_10], %6 {strides = array<i32>} : memref<18x18x4xf32, #tpu.memory_space<vmem>>, vector<16x16x4xf32>,
    %c0_11 = arith.constant 0 : index
    %c0_12 = arith.constant 0 : index
    %c0_13 = arith.constant 0 : index
    %8 = vector.load %arg5[%c0_11, %c0_12, %c0_13] : memref<18x18x4xf32, #tpu.memory_space<vmem>>, vector<18x18x4xf32>
    %9 = vector.extract_strided_slice %8 {offsets = [0, 0, 0], sizes = [18, 16, 4], strides = [1, 1, 1]} : vector<18x18x4xf32> to vector<18x16x4xf32>
    %10 = vector.extract_strided_slice %8 {offsets = [0, 1, 0], sizes = [18, 16, 4], strides = [1, 1, 1]} : vector<18x18x4xf32> to vector<18x16x4xf32>
    %11 = vector.extract_strided_slice %8 {offsets = [0, 2, 0], sizes = [18, 16, 4], strides = [1, 1, 1]} : vector<18x18x4xf32> to vector<18x16x4xf32>
    %12 = tpu.concatenate %9, %10, %11 in 2 : vector<18x16x4xf32>, vector<18x16x4xf32>, vector<18x16x4xf32> -> vector<18x16x12xf32>
    %13 = vector.extract_strided_slice %12 {offsets = [0, 0, 0], sizes = [16, 16, 12], strides = [1, 1, 1]} : vector<18x16x12xf32> to vector<16x16x12xf32>
    %14 = vector.shape_cast %13 : vector<16x16x12xf32> to vector<256x12xf32>
    %15 = vector.extract_strided_slice %4 {offsets = [0, 0, 0, 0], sizes = [1, 1, 12, 4], strides = [1, 1, 1, 1]} : vector<2x3x12x4xf32> to vector<1x1x12x4xf32>
    %16 = vector.shape_cast %15 : vector<1x1x12x4xf32> to vector<12x4xf32>
    %cst = arith.constant dense<0.000000e+00> : vector<256x4xf32>
    %17 = tpu.matmul %14, %16, %cst {dimension_numbers = #tpu.dot_dimension_numbers<[1], [0], [0], [1], [0, 0, 1, 1], [], []>} : vector<256x12xf32>, vector<12x4xf32>, vector<256x4xf32> -> vector<256x4xf32>
    %18 = vector.extract_strided_slice %12 {offsets = [1, 0, 0], sizes = [16, 16, 12], strides = [1, 1, 1]} : vector<18x16x12xf32> to vector<16x16x12xf32>
    %19 = vector.shape_cast %18 : vector<16x16x12xf32> to vector<256x12xf32>
    %20 = vector.extract_strided_slice %4 {offsets = [0, 1, 0, 0], sizes = [1, 1, 12, 4], strides = [1, 1, 1, 1]} : vector<2x3x12x4xf32> to vector<1x1x12x4xf32>
    %21 = vector.shape_cast %20 : vector<1x1x12x4xf32> to vector<12x4xf32>
    %cst_14 = arith.constant dense<0.000000e+00> : vector<256x4xf32>
    %22 = tpu.matmul %19, %21, %cst_14 {dimension_numbers = #tpu.dot_dimension_numbers<[1], [0], [0], [1], [0, 0, 1, 1], [], []>} : vector<256x12xf32>, vector<12x4xf32>, vector<256x4xf32> -> vector<256x4xf32>
    %23 = arith.addf %17, %22 : vector<256x4xf32>
    %24 = vector.extract_strided_slice %12 {offsets = [2, 0, 0], sizes = [16, 16, 12], strides = [1, 1, 1]} : vector<18x16x12xf32> to vector<16x16x12xf32>
    %25 = vector.shape_cast %24 : vector<16x16x12xf32> to vector<256x12xf32>
    %26 = vector.extract_strided_slice %4 {offsets = [0, 2, 0, 0], sizes = [1, 1, 12, 4], strides = [1, 1, 1, 1]} : vector<2x3x12x4xf32> to vector<1x1x12x4xf32>
    %27 = vector.shape_cast %26 : vector<1x1x12x4xf32> to vector<12x4xf32>
    %cst_15 = arith.constant dense<0.000000e+00> : vector<256x4xf32>
    %28 = tpu.matmul %25, %27, %cst_15 {dimension_numbers = #tpu.dot_dimension_numbers<[1], [0], [0], [1], [0, 0, 1, 1], [], []>} : vector<256x12xf32>, vector<12x4xf32>, vector<256x4xf32> -> vector<256x4xf32>
    %29 = arith.addf %23, %28 : vector<256x4xf32>
    %cst_16 = arith.constant dense<0.000000e+00> : vector<4xf32>
    %30 = vector.multi_reduction <add>, %29, %cst_16 [0] : vector<256x4xf32> to vector<4xf32>
    %31 = vector.shape_cast %30 : vector<4xf32> to vector<1x4xf32>
    %32 = arith.mulf %29, %29 : vector<256x4xf32>
    %cst_17 = arith.constant dense<0.000000e+00> : vector<4xf32>
    %33 = vector.multi_reduction <add>, %32, %cst_17 [0] : vector<256x4xf32> to vector<4xf32>
    %34 = vector.shape_cast %33 : vector<4xf32> to vector<1x4xf32>
    %cst_18 = arith.constant 3.906250e-03 : f32
    %35 = vector.broadcast %cst_18 : f32 to vector<1x4xf32>
    %36 = arith.mulf %31, %35 : vector<1x4xf32>
    %cst_19 = arith.constant 3.906250e-03 : f32
    %37 = vector.broadcast %cst_19 : f32 to vector<1x4xf32>
    %38 = arith.mulf %34, %37 : vector<1x4xf32>
    %39 = arith.mulf %36, %36 : vector<1x4xf32>
    %40 = arith.subf %38, %39 : vector<1x4xf32>
    %cst_20 = arith.constant 0.000000e+00 : f32
    %41 = vector.broadcast %cst_20 : f32 to vector<1x4xf32>
    %42 = arith.maximumf %40, %41 : vector<1x4xf32>
    %43 = vector.broadcast %36 : vector<1x4xf32> to vector<256x4xf32>
    %44 = arith.subf %29, %43 : vector<256x4xf32>
    %cst_21 = arith.constant 9.99999974E-6 : f32
    %45 = vector.broadcast %cst_21 : f32 to vector<1x4xf32>
    %46 = arith.addf %42, %45 : vector<1x4xf32>
    %47 = math.rsqrt %46 : vector<1x4xf32>
    %48 = vector.broadcast %47 : vector<1x4xf32> to vector<256x4xf32>
    %49 = arith.mulf %44, %48 : vector<256x4xf32>
    %cst_22 = arith.constant 0.000000e+00 : f32
    %50 = vector.broadcast %cst_22 : f32 to vector<256x4xf32>
    %51 = arith.maximumf %49, %50 : vector<256x4xf32>
    %52 = vector.shape_cast %51 : vector<256x4xf32> to vector<16x16x4xf32>
    %c1_23 = arith.constant 1 : index
    %c1_24 = arith.constant 1 : index
    %c0_25 = arith.constant 0 : index
    %53 = vector.load %arg5[%c1_23, %c1_24, %c0_25] : memref<18x18x4xf32, #tpu.memory_space<vmem>>, vector<16x16x4xf32>
    tpu.vector_store %arg5[%c1_23, %c1_24, %c0_25], %52 {strides = array<i32>} : memref<18x18x4xf32, #tpu.memory_space<vmem>>, vector<16x16x4xf32>,
    %c0_26 = arith.constant 0 : index
    %c0_27 = arith.constant 0 : index
    %c0_28 = arith.constant 0 : index
    %54 = vector.load %arg5[%c0_26, %c0_27, %c0_28] : memref<18x18x4xf32, #tpu.memory_space<vmem>>, vector<18x18x4xf32>
    %55 = vector.extract_strided_slice %54 {offsets = [0, 0, 0], sizes = [18, 16, 4], strides = [1, 1, 1]} : vector<18x18x4xf32> to vector<18x16x4xf32>
    %56 = vector.extract_strided_slice %54 {offsets = [0, 1, 0], sizes = [18, 16, 4], strides = [1, 1, 1]} : vector<18x18x4xf32> to vector<18x16x4xf32>
    %57 = vector.extract_strided_slice %54 {offsets = [0, 2, 0], sizes = [18, 16, 4], strides = [1, 1, 1]} : vector<18x18x4xf32> to vector<18x16x4xf32>
    %58 = tpu.concatenate %55, %56, %57 in 2 : vector<18x16x4xf32>, vector<18x16x4xf32>, vector<18x16x4xf32> -> vector<18x16x12xf32>
    %59 = vector.extract_strided_slice %58 {offsets = [0, 0, 0], sizes = [16, 16, 12], strides = [1, 1, 1]} : vector<18x16x12xf32> to vector<16x16x12xf32>
    %60 = vector.shape_cast %59 : vector<16x16x12xf32> to vector<256x12xf32>
    %61 = vector.extract_strided_slice %4 {offsets = [1, 0, 0, 0], sizes = [1, 1, 12, 4], strides = [1, 1, 1, 1]} : vector<2x3x12x4xf32> to vector<1x1x12x4xf32>
    %62 = vector.shape_cast %61 : vector<1x1x12x4xf32> to vector<12x4xf32>
    %cst_29 = arith.constant dense<0.000000e+00> : vector<256x4xf32>
    %63 = tpu.matmul %60, %62, %cst_29 {dimension_numbers = #tpu.dot_dimension_numbers<[1], [0], [0], [1], [0, 0, 1, 1], [], []>} : vector<256x12xf32>, vector<12x4xf32>, vector<256x4xf32> -> vector<256x4xf32>
    %64 = vector.extract_strided_slice %58 {offsets = [1, 0, 0], sizes = [16, 16, 12], strides = [1, 1, 1]} : vector<18x16x12xf32> to vector<16x16x12xf32>
    %65 = vector.shape_cast %64 : vector<16x16x12xf32> to vector<256x12xf32>
    %66 = vector.extract_strided_slice %4 {offsets = [1, 1, 0, 0], sizes = [1, 1, 12, 4], strides = [1, 1, 1, 1]} : vector<2x3x12x4xf32> to vector<1x1x12x4xf32>
    %67 = vector.shape_cast %66 : vector<1x1x12x4xf32> to vector<12x4xf32>
    %cst_30 = arith.constant dense<0.000000e+00> : vector<256x4xf32>
    %68 = tpu.matmul %65, %67, %cst_30 {dimension_numbers = #tpu.dot_dimension_numbers<[1], [0], [0], [1], [0, 0, 1, 1], [], []>} : vector<256x12xf32>, vector<12x4xf32>, vector<256x4xf32> -> vector<256x4xf32>
    %69 = arith.addf %63, %68 : vector<256x4xf32>
    %70 = vector.extract_strided_slice %58 {offsets = [2, 0, 0], sizes = [16, 16, 12], strides = [1, 1, 1]} : vector<18x16x12xf32> to vector<16x16x12xf32>
    %71 = vector.shape_cast %70 : vector<16x16x12xf32> to vector<256x12xf32>
    %72 = vector.extract_strided_slice %4 {offsets = [1, 2, 0, 0], sizes = [1, 1, 12, 4], strides = [1, 1, 1, 1]} : vector<2x3x12x4xf32> to vector<1x1x12x4xf32>
    %73 = vector.shape_cast %72 : vector<1x1x12x4xf32> to vector<12x4xf32>
    %cst_31 = arith.constant dense<0.000000e+00> : vector<256x4xf32>
    %74 = tpu.matmul %71, %73, %cst_31 {dimension_numbers = #tpu.dot_dimension_numbers<[1], [0], [0], [1], [0, 0, 1, 1], [], []>} : vector<256x12xf32>, vector<12x4xf32>, vector<256x4xf32> -> vector<256x4xf32>
    %75 = arith.addf %69, %74 : vector<256x4xf32>
    %cst_32 = arith.constant dense<0.000000e+00> : vector<4xf32>
    %76 = vector.multi_reduction <add>, %75, %cst_32 [0] : vector<256x4xf32> to vector<4xf32>
    %77 = vector.shape_cast %76 : vector<4xf32> to vector<1x4xf32>
    %78 = arith.mulf %75, %75 : vector<256x4xf32>
    %cst_33 = arith.constant dense<0.000000e+00> : vector<4xf32>
    %79 = vector.multi_reduction <add>, %78, %cst_33 [0] : vector<256x4xf32> to vector<4xf32>
    %80 = vector.shape_cast %79 : vector<4xf32> to vector<1x4xf32>
    %cst_34 = arith.constant 3.906250e-03 : f32
    %81 = vector.broadcast %cst_34 : f32 to vector<1x4xf32>
    %82 = arith.mulf %77, %81 : vector<1x4xf32>
    %cst_35 = arith.constant 3.906250e-03 : f32
    %83 = vector.broadcast %cst_35 : f32 to vector<1x4xf32>
    %84 = arith.mulf %80, %83 : vector<1x4xf32>
    %85 = arith.mulf %82, %82 : vector<1x4xf32>
    %86 = arith.subf %84, %85 : vector<1x4xf32>
    %cst_36 = arith.constant 0.000000e+00 : f32
    %87 = vector.broadcast %cst_36 : f32 to vector<1x4xf32>
    %88 = arith.maximumf %86, %87 : vector<1x4xf32>
    %89 = vector.broadcast %82 : vector<1x4xf32> to vector<256x4xf32>
    %90 = arith.subf %75, %89 : vector<256x4xf32>
    %cst_37 = arith.constant 9.99999974E-6 : f32
    %91 = vector.broadcast %cst_37 : f32 to vector<1x4xf32>
    %92 = arith.addf %88, %91 : vector<1x4xf32>
    %93 = math.rsqrt %92 : vector<1x4xf32>
    %94 = vector.broadcast %93 : vector<1x4xf32> to vector<256x4xf32>
    %95 = arith.mulf %90, %94 : vector<256x4xf32>
    %96 = vector.shape_cast %95 : vector<256x4xf32> to vector<16x16x4xf32>
    %97 = arith.addf %6, %96 : vector<16x16x4xf32>
    %c0_38 = arith.constant 0 : index
    %c0_39 = arith.constant 0 : index
    %c0_40 = arith.constant 0 : index
    %c0_41 = arith.constant 0 : index
    %98 = vector.load %arg4[%c0_38, %c0_39, %c0_40, %c0_41] : memref<1x16x16x4xf32, #tpu.memory_space<vmem>>, vector<1x16x16x4xf32>
    %99 = vector.shape_cast %98 : vector<1x16x16x4xf32> to vector<16x16x4xf32>
    %100 = vector.shape_cast %97 : vector<16x16x4xf32> to vector<1x16x16x4xf32>
    tpu.vector_store %arg4[%c0_38, %c0_39, %c0_40, %c0_41], %100 {strides = array<i32>} : memref<1x16x16x4xf32, #tpu.memory_space<vmem>>, vector<1x16x16x4xf32>,
    return
  }
  func.func @transform_0(%arg0: i32, %arg1: i32) -> (i32, i32, i32, i32) {
    %c0_i32 = arith.constant 0 : i32
    %c0_i32_0 = arith.constant 0 : i32
    %c0_i32_1 = arith.constant 0 : i32
    %c0_i32_2 = arith.constant 0 : i32
    return %arg0, %c0_i32, %c0_i32_0, %c0_i32_1 : i32, i32, i32, i32
  }
  func.func @transform_1(%arg0: i32, %arg1: i32) -> (i32, i32, i32, i32, i32) {
    %c0_i32 = arith.constant 0 : i32
    %c0_i32_0 = arith.constant 0 : i32
    %c0_i32_1 = arith.constant 0 : i32
    %c0_i32_2 = arith.constant 0 : i32
    %c0_i32_3 = arith.constant 0 : i32
    return %arg1, %c0_i32, %c0_i32_0, %c0_i32_1, %c0_i32_2 : i32, i32, i32, i32, i32
  }
  func.func @transform_2(%arg0: i32, %arg1: i32) -> (i32, i32, i32, i32) {
    %c0_i32 = arith.constant 0 : i32
    %c0_i32_0 = arith.constant 0 : i32
    %c0_i32_1 = arith.constant 0 : i32
    %c0_i32_2 = arith.constant 0 : i32
    return %arg0, %c0_i32, %c0_i32_0, %c0_i32_1 : i32, i32, i32, i32
  }
}

</mosaic_0001>

<bundles_post_ra>
// kernel: tpu_custom_call.1
= control target key start
LH: loop header
LB: loop body
LE: loop exit
PB: predicated region body
PF: predicated region fallthrough
CT: control target
= control target key end

     0   :  { %s7923_s0 = inlined_call_operand.hbm [shape: f32[2,16,16,4], index: 0, kind: input, shape index: {}]   ;;  %s7924_s1 = inlined_call_operand.hbm [shape: f32[2,2,3,12,4], index: 1, kind: input, shape index: {}]   ;;  %s7925_s2 = inlined_call_operand.hbm [shape: f32[2,16,16,4], index: 2, kind: output, shape index: {}]  }
   0x1   :  { %7960 = sst [smem:[#allocation39_spill]] %s7923_s0 }
   0x2   :  { %7 = vsyncpa [#allocation4], 0 }
   0x3   :  { %9 = vsyncpa [#allocation4 + $0x1], 0 }
   0x4   :  { %10 = vsyncpa [#allocation7], 0 }
   0x5   :  { %12 = vsyncpa [#allocation7 + $0x1], 0 }
   0x6   :  { %13 = vsyncpa [#allocation5], 0 }
   0x7   :  { %15 = vsyncpa [#allocation5 + $0x1], 0  ;;  %s5186_s9 = smov 0   ;;  %s5188_s10 = smov 0  }
   0x8   :  { %s5190_s11 = smov 0   ;;  %s5192_s12 = smov 0  }
   0x9   :  { %s5194_s13 = smov 0   ;;  %s5196_s14 = smov 0  }
   0xa   :  { %s5198_s15 = smov 0   ;;  %s5200_s16 = smov 0  }
   0xb   :  { %s5202_s17 = smov 0   ;;  %s5204_s18 = smov 0  }
   0xc   :  { %s5206_s19 = smov 0  }
   0xd LB: > { %7961 = sst [smem:[#allocation12_spill]] %s5155_s18  ;;  %s3952_s20 = sadd.s32 4294967295, %s5159_s19   ;;  %s5159_s19 = sphi %s5206_s19, %s21_s19   ;;  %s5155_s18 = sphi %s5204_s18, %s8035_s18   ;;  %s5151_s17 = sphi %s5202_s17, %s8043_s17   ;;  %s5147_s16 = sphi %s5200_s16, %s8033_s16   ;;  %s5143_s15 = sphi %s5198_s15, %s8042_s15   ;;  %s5139_s14 = sphi %s5196_s14, %s8041_s14   ;;  %s5135_s13 = sphi %s5194_s13, %s8040_s13   ;;  %s5131_s12 = sphi %s5192_s12, %s8039_s12   ;;  %s5127_s11 = sphi %s5190_s11, %s8038_s11   ;;  %s5123_s10 = sphi %s5188_s10, %s8037_s10   ;;  %s5119_s9 = sphi %s5186_s9, %s8036_s9  }
   0xe   : > { %s3953_s21 = sadd.s32 4294967294, %s5159_s19   ;;  %s33_s22 = sadd.s32 1, %s5155_s18 }
   0xf   : > { %s40_s23 = sadd.s32 1, %s5139_s14  ;;  %p47_p0 = scmp.ne.s32.totalorder %s5139_s14, %s5135_s13 }
  0x10   : > { %p7927_p1 = scmp.eq.s32.totalorder %s5159_s19, 0  ;;  %p53_p2 = scmp.ne.s32.totalorder %s5135_s13, %s5131_s12 }
  0x11   : > { %p5250_p3 = scmp.eq.s32.totalorder %s3952_s20, 0  ;;  %p103_p5 = scmp.eq.s32.totalorder %s3952_s20, 3 }
  0x12   : > { %p5256_p4 = por %p7927_p1, %p47_p0  ;;  %p109_p7 = scmp.eq.s32.totalorder %s3953_s21, 3 }
  0x13   : > { %p5262_p6 = por %p5250_p3, %p53_p2  ;;  %p5266_p8 = por %p103_p5, %p47_p0 }
  0x14   : > { %p5270_p9 = por %p109_p7, %p53_p2  ;;  %p7926_p10 = scmp.lt.s32.totalorder %s5159_s19, 4 }
  0x15   : > { %s7964_s26 = scalar_select %p5262_p6, 1, 0 }
  0x16   : > { %s7965_s27 = scalar_select %p5266_p8, 1, 0 }
  0x17   : > { %s7966_s28 = scalar_select %p5270_p9, 1, 0 }
  0x18   : > { %s129_s29 = sand.u32 1, %s5139_s14   ;;  %s4167_s30 = sshll.u32 %s5155_s18, 12 }
  0x19   : > { %s3956_s3 = sshll.u32 %s129_s29, 8  ;;  %s7967_s0 = sld [smem:[#allocation39_spill]] }
  0x1a   : > { %s133_s7 = scalar_lea.vmem [#allocation3], %s3956_s3  ;;  %p5286_p11 = pnand %p7926_p10, %p5256_p4 }
  0x1b   : > { %s140_s8 = sshll.u32 %s133_s7, 4  ;;  %s5292_s21 = scalar_lea.sflag [#allocation4], %s129_s29  ;;  %s5290_s8 = int_to_ptr.vmem [resolvable:$true] %s140_s8 }
  0x1c   : > { %p4975_p13 = pneg %p5286_p11 }
  0x1f   : > { %s5280_s6 = scalar_lea.hbm %s7967_s0, %s4167_s30  ;;  %s4978_s4 = scalar_lea.hbm %s7967_s0, 8192 }
  0x20   : > { %s4973_s30 = scalar_lea.hbm %s5280_s6, 4096  ;;  %p4979_p4 = scmp.lt.u32.totalorder %s5280_s6, %s7967_s0 }
  0x21   : > { %p4974_p12 = scmp.ne.s32.totalorder %s5280_s6, %s4973_s30  ;;  %p4980_p5 = scmp.lt.u32.totalorder %s4978_s4, %s4973_s30 }
  0x22   : > { %p4982_p10 = scmp.lt.u32.totalorder %s4973_s30, %s5280_s6 }
  0x23   : > { %p4976_p0 = pnand %p4975_p13, %p4974_p12  ;;  %p4981_p7 = por %p4980_p5, %p4979_p4 }
  0x25   : > { %p4977_p2 = pneg %p4976_p0  ;;  %p4983_p1 = por %p4982_p10, %p4981_p7 }
  0x27   : > { %p4984_p9 = pnand %p4983_p1, %p4977_p2 }
  0x29   : > { %4987 = shalt.err (!%p4984_p9)
}
  0x2a   : > { %s4988_s29 = scalar_lea.vmem %s5290_s8, 4096  ;;  %s5161_s25 = smov [#allocation3]  }
  0x2b   : > { %p4989_p12 = scmp.ne.s32.totalorder %s5290_s8, %s4988_s29  ;;  %s4993_s3 = sshll.u32 %s5161_s25, 4  ;;  %s4994_s3 = int_to_ptr.vmem [resolvable:$false] %s4993_s3 }
  0x2c   : > { %s4995_s5 = scalar_lea.vmem %s4994_s3, 8192  ;;  %p4996_p6 = scmp.lt.s32.totalorder %s5290_s8, %s4994_s3 }
  0x2d   : > { %p4991_p0 = pnand %p4989_p12, %p4975_p13  ;;  %p4997_p4 = scmp.lt.s32.totalorder %s4995_s5, %s4988_s29 }
  0x2f   : > { %p4992_p8 = pneg %p4991_p0  ;;  %p4998_p5 = por %p4997_p4, %p4996_p6 }
  0x31   : > { %p4999_p10 = pnand %p4998_p5, %p4992_p8 }
  0x33   : > { %5002 = shalt.err (!%p4999_p10)
}
  0x34   : > { %s7930_s30 = smov 128   ;;  %s7931_s4 = smov 8  }
  0x35   : > { %4861 = dma.hbm_to_vmem [thread:$0]  (!%p5286_p11), %s5280_s6, 4096, %s5290_s8, %s5292_s21, %s7930_s30, %s7930_s30, %s7931_s4  }
  0x36   : > { %p3960_p1 = scmp.ge.s32.totalorder %s5159_s19, 1  ;;  %p169_p6 = scmp.lt.s32.totalorder %s5159_s19, 5 }
  0x37   : > { %s30_s29 = sadd.s32 1, %s5151_s17  ;;  %s66_s25 = sadd.s32 1, %s5127_s11 }
  0x38   : > { %p5325_p8 = pnand %p3960_p1, %p169_p6  ;;  %p31_p9 = scmp.ge.s32.totalorder %s30_s29, 2 }
  0x39   : > { %p73_p13 = scmp.ne.s32.totalorder %s5127_s11, %s5123_s10  ;;  %p79_p2 = scmp.ne.s32.totalorder %s5123_s10, %s5119_s9 }
  0x3a   : > { %s8045_s29 = smov (%p31_p9, %s30_s29), 0  ;;  %s8047_s22 = smov (!%p31_p9, %s33_s22), %s5155_s18 }
  0x3b   : > { %7970 = sst [smem:[#allocation13_spill]] %s8045_s29  ;;  %s63_s6 = ssub.s32 %s5151_s17, %s8045_s29 }
  0x3c   : > { %p7971_p11 = scmp.eq.s32.totalorder %s5159_s19, 0  ;;  %p35_p12 = scmp.ge.s32.totalorder %s8047_s22, 2 }
  0x3d   : > { %p64_p0 = scmp.eq.s32.totalorder %s63_s6, 0  ;;  %p5346_p4 = por %p79_p2, %p5250_p3 }
  0x3e   : > { %p75_p7 = por %p73_p13, %p7971_p11  ;;  %s150_s20 = sand.u32 1, %s5127_s11  }
  0x3f   : > { %s7972_s8 = scalar_select %p5346_p4, 1, 0 }
  0x40   : > { %s8049_s22 = smov (%p35_p12, %s8047_s22), 0  ;;  %s4849_s3 = smul.u32 96, %s150_s20 }
  0x41   : > { %7973 = sst [smem:[#allocation14_spill]] %s8049_s22  ;;  %s37_s21 = ssub.s32 %s5155_s18, %s8049_s22 }
  0x42   : > { %s5354_s9 = scalar_select %p64_p0, %s5127_s11, %s66_s25  }
  0x43   : > { %p38_p5 = scmp.eq.s32.totalorder %s37_s21, 0  ;;  %s4850_s5 = smul.u32 1536, %s5151_s17 }
  0x44   : > { %p7974_p10 = scmp.lt.s32.totalorder %s5159_s19, 4  ;;  %s154_s25 = scalar_lea.vmem [#allocation6], %s4849_s3 }
  0x45   : > { %s5368_s24 = scalar_select %p38_p5, %s5139_s14, %s40_s23  }
  0x46   : > { %p5361_p1 = pnand %p7974_p10, %p75_p7  ;;  %s5373_s0 = scalar_lea.hbm %s7924_s1, %s4850_s5 }
  0x47   : > { %s161_s21 = sshll.u32 %s154_s25, 4  ;;  %s5377_s22 = scalar_lea.sflag [#allocation7], %s150_s20  ;;  %s5375_s21 = int_to_ptr.vmem [resolvable:$true] %s161_s21 }
  0x48   : > { %s5003_s29 = scalar_lea.hbm %s5373_s0, 1536  ;;  %p5005_p6 = pneg %p5361_p1 }
  0x49   : > { %p5004_p3 = scmp.ne.s32.totalorder %s5373_s0, %s5003_s29  ;;  %s5008_s5 = scalar_lea.hbm %s7924_s1, 3072 }
  0x4a   : > { %p5009_p2 = scmp.lt.u32.totalorder %s5373_s0, %s7924_s1  ;;  %p5010_p11 = scmp.lt.u32.totalorder %s5008_s5, %s5003_s29 }
  0x4b   : > { %p5006_p9 = pnand %p5005_p6, %p5004_p3  ;;  %p5012_p12 = scmp.lt.u32.totalorder %s5003_s29, %s5373_s0 }
  0x4c   : > { %p5011_p7 = por %p5010_p11, %p5009_p2 }
  0x4d   : > { %p5007_p13 = pneg %p5006_p9 }
  0x4e   : > { %p5013_p0 = por %p5012_p12, %p5011_p7 }
  0x50   : > { %p5014_p5 = pnand %p5013_p0, %p5007_p13 }
  0x52   : > { %5017 = shalt.err (!%p5014_p5)
}
  0x53   : > { %s5018_s20 = scalar_lea.vmem %s5375_s21, 1536  ;;  %s5164_s3 = smov [#allocation6]  }
  0x54   : > { %p5019_p10 = scmp.ne.s32.totalorder %s5375_s21, %s5018_s20  ;;  %s5023_s25 = sshll.u32 %s5164_s3, 4  ;;  %s5024_s25 = int_to_ptr.vmem [resolvable:$false] %s5023_s25 }
  0x55   : > { %s5025_s18 = scalar_lea.vmem %s5024_s25, 3072  ;;  %p5026_p4 = scmp.lt.s32.totalorder %s5375_s21, %s5024_s25 }
  0x56   : > { %p5021_p3 = pnand %p5019_p10, %p5005_p6  ;;  %p5027_p2 = scmp.lt.s32.totalorder %s5025_s18, %s5018_s20 }
  0x58   : > { %p5022_p9 = pneg %p5021_p3  ;;  %p5028_p11 = por %p5027_p2, %p5026_p4 }
  0x5a   : > { %p5029_p7 = pnand %p5028_p11, %p5022_p9 }
  0x5c   : > { %5032 = shalt.err (!%p5029_p7)
}
  0x5d   : > { %s7976_s29 = smov 8   ;;  %s7977_s23 = smov 128  }
  0x5e   : > { %4864 = dma.hbm_to_vmem [thread:$0]  (!%p5361_p1), %s5373_s0, 1536, %s5375_s21, %s5377_s22, %s7977_s23, %s7977_s23, %s7976_s29  }
  0x5f   : > { %173 = sbr.rel (%p5325_p8) target bundleno = 1478 (0x5c6), region = 28 }
  0x66   : > { %s5411_s4 = sand.u32 1, %s5135_s13   ;;  %p7978_p4 = scmp.ne.s32.totalorder %s7964_s26, 0 }
  0x67   : > { %s3961_s5 = sshll.u32 %s5411_s4, 8  ;;  %s176_s6 = scalar_lea.sflag [#allocation4], %s5411_s4 }
  0x68   : > { %s5415_s20 = scalar_lea.vmem [#allocation3], %s3961_s5 }
  0x69   : > { %5106 = dma.done.wait (%p7978_p4), %s176_s6, 4096  }
  0x6a   : > { %5108 = vsyncadd (%p7978_p4), %s176_s6, 4294963200  ;;  %s184_s0 = sand.u32 1, %s5123_s10   ;;  %p7979_p8 = scmp.ne.s32.totalorder %s7972_s8, 0 }
  0x6b   : > { %s4851_s22 = smul.u32 96, %s184_s0  ;;  %s185_s30 = scalar_lea.sflag [#allocation7], %s184_s0 }
  0x6d   : > { %s5422_s7 = scalar_lea.vmem [#allocation6], %s4851_s22 }
  0x6e   : > { %5110 = dma.done.wait (%p7979_p8), %s185_s30, 1536  }
  0x6f   : > { %5112 = vsyncadd (%p7979_p8), %s185_s30, 4294965760  ;;  %s5428_s21 = scalar_lea.vmem [#allocation8], %s3961_s5  ;;  %p3963_p1 = scmp.ne.s32.totalorder %s5143_s15, 0 }
  0x70   : > { %vm218_vm0 = vcmask (!%p3963_p1), 31744   ;;  %vm221_vm1 = vcmask (!%p3963_p1), 25600   ;;  %v274_v0 = vld [vmem:[%s5415_s20] sm:$0xff] (!%p3963_p1)  ;;  %v275_v1 = vld [vmem:[%s5415_s20 + $0x8] sm:$0xff] (!%p3963_p1)  ;;  %v276_v2 = vld [vmem:[%s5415_s20 + $0x10] sm:$0xff] (!%p3963_p1)  ;;  %v5165_v3 = vmov (!%p3963_p1), 0.0  }
  0x71   : > { %217 = sbr.rel (%p3963_p1) target bundleno = 156 (0x9c), region = 40  ;;  %219 = vst.msk [vmem:[#allocation2] sm:$0xff] (!%p3963_p1), %vm218_vm0, %v5165_v3  ;;  %220 = vst.msk [vmem:[#allocation2 + $0x8] sm:$0xff] (!%p3963_p1), %vm218_vm0, %v5165_v3  ;;  %v277_v4 = vld [vmem:[%s5415_s20 + $0x18] sm:$0xff] (!%p3963_p1)  ;;  %v278_v5 = vld [vmem:[%s5415_s20 + $0x20] sm:$0xff] (!%p3963_p1) }
  0x72   : > { %223 = vst.msk [vmem:[#allocation2 + $0x18] sm:$0xff] (!%p3963_p1), %vm218_vm0, %v5165_v3  ;;  %224 = vst.msk [vmem:[#allocation2 + $0x20] sm:$0xff] (!%p3963_p1), %vm218_vm0, %v5165_v3  ;;  %v279_v6 = vld [vmem:[%s5415_s20 + $0x28] sm:$0xff] (!%p3963_p1)  ;;  %v280_v7 = vld [vmem:[%s5415_s20 + $0x30] sm:$0xff] (!%p3963_p1) }
  0x73   : > { %226 = vst.msk [vmem:[#allocation2 + $0x30] sm:$0xff] (!%p3963_p1), %vm218_vm0, %v5165_v3  ;;  %227 = vst.msk [vmem:[#allocation2 + $0x38] sm:$0xff] (!%p3963_p1), %vm218_vm0, %v5165_v3  ;;  %v281_v8 = vld [vmem:[%s5415_s20 + $0x38] sm:$0xff] (!%p3963_p1)  ;;  %v282_v9 = vld [vmem:[%s5415_s20 + $0x40] sm:$0xff] (!%p3963_p1) }
  0x74   : > { %229 = vst.msk [vmem:[#allocation2 + $0x48] sm:$0xff] (!%p3963_p1), %vm218_vm0, %v5165_v3  ;;  %230 = vst.msk [vmem:[#allocation2 + $0x50] sm:$0xff] (!%p3963_p1), %vm218_vm0, %v5165_v3  ;;  %v283_v10 = vld [vmem:[%s5415_s20 + $0x48] sm:$0xff] (!%p3963_p1)  ;;  %v284_v11 = vld [vmem:[%s5415_s20 + $0x50] sm:$0xff] (!%p3963_p1) }
  0x75   : > { %232 = vst.msk [vmem:[#allocation2 + $0x60] sm:$0xff] (!%p3963_p1), %vm218_vm0, %v5165_v3  ;;  %233 = vst.msk [vmem:[#allocation2 + $0x68] sm:$0xff] (!%p3963_p1), %vm218_vm0, %v5165_v3  ;;  %v285_v12 = vld [vmem:[%s5415_s20 + $0x58] sm:$0xff] (!%p3963_p1)  ;;  %v286_v13 = vld [vmem:[%s5415_s20 + $0x60] sm:$0xff] (!%p3963_p1) }
  0x76   : > { %235 = vst.msk [vmem:[#allocation2 + $0x78] sm:$0xff] (!%p3963_p1), %vm218_vm0, %v5165_v3  ;;  %236 = vst.msk [vmem:[#allocation2 + $0x80] sm:$0xff] (!%p3963_p1), %vm218_vm0, %v5165_v3  ;;  %v287_v14 = vld [vmem:[%s5415_s20 + $0x68] sm:$0xff] (!%p3963_p1)  ;;  %v288_v15 = vld [vmem:[%s5415_s20 + $0x70] sm:$0xff] (!%p3963_p1) }
  0x77   : > { %238 = vst.msk [vmem:[#allocation2 + $0x90] sm:$0xff] (!%p3963_p1), %vm218_vm0, %v5165_v3  ;;  %239 = vst.msk [vmem:[#allocation2 + $0x98] sm:$0xff] (!%p3963_p1), %vm218_vm0, %v5165_v3  ;;  %v289_v16 = vld [vmem:[%s5415_s20 + $0x78] sm:$0xff] (!%p3963_p1)  ;;  %v290_v17 = vld [vmem:[%s5415_s20 + $0x80] sm:$0xff] (!%p3963_p1) }
  0x78   : > { %241 = vst.msk [vmem:[#allocation2 + $0xa8] sm:$0xff] %vm218_vm0, %v5165_v3  ;;  %242 = vst.msk [vmem:[#allocation2 + $0xb0] sm:$0xff] %vm218_vm0, %v5165_v3  ;;  %v291_v18 = vld [vmem:[%s5415_s20 + $0x88] sm:$0xff]  ;;  %v292_v19 = vld [vmem:[%s5415_s20 + $0x90] sm:$0xff] }
  0x79   : > { %244 = vst.msk [vmem:[#allocation2 + $0xc0] sm:$0xff] %vm218_vm0, %v5165_v3  ;;  %245 = vst.msk [vmem:[#allocation2 + $0xc8] sm:$0xff] %vm218_vm0, %v5165_v3  ;;  %v293_v20 = vld [vmem:[%s5415_s20 + $0x98] sm:$0xff]  ;;  %v294_v21 = vld [vmem:[%s5415_s20 + $0xa0] sm:$0xff] }
  0x7a   : > { %247 = vst.msk [vmem:[#allocation2 + $0xd8] sm:$0xff] %vm218_vm0, %v5165_v3  ;;  %248 = vst.msk [vmem:[#allocation2 + $0xe0] sm:$0xff] %vm218_vm0, %v5165_v3  ;;  %v295_v22 = vld [vmem:[%s5415_s20 + $0xa8] sm:$0xff]  ;;  %v296_v23 = vld [vmem:[%s5415_s20 + $0xb0] sm:$0xff] }
  0x7b   : > { %250 = vst.msk [vmem:[#allocation2 + $0xf0] sm:$0xff] %vm218_vm0, %v5165_v3  ;;  %251 = vst.msk [vmem:[#allocation2 + $0xf8] sm:$0xff] %vm218_vm0, %v5165_v3  ;;  %v297_v24 = vld [vmem:[%s5415_s20 + $0xb8] sm:$0xff]  ;;  %v298_v25 = vld [vmem:[%s5415_s20 + $0xc0] sm:$0xff] }
  0x7c   : > { %253 = vst.msk [vmem:[#allocation2 + $0x108] sm:$0xff] %vm218_vm0, %v5165_v3  ;;  %254 = vst.msk [vmem:[#allocation2 + $0x110] sm:$0xff] %vm218_vm0, %v5165_v3  ;;  %v299_v26 = vld [vmem:[%s5415_s20 + $0xc8] sm:$0xff]  ;;  %v300_v27 = vld [vmem:[%s5415_s20 + $0xd0] sm:$0xff] }
  0x7d   : > { %256 = vst.msk [vmem:[#allocation2 + $0x120] sm:$0xff] %vm218_vm0, %v5165_v3  ;;  %257 = vst.msk [vmem:[#allocation2 + $0x128] sm:$0xff] %vm218_vm0, %v5165_v3  ;;  %v301_v28 = vld [vmem:[%s5415_s20 + $0xd8] sm:$0xff]  ;;  %v302_v29 = vld [vmem:[%s5415_s20 + $0xe0] sm:$0xff] }
  0x7e   : > { %259 = vst.msk [vmem:[#allocation2 + $0x138] sm:$0xff] %vm218_vm0, %v5165_v3  ;;  %260 = vst.msk [vmem:[#allocation2 + $0x140] sm:$0xff] %vm218_vm0, %v5165_v3  ;;  %v303_v30 = vld [vmem:[%s5415_s20 + $0xe8] sm:$0xff]  ;;  %v304_v31 = vld [vmem:[%s5415_s20 + $0xf0] sm:$0xff] }
  0x7f   : > { %262 = vst.msk [vmem:[#allocation2 + $0x150] sm:$0xff] %vm218_vm0, %v5165_v3  ;;  %263 = vst.msk [vmem:[#allocation2 + $0x158] sm:$0xff] %vm218_vm0, %v5165_v3  ;;  %v305_v32 = vld [vmem:[%s5415_s20 + $0xf8] sm:$0xff] }
  0x80   : > { %265 = vst.msk [vmem:[#allocation2 + $0x168] sm:$0xff] %vm218_vm0, %v5165_v3  ;;  %266 = vst.msk [vmem:[#allocation2 + $0x170] sm:$0xff] %vm218_vm0, %v5165_v3 }
  0x81   : > { %268 = vst.msk [vmem:[#allocation2 + $0x180] sm:$0xff] %vm218_vm0, %v5165_v3  ;;  %269 = vst.msk [vmem:[#allocation2 + $0x188] sm:$0xff] %vm218_vm0, %v5165_v3 }
  0x82   : > { %271 = vst.msk [vmem:[#allocation2 + $0x198] sm:$0xff] %vm218_vm0, %v5165_v3  ;;  %272 = vst.msk [vmem:[#allocation2 + $0x1a0] sm:$0xff] %vm218_vm0, %v5165_v3 }
  0x83   : > { %222 = vst.msk [vmem:[#allocation2 + $0x10] sm:$0x3] %vm221_vm1, %v5165_v3  ;;  %225 = vst.msk [vmem:[#allocation2 + $0x28] sm:$0x3] %vm221_vm1, %v5165_v3 }
  0x84   : > { %228 = vst.msk [vmem:[#allocation2 + $0x40] sm:$0x3] %vm221_vm1, %v5165_v3  ;;  %231 = vst.msk [vmem:[#allocation2 + $0x58] sm:$0x3] %vm221_vm1, %v5165_v3 }
  0x85   : > { %234 = vst.msk [vmem:[#allocation2 + $0x70] sm:$0x3] %vm221_vm1, %v5165_v3  ;;  %237 = vst.msk [vmem:[#allocation2 + $0x88] sm:$0x3] %vm221_vm1, %v5165_v3 }
  0x86   : > { %240 = vst.msk [vmem:[#allocation2 + $0xa0] sm:$0x3] %vm221_vm1, %v5165_v3  ;;  %243 = vst.msk [vmem:[#allocation2 + $0xb8] sm:$0x3] %vm221_vm1, %v5165_v3 }
  0x87   : > { %246 = vst.msk [vmem:[#allocation2 + $0xd0] sm:$0x3] %vm221_vm1, %v5165_v3  ;;  %249 = vst.msk [vmem:[#allocation2 + $0xe8] sm:$0x3] %vm221_vm1, %v5165_v3 }
  0x88   : > { %252 = vst.msk [vmem:[#allocation2 + $0x100] sm:$0x3] %vm221_vm1, %v5165_v3  ;;  %255 = vst.msk [vmem:[#allocation2 + $0x118] sm:$0x3] %vm221_vm1, %v5165_v3 }
  0x89   : > { %258 = vst.msk [vmem:[#allocation2 + $0x130] sm:$0x3] %vm221_vm1, %v5165_v3  ;;  %261 = vst.msk [vmem:[#allocation2 + $0x148] sm:$0x3] %vm221_vm1, %v5165_v3 }
  0x8a   : > { %264 = vst.msk [vmem:[#allocation2 + $0x160] sm:$0x3] %vm221_vm1, %v5165_v3  ;;  %267 = vst.msk [vmem:[#allocation2 + $0x178] sm:$0x3] %vm221_vm1, %v5165_v3 }
  0x8b   : > { %270 = vst.msk [vmem:[#allocation2 + $0x190] sm:$0x3] %vm221_vm1, %v5165_v3  ;;  %273 = vst.msk [vmem:[#allocation2 + $0x1a8] sm:$0x3] %vm221_vm1, %v5165_v3 }
  0x8c   : > { %306 = vst.msk [vmem:[%s5428_s21] sm:$0xff] %vm218_vm0, %v274_v0  ;;  %307 = vst.msk [vmem:[%s5428_s21 + $0x8] sm:$0xff] %vm218_vm0, %v275_v1 }
  0x8d   : > { %308 = vst.msk [vmem:[%s5428_s21 + $0x10] sm:$0xff] %vm218_vm0, %v276_v2  ;;  %309 = vst.msk [vmem:[%s5428_s21 + $0x18] sm:$0xff] %vm218_vm0, %v277_v4 }
  0x8e   : > { %310 = vst.msk [vmem:[%s5428_s21 + $0x20] sm:$0xff] %vm218_vm0, %v278_v5  ;;  %311 = vst.msk [vmem:[%s5428_s21 + $0x28] sm:$0xff] %vm218_vm0, %v279_v6 }
  0x8f   : > { %312 = vst.msk [vmem:[%s5428_s21 + $0x30] sm:$0xff] %vm218_vm0, %v280_v7  ;;  %313 = vst.msk [vmem:[%s5428_s21 + $0x38] sm:$0xff] %vm218_vm0, %v281_v8 }
  0x90   : > { %314 = vst.msk [vmem:[%s5428_s21 + $0x40] sm:$0xff] %vm218_vm0, %v282_v9  ;;  %315 = vst.msk [vmem:[%s5428_s21 + $0x48] sm:$0xff] %vm218_vm0, %v283_v10 }
  0x91   : > { %316 = vst.msk [vmem:[%s5428_s21 + $0x50] sm:$0xff] %vm218_vm0, %v284_v11  ;;  %317 = vst.msk [vmem:[%s5428_s21 + $0x58] sm:$0xff] %vm218_vm0, %v285_v12 }
  0x92   : > { %318 = vst.msk [vmem:[%s5428_s21 + $0x60] sm:$0xff] %vm218_vm0, %v286_v13  ;;  %319 = vst.msk [vmem:[%s5428_s21 + $0x68] sm:$0xff] %vm218_vm0, %v287_v14 }
  0x93   : > { %320 = vst.msk [vmem:[%s5428_s21 + $0x70] sm:$0xff] %vm218_vm0, %v288_v15  ;;  %321 = vst.msk [vmem:[%s5428_s21 + $0x78] sm:$0xff] %vm218_vm0, %v289_v16 }
  0x94   : > { %322 = vst.msk [vmem:[%s5428_s21 + $0x80] sm:$0xff] %vm218_vm0, %v290_v17  ;;  %323 = vst.msk [vmem:[%s5428_s21 + $0x88] sm:$0xff] %vm218_vm0, %v291_v18 }
  0x95   : > { %324 = vst.msk [vmem:[%s5428_s21 + $0x90] sm:$0xff] %vm218_vm0, %v292_v19  ;;  %325 = vst.msk [vmem:[%s5428_s21 + $0x98] sm:$0xff] %vm218_vm0, %v293_v20 }
  0x96   : > { %326 = vst.msk [vmem:[%s5428_s21 + $0xa0] sm:$0xff] %vm218_vm0, %v294_v21  ;;  %327 = vst.msk [vmem:[%s5428_s21 + $0xa8] sm:$0xff] %vm218_vm0, %v295_v22 }
  0x97   : > { %328 = vst.msk [vmem:[%s5428_s21 + $0xb0] sm:$0xff] %vm218_vm0, %v296_v23  ;;  %329 = vst.msk [vmem:[%s5428_s21 + $0xb8] sm:$0xff] %vm218_vm0, %v297_v24 }
  0x98   : > { %330 = vst.msk [vmem:[%s5428_s21 + $0xc0] sm:$0xff] %vm218_vm0, %v298_v25  ;;  %331 = vst.msk [vmem:[%s5428_s21 + $0xc8] sm:$0xff] %vm218_vm0, %v299_v26 }
  0x99   : > { %332 = vst.msk [vmem:[%s5428_s21 + $0xd0] sm:$0xff] %vm218_vm0, %v300_v27  ;;  %333 = vst.msk [vmem:[%s5428_s21 + $0xd8] sm:$0xff] %vm218_vm0, %v301_v28 }
  0x9a   : > { %334 = vst.msk [vmem:[%s5428_s21 + $0xe0] sm:$0xff] %vm218_vm0, %v302_v29  ;;  %335 = vst.msk [vmem:[%s5428_s21 + $0xe8] sm:$0xff] %vm218_vm0, %v303_v30 }
  0x9b   : > { %336 = vst.msk [vmem:[%s5428_s21 + $0xf0] sm:$0xff] %vm218_vm0, %v304_v31  ;;  %337 = vst.msk [vmem:[%s5428_s21 + $0xf8] sm:$0xff] %vm218_vm0, %v305_v32 }
  0x9c PF: > { %v5582_v33 = vld [vmem:[%s5428_s21] sm:$0xff]  ;;  %v5585_v34 = vld [vmem:[%s5428_s21 + $0x8] sm:$0xff]  ;;  %vm383_vm2 = vcmask 31744   ;;  %v5592_v35 = vld [vmem:[%s5428_s21 + $0x10] sm:$0xff]  ;;  %vm723_vm3 = vcmask 1045504   ;;  %vm524_vm4 = vcmask 1046528  }
  0x9d   : > { %384 = vst.msk [vmem:[#allocation2 + $0x19] sm:$0xff] %vm383_vm2, %v5582_v33  ;;  %385 = vst.msk [vmem:[#allocation2 + $0x21] sm:$0xff] %vm383_vm2, %v5585_v34  ;;  %v5595_v36 = vld [vmem:[%s5428_s21 + $0x18] sm:$0xff]  ;;  %v5598_v37 = vld [vmem:[%s5428_s21 + $0x20] sm:$0xff]  ;;  %s5166_s15 = smov 8   ;;  %s5167_s26 = smov 4  }
  0x9e   : > { %386 = vst.msk [vmem:[#allocation2 + $0x31] sm:$0xff] %vm383_vm2, %v5592_v35  ;;  %387 = vst.msk [vmem:[#allocation2 + $0x39] sm:$0xff] %vm383_vm2, %v5595_v36  ;;  %v5605_v38 = vld [vmem:[%s5428_s21 + $0x28] sm:$0xff]  ;;  %v5610_v39 = vld [vmem:[%s5428_s21 + $0x30] sm:$0xff]  ;;  %vm1092_vm5 = vcmask 1043456   ;;  %vm5168_vm6 = vmmov 1  }
  0x9f   : > { %388 = vst.msk [vmem:[#allocation2 + $0x49] sm:$0xff] %vm383_vm2, %v5598_v37  ;;  %v5613_v40 = vld [vmem:[%s5428_s21 + $0x38] sm:$0xff]  ;;  %389 = vst.msk [vmem:[#allocation2 + $0x51] sm:$0xff] %vm383_vm2, %v5605_v38  ;;  %v5622_v41 = vld [vmem:[%s5428_s21 + $0x40] sm:$0xff]  ;;  %vm958_vm8 = vcmask 64512   ;;  %vm995_vm9 = vcmask 97280  }
  0xa0   : > { %7980 = vst [vmem:[#allocation15_spill] sm:$0xff] %v5613_v40  ;;  %390 = vst.msk [vmem:[#allocation2 + $0x61] sm:$0xff] %vm383_vm2, %v5610_v39  ;;  %v5625_v42 = vld [vmem:[%s5428_s21 + $0x48] sm:$0xff]  ;;  %v5628_v43 = vld [vmem:[%s5428_s21 + $0x50] sm:$0xff]  ;;  %s4168_s8 = sshll.u32 %s5147_s16, 12  ;;  %s3845_s16 = sshll.u32 %s5428_s21, 4  ;;  %s7843_s16 = int_to_ptr.vmem [resolvable:$true] %s3845_s16 }
  0xa1   : > { %391 = vst.msk [vmem:[#allocation2 + $0x69] sm:$0xff] %vm383_vm2, %v5613_v40  ;;  %7981 = vst [vmem:[#allocation16_spill] sm:$0xff] %v5622_v41  ;;  %v5635_v44 = vld [vmem:[%s5428_s21 + $0x58] sm:$0xff]  ;;  %v5640_v45 = vld [vmem:[%s5428_s21 + $0x60] sm:$0xff]  ;;  %s7829_s18 = scalar_lea.hbm %s7925_s2, %s4168_s8  ;;  %s3832_s29 = scalar_lea.sflag [#allocation5], %s5411_s4 }
  0xa2   : > { %7982 = vst [vmem:[#allocation17_spill] sm:$0xff] %v5625_v42  ;;  %7983 = vst [vmem:[#allocation18_spill] sm:$0xff] %v5628_v43  ;;  %v5643_v46 = vld [vmem:[%s5428_s21 + $0x68] sm:$0xff]  ;;  %v5652_v47 = vld [vmem:[%s5428_s21 + $0x70] sm:$0xff]  ;;  %s5033_s23 = scalar_lea.vmem %s7843_s16, 4096  ;;  %p8030_p13 = scmp.ne.s32.totalorder %s7965_s27, 0 }
  0xa3   : > { %392 = vst.msk [vmem:[#allocation2 + $0x79] sm:$0xff] %vm383_vm2, %v5622_v41  ;;  %393 = vst.msk [vmem:[#allocation2 + $0x81] sm:$0xff] %vm383_vm2, %v5625_v42  ;;  %v5655_v48 = vld [vmem:[%s5428_s21 + $0x78] sm:$0xff]  ;;  %v5658_v49 = vld [vmem:[%s5428_s21 + $0x80] sm:$0xff]  ;;  %p5034_p6 = scmp.ne.s32.totalorder %s7843_s16, %s5033_s23  ;;  %s5169_s5 = smov [#allocation8]  }
  0xa4   : > { %7984 = vst [vmem:[#allocation19_spill] sm:$0xff] %v5635_v44  ;;  %394 = vst.msk [vmem:[#allocation2 + $0x91] sm:$0xff] %vm383_vm2, %v5628_v43  ;;  %v5665_v50 = vld [vmem:[%s5428_s21 + $0x88] sm:$0xff]  ;;  %v5670_v51 = vld [vmem:[%s5428_s21 + $0x90] sm:$0xff]  ;;  %s5037_s6 = sshll.u32 %s5169_s5, 4  ;;  %s5038_s6 = int_to_ptr.vmem [resolvable:$false] %s5037_s6 }
  0xa5   : > { %7985 = vst [vmem:[#allocation20_spill] sm:$0xff] %v5640_v45  ;;  %7986 = vst [vmem:[#allocation21_spill] sm:$0xff] %v5643_v46  ;;  %v5673_v52 = vld [vmem:[%s5428_s21 + $0x98] sm:$0xff]  ;;  %v5682_v53 = vld [vmem:[%s5428_s21 + $0xa0] sm:$0xff]  ;;  %p5035_p12 = pnand %p5034_p6, %p8030_p13  ;;  %s5039_s20 = scalar_lea.vmem %s5038_s6, 8192 }
  0xa6   : > { %395 = vst.msk [vmem:[#allocation2 + $0x99] sm:$0xff] %vm383_vm2, %v5635_v44  ;;  %396 = vst.msk [vmem:[#allocation2 + $0xa9] sm:$0xff] %vm383_vm2, %v5640_v45  ;;  %v5685_v54 = vld [vmem:[%s5428_s21 + $0xa8] sm:$0xff]  ;;  %v5688_v55 = vld [vmem:[%s5428_s21 + $0xb0] sm:$0xff]  ;;  %p5040_p5 = scmp.lt.s32.totalorder %s7843_s16, %s5038_s6  ;;  %p5041_p10 = scmp.lt.s32.totalorder %s5039_s20, %s5033_s23 }
  0xa7   : > { %397 = vst.msk [vmem:[#allocation2 + $0xb1] sm:$0xff] %vm383_vm2, %v5643_v46  ;;  %7987 = vst [vmem:[#allocation22_spill] sm:$0xff] %v5652_v47  ;;  %v5690_v56 = vld [vmem:[#allocation2 + $0x18] sm:$0xff]  ;;  %v5692_v57 = vld [vmem:[#allocation2 + $0x20] sm:$0xff]  ;;  %p5036_p0 = pneg %p5035_p12 }
  0xa8   : > { %7988 = vst [vmem:[#allocation23_spill] sm:$0xff] %v5655_v48  ;;  %7989 = vst [vmem:[#allocation24_spill] sm:$0xff] %v5658_v49  ;;  %v421_v58 = vld [vmem:[#allocation2 + $0x28] sm:$0x3]  ;;  %v729_v59 = vrot.slane %v5690_v56, 2  ;;  %v730_v60 = vrot.slane %v5692_v57, 2  ;;  %p5042_p3 = por %p5041_p10, %p5040_p5 }
  0xa9   : > { %398 = vst.msk [vmem:[#allocation2 + $0xc1] sm:$0xff] %vm383_vm2, %v5652_v47  ;;  %399 = vst.msk [vmem:[#allocation2 + $0xc9] sm:$0xff] %vm383_vm2, %v5655_v48  ;;  %v530_v61 = vrot.slane %v5690_v56, 1  ;;  %v531_v62 = vrot.slane %v5692_v57, 1  ;;  %v5704_v63 = vld [vmem:[#allocation2 + $0x38] sm:$0xff]  ;;  %v732_v0 = vrot.slane %v421_v58, 2 }
  0xaa   : > { %7990 = vst [vmem:[#allocation25_spill] sm:$0xff] %v5665_v50  ;;  %400 = vst.msk [vmem:[#allocation2 + $0xd9] sm:$0xff] %vm383_vm2, %v5658_v49  ;;  %v533_v1 = vrot.slane %v421_v58, 1  ;;  %v424_v2 = vld [vmem:[#allocation2 + $0x40] sm:$0x3]  ;;  %v5706_v3 = vld [vmem:[#allocation2 + $0x30] sm:$0xff]  ;;  %v731_v4 = vsel %vm723_vm3, %v729_v59, %v730_v60  ;;  %p5043_p9 = pnand %p5042_p3, %p5036_p0 }
  0xab   : > { %7991 = vst [vmem:[#allocation26_spill] sm:$0xff] %v5670_v51  ;;  %7992 = vst [vmem:[#allocation27_spill] sm:$0xff] %v5673_v52  ;;  %v532_v5 = vsel %vm524_vm4, %v530_v61, %v531_v62  ;;  %818 = vrot.lane.b32.xlu1 %v731_v4, %s5166_s15  ;;  %v536_v6 = vrot.slane %v5704_v63, 1  ;;  %v733_v7 = vsel %vm723_vm3, %v730_v60, %v732_v0  ;;  %v538_v9 = vrot.slane %v424_v2, 1  ;;  %v5722_v16 = vld [vmem:[#allocation2 + $0x50] sm:$0xff]  ;;  %v5724_v18 = vld [vmem:[#allocation2 + $0x48] sm:$0xff] }
  0xac   : > { %401 = vst.msk [vmem:[#allocation2 + $0xe1] sm:$0xff] %vm383_vm2, %v5665_v50  ;;  %402 = vst.msk [vmem:[#allocation2 + $0xf1] sm:$0xff] %vm383_vm2, %v5670_v51  ;;  %619 = vrot.lane.b32.xlu0 %v532_v5, %s5167_s26  ;;  %v534_v8 = vsel %vm524_vm4, %v531_v62, %v533_v1  ;;  %v535_v10 = vrot.slane %v5706_v3, 1  ;;  %v735_v11 = vrot.slane %v5704_v63, 2  ;;  %v737_v14 = vrot.slane %v424_v2, 2  ;;  %v5733_v24 = vld [vmem:[%s5428_s21 + $0xb8] sm:$0xff] }
  0xad   : > { %403 = vst.msk [vmem:[#allocation2 + $0xf9] sm:$0xff] %vm383_vm2, %v5673_v52  ;;  %7993 = vst [vmem:[#allocation28_spill] sm:$0xff] %v5682_v53  ;;  %v539_v12 = vsel %vm524_vm4, %v536_v6, %v538_v9  ;;  %v734_v15 = vrot.slane %v5706_v3, 2  ;;  %v427_v17 = vld [vmem:[#allocation2 + $0x58] sm:$0x3]  ;;  %v541_v19 = vrot.slane %v5722_v16, 1 }
  0xae   : > { %7994 = vst [vmem:[#allocation29_spill] sm:$0xff] %v5685_v54  ;;  %7995 = vst [vmem:[#allocation30_spill] sm:$0xff] %v5688_v55  ;;  %v537_v13 = vsel %vm524_vm4, %v535_v10, %v536_v6  ;;  %v738_v20 = vsel %vm723_vm3, %v735_v11, %v737_v14  ;;  %v543_v22 = vrot.slane %v427_v17, 1  ;;  %v540_v23 = vrot.slane %v5724_v18, 1  ;;  %v5736_v25 = vld [vmem:[%s5428_s21 + $0xc0] sm:$0xff]  ;;  %v5741_v26 = vld [vmem:[%s5428_s21 + $0xc8] sm:$0xff] }
  0xaf   : > { %404 = vst.msk [vmem:[#allocation2 + $0x109] sm:$0xff] %vm383_vm2, %v5682_v53  ;;  %405 = vst.msk [vmem:[#allocation2 + $0x111] sm:$0xff] %vm383_vm2, %v5685_v54  ;;  %820 = vrot.lane.b32.xlu1 %v733_v7, %s5166_s15  ;;  %v736_v21 = vsel %vm723_vm3, %v734_v15, %v735_v11  ;;  %v5746_v27 = vld [vmem:[%s5428_s21 + $0xd0] sm:$0xff]  ;;  %v5749_v28 = vld [vmem:[%s5428_s21 + $0xd8] sm:$0xff]  ;;  %v740_v31 = vrot.slane %v5722_v16, 2  ;;  %v742_v60 = vrot.slane %v427_v17, 2 }
  0xb0   : > { %406 = vst.msk [vmem:[#allocation2 + $0x121] sm:$0xff] %vm383_vm2, %v5688_v55  ;;  %621 = vrot.lane.b32.xlu0 %v534_v8, %s5167_s26  ;;  %7996 = vst [vmem:[#allocation31_spill] sm:$0xff] %v5733_v24  ;;  %v5758_v29 = vld [vmem:[%s5428_s21 + $0xe0] sm:$0xff]  ;;  %v5761_v30 = vld [vmem:[%s5428_s21 + $0xe8] sm:$0xff]  ;;  %v544_v58 = vsel %vm524_vm4, %v541_v19, %v543_v22  ;;  %v542_v59 = vsel %vm524_vm4, %v540_v23, %v541_v19  ;;  %v739_v61 = vrot.slane %v5724_v18, 2 }
  0xb1   : > { %7997 = vst [vmem:[#allocation32_spill] sm:$0xff] %v5736_v25  ;;  %407 = vst.msk [vmem:[#allocation2 + $0x129] sm:$0xff] %vm383_vm2, %v5733_v24  ;;  %v5771_v32 = vld [vmem:[%s5428_s21 + $0xf0] sm:$0xff]  ;;  %v5776_v62 = vld [vmem:[#allocation2 + $0x68] sm:$0xff]  ;;  %v743_v5 = vsel %vm723_vm3, %v740_v31, %v742_v60 }
  0xb2   : > { %7998 = vst [vmem:[#allocation33_spill] sm:$0xff] %v5741_v26  ;;  %408 = vst.msk [vmem:[#allocation2 + $0x139] sm:$0xff] %vm383_vm2, %v5736_v25  ;;  %v5779_v0 = vld [vmem:[%s5428_s21 + $0xf8] sm:$0xff]  ;;  %v430_v1 = vld [vmem:[#allocation2 + $0x70] sm:$0x3]  ;;  %v546_v4 = vrot.slane %v5776_v62, 1  ;;  %v741_v6 = vsel %vm723_vm3, %v739_v61, %v740_v31 }
  0xb3   : > { %625 = vrot.lane.b32.xlu1 %v539_v12, %s5167_s26  ;;  %7999 = vst [vmem:[#allocation34_spill] sm:$0xff] %v5746_v27  ;;  %8000 = vst [vmem:[#allocation35_spill] sm:$0xff] %v5749_v28  ;;  %v5783_v2 = vld [vmem:[#allocation2 + $0x60] sm:$0xff]  ;;  %v548_v7 = vrot.slane %v430_v1, 1  ;;  %v745_v9 = vrot.slane %v5776_v62, 2  ;;  %v747_v12 = vrot.slane %v430_v1, 2 }
  0xb4   : > { %623 = vrot.lane.b32.xlu0 %v537_v13, %s5167_s26  ;;  %409 = vst.msk [vmem:[#allocation2 + $0x141] sm:$0xff] %vm383_vm2, %v5741_v26  ;;  %410 = vst.msk [vmem:[#allocation2 + $0x151] sm:$0xff] %vm383_vm2, %v5746_v27  ;;  %v545_v8 = vrot.slane %v5783_v2, 1  ;;  %v744_v13 = vrot.slane %v5783_v2, 2  ;;  %v5799_v14 = vld [vmem:[#allocation2 + $0x80] sm:$0xff]  ;;  %v5801_v17 = vld [vmem:[#allocation2 + $0x78] sm:$0xff] }
  0xb5   : > { %411 = vst.msk [vmem:[#allocation2 + $0x159] sm:$0xff] %vm383_vm2, %v5749_v28  ;;  %8001 = vst [vmem:[#allocation36_spill] sm:$0xff] %v5758_v29  ;;  %v549_v10 = vsel %vm524_vm4, %v546_v4, %v548_v7  ;;  %v433_v15 = vld [vmem:[#allocation2 + $0x88] sm:$0x3]  ;;  %v551_v19 = vrot.slane %v5799_v14, 1  ;;  %v550_v23 = vrot.slane %v5801_v17, 1 }
  0xb6   : > { %8002 = vst [vmem:[#allocation37_spill] sm:$0xff] %v5761_v30  ;;  %412 = vst.msk [vmem:[#allocation2 + $0x169] sm:$0xff] %vm383_vm2, %v5758_v29  ;;  %v547_v11 = vsel %vm524_vm4, %v545_v8, %v546_v4  ;;  %v553_v22 = vrot.slane %v433_v15, 1  ;;  %v750_v31 = vrot.slane %v5799_v14, 2  ;;  %v752_v60 = vrot.slane %v433_v15, 2  ;;  %v5815_v1 = vld [vmem:[#allocation2 + $0x98] sm:$0xff] }
  0xb7   : > { %824 = vrot.lane.b32.xlu1 %v738_v20, %s5166_s15  ;;  %413 = vst.msk [vmem:[#allocation2 + $0x171] sm:$0xff] %vm383_vm2, %v5761_v30  ;;  %8003 = vst [vmem:[#allocation38_spill] sm:$0xff] %v5779_v0  ;;  %v748_v20 = vsel %vm723_vm3, %v745_v9, %v747_v12  ;;  %v749_v61 = vrot.slane %v5801_v17, 2  ;;  %v436_v4 = vld [vmem:[#allocation2 + $0xa0] sm:$0x3]  ;;  %v556_v8 = vrot.slane %v5815_v1, 1 }
  0xb8   : > { %822 = vrot.lane.b32.xlu0 %v736_v21, %s5166_s15  ;;  %414 = vst.msk [vmem:[#allocation2 + $0x181] sm:$0xff] %vm383_vm2, %v5771_v32  ;;  %415 = vst.msk [vmem:[#allocation2 + $0x189] sm:$0xff] %vm383_vm2, %v5779_v0  ;;  %v746_v21 = vsel %vm723_vm3, %v744_v13, %v745_v9  ;;  %v341_v7 = vld [vmem:[%s5422_s7 + $0x18] sm:$0xf]  ;;  %v558_v9 = vrot.slane %v436_v4, 1  ;;  %v5913_v27 = vld [vmem:[#allocation2 + $0x110] sm:$0xff] }
  0xb9   : > { %vm5825_vm7 = vmpackc.low %vm1092_vm5, %vm5168_vm6  ;;  %v751_v12 = vsel %vm723_vm3, %v749_v61, %v750_v31  ;;  %v339_v0 = vld [vmem:[%s5422_s7 + $0x8] sm:$0xf]  ;;  %v5929_v25 = vld [vmem:[#allocation2 + $0x128] sm:$0xff] }
  0xba   : > { %v342_v47 = vld [vmem:[%s5422_s7 + $0x20] sm:$0xff]  ;;  %v343_v46 = vld [vmem:[%s5422_s7 + $0x28] sm:$0xf]  ;;  %v6059_v43 = vld [vmem:[#allocation2 + $0x1a0] sm:$0xff] }
  0xbb   : > { %629 = vrot.lane.b32.xlu1 %v544_v58, %s5167_s26  ;;  %v554_v58 = vsel %vm524_vm4, %v551_v19, %v553_v22  ;;  %v757_v22 = vrot.slane %v436_v4, 2  ;;  %v5945_v55 = vld [vmem:[#allocation2 + $0x140] sm:$0xff] }
  0xbc   : > { %627 = vrot.lane.b32.xlu0 %v542_v59, %s5167_s26  ;;  %v552_v59 = vsel %vm524_vm4, %v550_v23, %v551_v19  ;;  %v755_v19 = vrot.slane %v5815_v1, 2  ;;  %v5961_v53 = vld [vmem:[#allocation2 + $0x158] sm:$0xff] }
  0xbe   : > { %v758_v61 = vsel %vm723_vm3, %v755_v19, %v757_v22  ;;  %v5977_v51 = vld [vmem:[#allocation2 + $0x170] sm:$0xff] }
  0xbf   : > { %828 = vrot.lane.b32.xlu1 %v743_v5, %s5166_s15  ;;  %v5817_v5 = vld [vmem:[#allocation2 + $0x90] sm:$0xff]  ;;  %v5993_v49 = vld [vmem:[#allocation2 + $0x188] sm:$0xff] }
  0xc0   : > { %826 = vrot.lane.b32.xlu0 %v741_v6, %s5166_s15  ;;  %v340_v6 = vld [vmem:[%s5422_s7 + $0x10] sm:$0xff]  ;;  %v555_v13 = vrot.slane %v5817_v5, 1  ;;  %v754_v23 = vrot.slane %v5817_v5, 2 }
  0xc1   : > { %v4685_v15 = vpack.c.bf16 %v341_v7, %v340_v6 }
  0xc2   : > { %v756_v4 = vsel %vm723_vm3, %v754_v23, %v755_v19  ;;  %v5860_v19 = vld [vmem:[#allocation2 + $0xc0] sm:$0xff] }
  0xc3   : > { %633 = vrot.lane.b32.xlu1 %v549_v10, %s5167_s26  ;;  %4687 = vmatprep.subr.msk.bf16.mxu0 %vm5825_vm7, %v4685_v15 }
  0xc4   : > { %631 = vrot.lane.b32.xlu0 %v547_v11, %s5167_s26  ;;  %v753_v11 = vsel %vm723_vm3, %v750_v31, %v752_v60  ;;  %v5840_v31 = vld [vmem:[#allocation2 + $0xb0] sm:$0xff]  ;;  %4690 = vmatpush3.bf16.msk.msra.mxu0 %vm5825_vm7, %v4685_v15  ;;  %v5858_v15 = vld [vmem:[#allocation2 + $0xc8] sm:$0xff] }
  0xc5   : > { %v561_v60 = vrot.slane %v5840_v31, 1 }
  0xc7   : > { %832 = vrot.lane.b32.xlu1 %v748_v20, %s5166_s15  ;;  %v559_v20 = vsel %vm524_vm4, %v556_v8, %v558_v9 }
  0xc8   : > { %830 = vrot.lane.b32.xlu0 %v746_v21, %s5166_s15  ;;  %v557_v21 = vsel %vm524_vm4, %v555_v13, %v556_v8  ;;  %v760_v8 = vrot.slane %v5840_v31, 2 }
  0xcb   : > { %637 = vrot.lane.b32.xlu1 %v554_v58, %s5167_s26  ;;  %v439_v58 = vld [vmem:[#allocation2 + $0xb8] sm:$0x3] }
  0xcc   : > { %635 = vrot.lane.b32.xlu0 %v552_v59, %s5167_s26  ;;  %v5844_v59 = vld [vmem:[#allocation2 + $0xa8] sm:$0xff]  ;;  %v563_v6 = vrot.slane %v439_v58, 1 }
  0xcd   : > { %v560_v7 = vrot.slane %v5844_v59, 1  ;;  %v759_v13 = vrot.slane %v5844_v59, 2 }
  0xce   : > { %v564_v9 = vsel %vm524_vm4, %v561_v60, %v563_v6 }
  0xcf   : > { %836 = vrot.lane.b32.xlu1 %v753_v11, %s5166_s15  ;;  %v562_v11 = vsel %vm524_vm4, %v560_v7, %v561_v60  ;;  %v761_v23 = vsel %vm723_vm3, %v759_v13, %v760_v8  ;;  %v765_v60 = vrot.slane %v5858_v15, 2 }
  0xd0   : > { %834 = vrot.lane.b32.xlu0 %v751_v12, %s5166_s15  ;;  %v762_v12 = vrot.slane %v439_v58, 2  ;;  %v565_v58 = vrot.slane %v5860_v19, 1 }
  0xd2   : > { %v763_v22 = vsel %vm723_vm3, %v760_v8, %v762_v12  ;;  %v445_v8 = vld [vmem:[#allocation2 + $0xe8] sm:$0x3]  ;;  %v5876_v12 = vld [vmem:[#allocation2 + $0xd8] sm:$0xff] }
  0xd3   : > { %641 = vrot.lane.b32.xlu1 %v559_v20, %s5167_s26  ;;  %v442_v20 = vld [vmem:[#allocation2 + $0xd0] sm:$0x3]  ;;  %v772_v30 = vrot.slane %v445_v8, 2 }
  0xd4   : > { %639 = vrot.lane.b32.xlu0 %v557_v21, %s5167_s26  ;;  %v566_v21 = vrot.slane %v5858_v15, 1  ;;  %v767_v7 = vrot.slane %v442_v20, 2 }
  0xd6   : > { %v567_v6 = vsel %vm524_vm4, %v565_v58, %v566_v21 }
  0xd7   : > { %840 = vrot.lane.b32.xlu1 %v758_v61, %s5166_s15  ;;  %v568_v61 = vrot.slane %v442_v20, 1 }
  0xd8   : > { %838 = vrot.lane.b32.xlu0 %v756_v4, %s5166_s15 }
  0xd9   : > { %v569_v4 = vsel %vm524_vm4, %v566_v21, %v568_v61  ;;  %v768_v61 = vsel %vm723_vm3, %v765_v60, %v767_v7  ;;  %v570_v21 = vrot.slane %v5876_v12, 1 }
  0xdb   : > { %645 = vrot.lane.b32.xlu1 %v564_v9, %s5167_s26  ;;  %v764_v9 = vrot.slane %v5860_v19, 2 }
  0xdc   : > { %643 = vrot.lane.b32.xlu0 %v562_v11, %s5167_s26  ;;  %v5874_v11 = vld [vmem:[#allocation2 + $0xe0] sm:$0xff] }
  0xdd   : > { %v571_v13 = vrot.slane %v5874_v11, 1  ;;  %v766_v20 = vsel %vm723_vm3, %v764_v9, %v765_v60  ;;  %v769_v60 = vrot.slane %v5876_v12, 2  ;;  %v5897_v9 = vld [vmem:[#allocation2 + $0xf8] sm:$0xff] }
  0xdf   : > { %844 = vrot.lane.b32.xlu1 %v763_v22, %s5166_s15  ;;  %v573_v22 = vrot.slane %v445_v8, 1  ;;  %v572_v7 = vsel %vm524_vm4, %v570_v21, %v571_v13 }
  0xe0   : > { %842 = vrot.lane.b32.xlu0 %v761_v23, %s5166_s15  ;;  %v338_v23 = vld [vmem:[%s5422_s7] sm:$0xff] }
  0xe1   : > { %v5886_v58 = vpack.c.bf16 %v339_v0, %v338_v23  ;;  %v448_v0 = vld [vmem:[#allocation2 + $0x100] sm:$0x3]  ;;  %v5899_v23 = vld [vmem:[#allocation2 + $0xf0] sm:$0xff] }
  0xe2   : > { %v578_v29 = vrot.slane %v448_v0, 1  ;;  %v575_v8 = vrot.slane %v5899_v23, 1  ;;  %v774_v28 = vrot.slane %v5899_v23, 2 }
  0xe3   : > { %649 = vrot.lane.b32.xlu1 %v569_v4, %s5167_s26  ;;  %4693 = vmatprep.subr.msk.bf16.mxu0 %vm5825_vm7, %v5886_v58  ;;  %v770_v4 = vrot.slane %v5874_v11, 2 }
  0xe4   : > { %647 = vrot.lane.b32.xlu0 %v567_v6, %s5167_s26  ;;  %v574_v6 = vsel %vm524_vm4, %v571_v13, %v573_v22  ;;  %v775_v13 = vrot.slane %v5897_v9, 2 }
  0xe5   : > { %v771_v22 = vsel %vm723_vm3, %v769_v60, %v770_v4  ;;  %v581_v60 = vrot.slane %v5913_v27, 1 }
  0xe7   : > { %848 = vrot.lane.b32.xlu1 %v768_v61, %s5166_s15  ;;  %v576_v61 = vrot.slane %v5897_v9, 1 }
  0xe8   : > { %846 = vrot.lane.b32.xlu0 %v766_v20, %s5166_s15  ;;  %v773_v20 = vsel %vm723_vm3, %v770_v4, %v772_v30  ;;  %v451_v30 = vld [vmem:[#allocation2 + $0x118] sm:$0x3]  ;;  %v5915_v4 = vld [vmem:[#allocation2 + $0x108] sm:$0xff] }
  0xe9   : > { %v579_v21 = vsel %vm524_vm4, %v576_v61, %v578_v29  ;;  %v776_v29 = vsel %vm723_vm3, %v774_v28, %v775_v13  ;;  %v779_v26 = vrot.slane %v5915_v4, 2  ;;  %v5931_v28 = vld [vmem:[#allocation2 + $0x120] sm:$0xff] }
  0xea   : > { %v784_v24 = vrot.slane %v5931_v28, 2 }
  0xeb   : > { %653 = vrot.lane.b32.xlu1 %v574_v6, %s5167_s26  ;;  %v577_v6 = vsel %vm524_vm4, %v575_v8, %v576_v61  ;;  %v780_v61 = vrot.slane %v5913_v27, 2 }
  0xec   : > { %651 = vrot.lane.b32.xlu0 %v572_v7, %s5167_s26  ;;  %v777_v7 = vrot.slane %v448_v0, 2  ;;  %v580_v0 = vrot.slane %v5915_v4, 1 }
  0xef   : > { %852 = vrot.lane.b32.xlu1 %v773_v20, %s5166_s15  ;;  %v778_v20 = vsel %vm723_vm3, %v775_v13, %v777_v7  ;;  %v454_v7 = vld [vmem:[#allocation2 + $0x130] sm:$0x3]  ;;  %v586_v13 = vrot.slane %v5929_v25, 1 }
  0xf0   : > { %850 = vrot.lane.b32.xlu0 %v771_v22, %s5166_s15  ;;  %v583_v22 = vrot.slane %v451_v30, 1 }
  0xf2   : > { %v584_v8 = vsel %vm524_vm4, %v581_v60, %v583_v22  ;;  %v588_v22 = vrot.slane %v454_v7, 1 }
  0xf3   : > { %657 = vrot.lane.b32.xlu1 %v579_v21, %s5167_s26  ;;  %v582_v21 = vsel %vm524_vm4, %v580_v0, %v581_v60  ;;  %v785_v60 = vrot.slane %v5929_v25, 2 }
  0xf4   : > { %655 = vrot.lane.b32.xlu0 %v577_v6, %s5167_s26  ;;  %v782_v6 = vrot.slane %v451_v30, 2  ;;  %v585_v30 = vrot.slane %v5931_v28, 1  ;;  %v589_v0 = vsel %vm524_vm4, %v586_v13, %v588_v22 }
  0xf7   : > { %856 = vrot.lane.b32.xlu1 %v778_v20, %s5166_s15  ;;  %v783_v20 = vsel %vm723_vm3, %v780_v61, %v782_v6  ;;  %v457_v6 = vld [vmem:[#allocation2 + $0x148] sm:$0x3] }
  0xf8   : > { %854 = vrot.lane.b32.xlu0 %v776_v29, %s5166_s15  ;;  %v781_v29 = vsel %vm723_vm3, %v779_v26, %v780_v61  ;;  %v5947_v26 = vld [vmem:[#allocation2 + $0x138] sm:$0xff]  ;;  %v591_v61 = vrot.slane %v5945_v55, 1  ;;  %v593_v22 = vrot.slane %v457_v6, 1 }
  0xf9   : > { %v789_v54 = vrot.slane %v5947_v26, 2 }
  0xfb   : > { %661 = vrot.lane.b32.xlu1 %v584_v8, %s5167_s26  ;;  %v587_v8 = vsel %vm524_vm4, %v585_v30, %v586_v13  ;;  %v790_v13 = vrot.slane %v5945_v55, 2  ;;  %v594_v30 = vsel %vm524_vm4, %v591_v61, %v593_v22 }
  0xfc   : > { %659 = vrot.lane.b32.xlu0 %v582_v21, %s5167_s26  ;;  %v787_v21 = vrot.slane %v454_v7, 2  ;;  %v590_v7 = vrot.slane %v5947_v26, 1 }
  0xff   : > { %860 = vrot.lane.b32.xlu1 %v783_v20, %s5166_s15  ;;  %v788_v20 = vsel %vm723_vm3, %v785_v60, %v787_v21  ;;  %v460_v21 = vld [vmem:[#allocation2 + $0x160] sm:$0x3] }
 0x100   : > { %858 = vrot.lane.b32.xlu0 %v781_v29, %s5166_s15  ;;  %v786_v29 = vsel %vm723_vm3, %v784_v24, %v785_v60  ;;  %v5963_v24 = vld [vmem:[#allocation2 + $0x150] sm:$0xff]  ;;  %v596_v60 = vrot.slane %v5961_v53, 1  ;;  %v598_v22 = vrot.slane %v460_v21, 1 }
 0x101   : > { %v794_v52 = vrot.slane %v5963_v24, 2 }
 0x103   : > { %665 = vrot.lane.b32.xlu1 %v589_v0, %s5167_s26  ;;  %v592_v0 = vsel %vm524_vm4, %v590_v7, %v591_v61  ;;  %v795_v61 = vrot.slane %v5961_v53, 2  ;;  %v599_v7 = vsel %vm524_vm4, %v596_v60, %v598_v22 }
 0x104   : > { %663 = vrot.lane.b32.xlu0 %v587_v8, %s5167_s26  ;;  %v792_v8 = vrot.slane %v457_v6, 2  ;;  %v595_v6 = vrot.slane %v5963_v24, 1 }
 0x107   : > { %864 = vrot.lane.b32.xlu1 %v788_v20, %s5166_s15  ;;  %v793_v20 = vsel %vm723_vm3, %v790_v13, %v792_v8  ;;  %v463_v8 = vld [vmem:[#allocation2 + $0x178] sm:$0x3] }
 0x108   : > { %862 = vrot.lane.b32.xlu0 %v786_v29, %s5166_s15  ;;  %v791_v29 = vsel %vm723_vm3, %v789_v54, %v790_v13  ;;  %v5979_v54 = vld [vmem:[#allocation2 + $0x168] sm:$0xff]  ;;  %v601_v13 = vrot.slane %v5977_v51, 1  ;;  %v603_v22 = vrot.slane %v463_v8, 1 }
 0x109   : > { %v799_v50 = vrot.slane %v5979_v54, 2 }
 0x10b   : > { %669 = vrot.lane.b32.xlu1 %v594_v30, %s5167_s26  ;;  %v597_v30 = vsel %vm524_vm4, %v595_v6, %v596_v60  ;;  %v800_v60 = vrot.slane %v5977_v51, 2  ;;  %v604_v6 = vsel %vm524_vm4, %v601_v13, %v603_v22 }
 0x10c   : > { %667 = vrot.lane.b32.xlu0 %v592_v0, %s5167_s26  ;;  %v797_v0 = vrot.slane %v460_v21, 2  ;;  %v600_v21 = vrot.slane %v5979_v54, 1 }
 0x10f   : > { %868 = vrot.lane.b32.xlu1 %v793_v20, %s5166_s15  ;;  %v798_v20 = vsel %vm723_vm3, %v795_v61, %v797_v0  ;;  %v466_v0 = vld [vmem:[#allocation2 + $0x190] sm:$0x3] }
 0x110   : > { %866 = vrot.lane.b32.xlu0 %v791_v29, %s5166_s15  ;;  %v796_v29 = vsel %vm723_vm3, %v794_v52, %v795_v61  ;;  %v5995_v52 = vld [vmem:[#allocation2 + $0x180] sm:$0xff]  ;;  %v606_v61 = vrot.slane %v5993_v49, 1 }
 0x113   : > { %673 = vrot.lane.b32.xlu1 %v599_v7, %s5167_s26  ;;  %v602_v7 = vsel %vm524_vm4, %v600_v21, %v601_v13  ;;  %v608_v13 = vrot.slane %v466_v0, 1 }
 0x114   : > { %671 = vrot.lane.b32.xlu0 %v597_v30, %s5167_s26  ;;  %v802_v30 = vrot.slane %v463_v8, 2  ;;  %v605_v8 = vrot.slane %v5995_v52, 1 }
 0x117   : > { %872 = vrot.lane.b32.xlu1 %v798_v20, %s5166_s15  ;;  %v803_v20 = vsel %vm723_vm3, %v800_v60, %v802_v30  ;;  %v807_v30 = vrot.slane %v466_v0, 2 }
 0x118   : > { %870 = vrot.lane.b32.xlu0 %v796_v29, %s5166_s15  ;;  %v801_v29 = vsel %vm723_vm3, %v799_v50, %v800_v60  ;;  %v609_v50 = vsel %vm524_vm4, %v606_v61, %v608_v13  ;;  %v607_v60 = vsel %vm524_vm4, %v605_v8, %v606_v61 }
 0x11b   : > { %677 = vrot.lane.b32.xlu1 %v604_v6, %s5167_s26 }
 0x11c   : > { %675 = vrot.lane.b32.xlu0 %v602_v7, %s5167_s26  ;;  %v805_v7 = vrot.slane %v5993_v49, 2 }
 0x11d   : > { %v819_v22 = vpop.permute.xlu1 %818 }
 0x11e   : > { %v620_v21 = vpop.permute.xlu0 %619  ;;  %v808_v61 = vsel %vm723_vm3, %v805_v7, %v807_v30 }
 0x11f   : > { %v924_v48 = vsel %vm383_vm2, %v5690_v56, %v620_v21  ;;  %876 = vrot.lane.b32.xlu1 %v803_v20, %s5166_s15  ;;  %v804_v56 = vrot.slane %v5995_v52, 2  ;;  %v6016_v20 = vld [vmem:[#allocation2 + $0x8] sm:$0xff] }
 0x120   : > { %874 = vrot.lane.b32.xlu0 %v801_v29, %s5166_s15  ;;  %v6008_v6 = vsel %vm958_vm8, %v924_v48, %v819_v22  ;;  %v418_v48 = vld [vmem:[#allocation2 + $0x10] sm:$0x3]  ;;  %v6018_v22 = vld [vmem:[#allocation2] sm:$0xff]  ;;  %v6029_v8 = vrot.slane %v6016_v20, 1 }
 0x121   : > { %4377 = vmatprep.mubr.msk.f32.mxu0 %vm995_vm9, %v6008_v6  ;;  %v821_v29 = vpop.permute.xlu1 %820  ;;  %v806_v45 = vsel %vm723_vm3, %v804_v56, %v805_v7  ;;  %v725_v7 = vrot.slane %v6016_v20, 2  ;;  %v727_v30 = vrot.slane %v418_v48, 2  ;;  %v724_v56 = vrot.slane %v6018_v22, 2 }
 0x122   : > { %v622_v21 = vpop.permute.xlu0 %621 }
 0x123   : > { %v925_v0 = vsel %vm383_vm2, %v5692_v57, %v622_v21  ;;  %681 = vrot.lane.b32.xlu1 %v609_v50, %s5167_s26  ;;  %v528_v57 = vrot.slane %v418_v48, 1  ;;  %v525_v50 = vrot.slane %v6018_v22, 1  ;;  %v6037_v21 = vpack.c.bf16 %v343_v46, %v342_v47  ;;  %v469_v48 = vld [vmem:[#allocation2 + $0x1a8] sm:$0x3] }
 0x124   : > { %679 = vrot.lane.b32.xlu0 %v607_v60, %s5167_s26  ;;  %v6025_v13 = vsel %vm958_vm8, %v925_v0, %v821_v29  ;;  %v812_v40 = vrot.slane %v469_v48, 2 }
 0x125   : > { %4378 = vmatmul.mubr.msk.f32.vlgmr.msra.gmra.mrb[0].mxu0 %vm995_vm9, %v6025_v13  ;;  %v626_v60 = vpop.permute.xlu1 %625  ;;  %v529_v46 = vsel %vm524_vm4, %v6029_v8, %v528_v57  ;;  %v527_v47 = vsel %vm524_vm4, %v525_v50, %v6029_v8 }
 0x126   : > { %v624_v29 = vpop.permute.xlu0 %623  ;;  %4696 = vmatpush3.bf16.msk.msra.mxu0 %vm5825_vm7, %v5886_v58  ;;  %v927_v58 = vsel %vm383_vm2, %v5704_v63, %v626_v60  ;;  %v728_v63 = vsel %vm723_vm3, %v725_v7, %v727_v30 }
 0x127   : > { %4699 = vmatprep.subr.msk.bf16.mxu0 %vm5825_vm7, %v6037_v21  ;;  %880 = vrot.lane.b32.xlu1 %v808_v61, %s5166_s15  ;;  %v926_v0 = vsel %vm383_vm2, %v5706_v3, %v624_v29  ;;  %v726_v3 = vsel %vm723_vm3, %v724_v56, %v725_v7  ;;  %v611_v29 = vrot.slane %v6059_v43, 1  ;;  %v810_v7 = vrot.slane %v6059_v43, 2 }
 0x128   : > { %878 = vrot.lane.b32.xlu0 %v806_v45, %s5166_s15  ;;  %v6057_v45 = vld [vmem:[#allocation2 + $0x198] sm:$0xff] }
 0x129   : > { %v825_v61 = vpop.permute.xlu1 %824  ;;  %v610_v60 = vrot.slane %v6057_v45, 1 }
 0x12a   : > { %v823_v44 = vpop.permute.xlu0 %822  ;;  %v6062_v57 = vsel %vm958_vm8, %v927_v58, %v825_v61 }
 0x12b   : > { %v6065_v50 = vsel %vm958_vm8, %v926_v0, %v823_v44  ;;  %617 = vrot.lane.b32.xlu1 %v529_v46, %s5167_s26  ;;  %v613_v0 = vrot.slane %v469_v48, 1  ;;  %v612_v46 = vsel %vm524_vm4, %v610_v60, %v611_v29  ;;  %v813_v60 = vsel %vm723_vm3, %v810_v7, %v812_v40 }
 0x12c   : > { %615 = vrot.lane.b32.xlu0 %v527_v47, %s5167_s26  ;;  %4380 = vmatprep.mubr.msk.f32.mxu0 %vm995_vm9, %v6065_v50  ;;  %v809_v47 = vrot.slane %v6057_v45, 2 }
 0x12d   : > { %4381 = vmatmul.mubr.msk.f32.gmra.mrb[2].mxu0 %vm995_vm9, %v6062_v57  ;;  %v630_v44 = vpop.permute.xlu1 %629  ;;  %v614_v41 = vsel %vm524_vm4, %v611_v29, %v613_v0 }
 0x12e   : > { %v628_v58 = vpop.permute.xlu0 %627  ;;  %v929_v30 = vsel %vm383_vm2, %v5722_v16, %v630_v44  ;;  %v811_v16 = vsel %vm723_vm3, %v809_v47, %v810_v7 }
 0x12f   : > { %816 = vrot.lane.b32.xlu1 %v728_v63, %s5166_s15  ;;  %v928_v56 = vsel %vm383_vm2, %v5724_v18, %v628_v58 }
 0x130   : > { %814 = vrot.lane.b32.xlu0 %v726_v3, %s5166_s15 }
 0x131   : > { %v829_v61 = vpop.permute.xlu1 %828 }
 0x132   : > { %v827_v42 = vpop.permute.xlu0 %826  ;;  %v6088_v63 = vsel %vm958_vm8, %v929_v30, %v829_v61 }
 0x133   : > { %v6091_v3 = vsel %vm958_vm8, %v928_v56, %v827_v42  ;;  %685 = vrot.lane.b32.xlu1 %v614_v41, %s5167_s26 }
 0x134   : > { %4383 = vmatprep.mubr.msk.f32.mxu0 %vm995_vm9, %v6091_v3  ;;  %683 = vrot.lane.b32.xlu0 %v612_v46, %s5167_s26 }
 0x135   : > { %4384 = vmatmul.mubr.msk.f32.gmra.mrb[4].mxu0 %vm995_vm9, %v6088_v63  ;;  %v634_v18 = vpop.permute.xlu1 %633 }
 0x136   : > { %v632_v48 = vpop.permute.xlu0 %631  ;;  %v931_v42 = vsel %vm383_vm2, %v5776_v62, %v634_v18 }
 0x137   : > { %884 = vrot.lane.b32.xlu1 %v813_v60, %s5166_s15  ;;  %v930_v29 = vsel %vm383_vm2, %v5783_v2, %v632_v48 }
 0x138   : > { %882 = vrot.lane.b32.xlu0 %v811_v16, %s5166_s15 }
 0x139   : > { %v833_v44 = vpop.permute.xlu1 %832 }
 0x13a   : > { %v831_v58 = vpop.permute.xlu0 %830  ;;  %v6108_v41 = vsel %vm958_vm8, %v931_v42, %v833_v44 }
 0x13b   : > { %v6111_v0 = vsel %vm958_vm8, %v930_v29, %v831_v58 }
 0x13c   : > { %4386 = vmatprep.mubr.msk.f32.mxu0 %vm995_vm9, %v6111_v0 }
 0x13d   : > { %4387 = vmatmul.mubr.msk.f32.gmra.mrb[6].mxu0 %vm995_vm9, %v6108_v41  ;;  %v638_v40 = vpop.permute.xlu1 %637 }
 0x13e   : > { %v636_v46 = vpop.permute.xlu0 %635  ;;  %v933_v62 = vsel %vm383_vm2, %v5799_v14, %v638_v40 }
 0x13f   : > { %v932_v2 = vsel %vm383_vm2, %v5801_v17, %v636_v46 }
 0x141   : > { %v837_v47 = vpop.permute.xlu1 %836 }
 0x142   : > { %v835_v7 = vpop.permute.xlu0 %834  ;;  %v6122_v30 = vsel %vm958_vm8, %v933_v62, %v837_v47 }
 0x143   : > { %v6125_v56 = vsel %vm958_vm8, %v932_v2, %v835_v7 }
 0x144   : > { %4389 = vmatprep.mubr.msk.f32.mxu0 %vm995_vm9, %v6125_v56 }
 0x145   : > { %4390 = vmatmul.mubr.msk.f32.gmra.mrb[8].mxu0 %vm995_vm9, %v6122_v30  ;;  %v642_v61 = vpop.permute.xlu1 %641 }
 0x146   : > { %v640_v16 = vpop.permute.xlu0 %639  ;;  %v935_v14 = vsel %vm383_vm2, %v5815_v1, %v642_v61 }
 0x147   : > { %v934_v17 = vsel %vm383_vm2, %v5817_v5, %v640_v16 }
 0x149   : > { %v841_v18 = vpop.permute.xlu1 %840 }
 0x14a   : > { %v839_v48 = vpop.permute.xlu0 %838  ;;  %v6136_v60 = vsel %vm958_vm8, %v935_v14, %v841_v18 }
 0x14b   : > { %v6139_v42 = vsel %vm958_vm8, %v934_v17, %v839_v48 }
 0x14c   : > { %4392 = vmatprep.mubr.msk.f32.mxu0 %vm995_vm9, %v6139_v42 }
 0x14d   : > { %4393 = vmatmul.mubr.msk.f32.gmra.mrb[10].mxu0 %vm995_vm9, %v6136_v60  ;;  %v646_v29 = vpop.permute.xlu1 %645 }
 0x14e   : > { %v644_v44 = vpop.permute.xlu0 %643  ;;  %v937_v1 = vsel %vm383_vm2, %v5840_v31, %v646_v29 }
 0x14f   : > { %v936_v5 = vsel %vm383_vm2, %v5844_v59, %v644_v44 }
 0x151   : > { %v845_v58 = vpop.permute.xlu1 %844 }
 0x152   : > { %v843_v40 = vpop.permute.xlu0 %842  ;;  %v6150_v46 = vsel %vm958_vm8, %v937_v1, %v845_v58 }
 0x153   : > { %v6153_v62 = vsel %vm958_vm8, %v936_v5, %v843_v40 }
 0x154   : > { %4395 = vmatprep.mubr.msk.f32.mxu0 %vm995_vm9, %v6153_v62 }
 0x155   : > { %4396 = vmatmul.mubr.msk.f32.gmra.mrb[12].mxu0 %vm995_vm9, %v6150_v46  ;;  %v650_v2 = vpop.permute.xlu1 %649 }
 0x156   : > { %v648_v47 = vpop.permute.xlu0 %647  ;;  %v939_v31 = vsel %vm383_vm2, %v5858_v15, %v650_v2 }
 0x157   : > { %v938_v59 = vsel %vm383_vm2, %v5860_v19, %v648_v47 }
 0x159   : > { %v849_v7 = vpop.permute.xlu1 %848 }
 0x15a   : > { %v847_v61 = vpop.permute.xlu0 %846  ;;  %v6164_v16 = vsel %vm958_vm8, %v939_v31, %v849_v7 }
 0x15b   : > { %v6167_v14 = vsel %vm958_vm8, %v938_v59, %v847_v61 }
 0x15c   : > { %4398 = vmatprep.mubr.msk.f32.mxu0 %vm995_vm9, %v6167_v14 }
 0x15d   : > { %4399 = vmatmul.mubr.msk.f32.gmra.mrb[14].mxu0 %vm995_vm9, %v6164_v16  ;;  %v654_v17 = vpop.permute.xlu1 %653 }
 0x15e   : > { %v652_v18 = vpop.permute.xlu0 %651  ;;  %v941_v15 = vsel %vm383_vm2, %v5874_v11, %v654_v17 }
 0x15f   : > { %v940_v19 = vsel %vm383_vm2, %v5876_v12, %v652_v18 }
 0x161   : > { %v853_v48 = vpop.permute.xlu1 %852 }
 0x162   : > { %v851_v29 = vpop.permute.xlu0 %850  ;;  %v6178_v44 = vsel %vm958_vm8, %v941_v15, %v853_v48 }
 0x163   : > { %v6181_v1 = vsel %vm958_vm8, %v940_v19, %v851_v29 }
 0x164   : > { %4401 = vmatprep.mubr.msk.f32.mxu0 %vm995_vm9, %v6181_v1 }
 0x165   : > { %4402 = vmatmul.mubr.msk.f32.gmra.mrb[16].mxu0 %vm995_vm9, %v6178_v44  ;;  %v658_v5 = vpop.permute.xlu1 %657 }
 0x166   : > { %v656_v58 = vpop.permute.xlu0 %655  ;;  %v943_v11 = vsel %vm383_vm2, %v5897_v9, %v658_v5 }
 0x167   : > { %v942_v12 = vsel %vm383_vm2, %v5899_v23, %v656_v58 }
 0x169   : > { %v857_v40 = vpop.permute.xlu1 %856 }
 0x16a   : > { %v855_v2 = vpop.permute.xlu0 %854  ;;  %v6192_v47 = vsel %vm958_vm8, %v943_v11, %v857_v40 }
 0x16b   : > { %v6195_v31 = vsel %vm958_vm8, %v942_v12, %v855_v2 }
 0x16c   : > { %4404 = vmatprep.mubr.msk.f32.mxu0 %vm995_vm9, %v6195_v31 }
 0x16d   : > { %4405 = vmatmul.mubr.msk.f32.gmra.mrb[18].mxu0 %vm995_vm9, %v6192_v47  ;;  %v662_v59 = vpop.permute.xlu1 %661 }
 0x16e   : > { %v660_v7 = vpop.permute.xlu0 %659  ;;  %v945_v9 = vsel %vm383_vm2, %v5913_v27, %v662_v59 }
 0x16f   : > { %v944_v23 = vsel %vm383_vm2, %v5915_v4, %v660_v7 }
 0x171   : > { %v861_v61 = vpop.permute.xlu1 %860 }
 0x172   : > { %v859_v17 = vpop.permute.xlu0 %858  ;;  %v6206_v18 = vsel %vm958_vm8, %v945_v9, %v861_v61 }
 0x173   : > { %v6209_v15 = vsel %vm958_vm8, %v944_v23, %v859_v17 }
 0x174   : > { %4407 = vmatprep.mubr.msk.f32.mxu0 %vm995_vm9, %v6209_v15 }
 0x175   : > { %4408 = vmatmul.mubr.msk.f32.gmra.mrb[20].mxu0 %vm995_vm9, %v6206_v18  ;;  %v666_v19 = vpop.permute.xlu1 %665 }
 0x176   : > { %v664_v48 = vpop.permute.xlu0 %663  ;;  %v947_v27 = vsel %vm383_vm2, %v5929_v25, %v666_v19 }
 0x177   : > { %v946_v4 = vsel %vm383_vm2, %v5931_v28, %v664_v48 }
 0x179   : > { %v865_v29 = vpop.permute.xlu1 %864 }
 0x17a   : > { %v863_v5 = vpop.permute.xlu0 %862  ;;  %v6220_v58 = vsel %vm958_vm8, %v947_v27, %v865_v29 }
 0x17b   : > { %v6223_v11 = vsel %vm958_vm8, %v946_v4, %v863_v5 }
 0x17c   : > { %4410 = vmatprep.mubr.msk.f32.mxu0 %vm995_vm9, %v6223_v11 }
 0x17d   : > { %4411 = vmatmul.mubr.msk.f32.gmra.mrb[22].mxu0 %vm995_vm9, %v6220_v58  ;;  %v670_v12 = vpop.permute.xlu1 %669 }
 0x17e   : > { %v668_v40 = vpop.permute.xlu0 %667  ;;  %v949_v25 = vsel %vm383_vm2, %v5945_v55, %v670_v12 }
 0x17f   : > { %v948_v28 = vsel %vm383_vm2, %v5947_v26, %v668_v40 }
 0x181   : > { %v869_v2 = vpop.permute.xlu1 %868 }
 0x182   : > { %v867_v59 = vpop.permute.xlu0 %866  ;;  %v6234_v7 = vsel %vm958_vm8, %v949_v25, %v869_v2 }
 0x183   : > { %v6237_v9 = vsel %vm958_vm8, %v948_v28, %v867_v59 }
 0x184   : > { %4413 = vmatprep.mubr.msk.f32.mxu0 %vm995_vm9, %v6237_v9 }
 0x185   : > { %4414 = vmatmul.mubr.msk.f32.gmra.mrb[24].mxu0 %vm995_vm9, %v6234_v7  ;;  %v674_v23 = vpop.permute.xlu1 %673 }
 0x186   : > { %v672_v61 = vpop.permute.xlu0 %671  ;;  %v951_v55 = vsel %vm383_vm2, %v5961_v53, %v674_v23 }
 0x187   : > { %v950_v26 = vsel %vm383_vm2, %v5963_v24, %v672_v61 }
 0x189   : > { %v873_v17 = vpop.permute.xlu1 %872 }
 0x18a   : > { %v871_v19 = vpop.permute.xlu0 %870  ;;  %v6248_v48 = vsel %vm958_vm8, %v951_v55, %v873_v17 }
 0x18b   : > { %v6251_v27 = vsel %vm958_vm8, %v950_v26, %v871_v19 }
 0x18c   : > { %4416 = vmatprep.mubr.msk.f32.mxu0 %vm995_vm9, %v6251_v27 }
 0x18d   : > { %4417 = vmatmul.mubr.msk.f32.gmra.mrb[26].mxu0 %vm995_vm9, %v6248_v48  ;;  %v678_v4 = vpop.permute.xlu1 %677 }
 0x18e   : > { %v676_v29 = vpop.permute.xlu0 %675  ;;  %v953_v53 = vsel %vm383_vm2, %v5977_v51, %v678_v4 }
 0x18f   : > { %v952_v24 = vsel %vm383_vm2, %v5979_v54, %v676_v29 }
 0x191   : > { %v877_v5 = vpop.permute.xlu1 %876 }
 0x192   : > { %v875_v12 = vpop.permute.xlu0 %874  ;;  %v6262_v40 = vsel %vm958_vm8, %v953_v53, %v877_v5 }
 0x193   : > { %v6265_v25 = vsel %vm958_vm8, %v952_v24, %v875_v12 }
 0x194   : > { %4419 = vmatprep.mubr.msk.f32.mxu0 %vm995_vm9, %v6265_v25 }
 0x195   : > { %4420 = vmatmul.mubr.msk.f32.gmra.mrb[28].mxu0 %vm995_vm9, %v6262_v40  ;;  %v682_v28 = vpop.permute.xlu1 %681 }
 0x196   : > { %v680_v2 = vpop.permute.xlu0 %679  ;;  %v955_v51 = vsel %vm383_vm2, %v5993_v49, %v682_v28 }
 0x197   : > { %v954_v54 = vsel %vm383_vm2, %v5995_v52, %v680_v2 }
 0x199   : > { %v881_v59 = vpop.permute.xlu1 %880 }
 0x19a   : > { %v879_v23 = vpop.permute.xlu0 %878  ;;  %v6276_v61 = vsel %vm958_vm8, %v955_v51, %v881_v59 }
 0x19b   : > { %v6279_v55 = vsel %vm958_vm8, %v954_v54, %v879_v23 }
 0x19c   : > { %4422 = vmatprep.mubr.msk.f32.mxu0 %vm995_vm9, %v6279_v55 }
 0x19d   : > { %4423 = vmatmul.mubr.msk.f32.gmra.mrb[30].mxu0 %vm995_vm9, %v6276_v61  ;;  %v618_v26 = vpop.permute.xlu1 %617 }
 0x19e   : > { %v616_v17 = vpop.permute.xlu0 %615  ;;  %v923_v49 = vsel %vm383_vm2, %v6016_v20, %v618_v26 }
 0x19f   : > { %v922_v52 = vsel %vm383_vm2, %v6018_v22, %v616_v17 }
 0x1a1   : > { %v817_v19 = vpop.permute.xlu1 %816 }
 0x1a2   : > { %v815_v4 = vpop.permute.xlu0 %814  ;;  %v960_v29 = vsel %vm958_vm8, %v923_v49, %v817_v19 }
 0x1a3   : > { %v959_v53 = vsel %vm958_vm8, %v922_v52, %v815_v4 }
 0x1a4   : > { %4429 = vmatprep.mubr.msk.f32.mxu0 %vm995_vm9, %v959_v53 }
 0x1a5   : > { %4430 = vmatmul.mubr.msk.f32.vlgmr.msra.gmra.mrb[0].mxu0 %vm995_vm9, %v960_v29  ;;  %v686_v20 = vpop.permute.xlu1 %685 }
 0x1a6   : > { %4702 = vmatpush3.bf16.msk.msra.mxu0 %vm5825_vm7, %v6037_v21  ;;  %4432 = vmatprep.mubr.msk.f32.mxu0 %vm995_vm9, %v6008_v6  ;;  %v684_v6 = vpop.permute.xlu0 %683 }
 0x1a7   : > { %v956_v22 = vsel %vm383_vm2, %v6057_v45, %v684_v6 }
 0x1a9   : > { %4433 = vmatmul.mubr.msk.f32.gmra.mrb[2].mxu0 %vm995_vm9, %v6025_v13 }
 0x1aa   : > { %4435 = vmatprep.mubr.msk.f32.mxu0 %vm995_vm9, %v6065_v50  ;;  %v883_v13 = vpop.permute.xlu0 %882 }
 0x1ab   : > { %v993_v21 = vsel %vm958_vm8, %v956_v22, %v883_v13 }
 0x1ad   : > { %4436 = vmatmul.mubr.msk.f32.gmra.mrb[4].mxu0 %vm995_vm9, %v6062_v57 }
 0x1ae   : > { %4438 = vmatprep.mubr.msk.f32.mxu0 %vm995_vm9, %v6091_v3 }
 0x1b1   : > { %4439 = vmatmul.mubr.msk.f32.gmra.mrb[6].mxu0 %vm995_vm9, %v6088_v63 }
 0x1b2   : > { %4441 = vmatprep.mubr.msk.f32.mxu0 %vm995_vm9, %v6111_v0 }
 0x1b5   : > { %4442 = vmatmul.mubr.msk.f32.gmra.mrb[8].mxu0 %vm995_vm9, %v6108_v41 }
 0x1b6   : > { %4444 = vmatprep.mubr.msk.f32.mxu0 %vm995_vm9, %v6125_v56 }
 0x1b9   : > { %4445 = vmatmul.mubr.msk.f32.gmra.mrb[10].mxu0 %vm995_vm9, %v6122_v30 }
 0x1ba   : > { %4447 = vmatprep.mubr.msk.f32.mxu0 %vm995_vm9, %v6139_v42 }
 0x1bd   : > { %4448 = vmatmul.mubr.msk.f32.gmra.mrb[12].mxu0 %vm995_vm9, %v6136_v60 }
 0x1be   : > { %4450 = vmatprep.mubr.msk.f32.mxu0 %vm995_vm9, %v6153_v62 }
 0x1c1   : > { %4451 = vmatmul.mubr.msk.f32.gmra.mrb[14].mxu0 %vm995_vm9, %v6150_v46 }
 0x1c2   : > { %4453 = vmatprep.mubr.msk.f32.mxu0 %vm995_vm9, %v6167_v14 }
 0x1c5   : > { %4454 = vmatmul.mubr.msk.f32.gmra.mrb[16].mxu0 %vm995_vm9, %v6164_v16 }
 0x1c6   : > { %4456 = vmatprep.mubr.msk.f32.mxu0 %vm995_vm9, %v6181_v1 }
 0x1c9   : > { %4457 = vmatmul.mubr.msk.f32.gmra.mrb[18].mxu0 %vm995_vm9, %v6178_v44 }
 0x1ca   : > { %4459 = vmatprep.mubr.msk.f32.mxu0 %vm995_vm9, %v6195_v31 }
 0x1cd   : > { %4460 = vmatmul.mubr.msk.f32.gmra.mrb[20].mxu0 %vm995_vm9, %v6192_v47 }
 0x1ce   : > { %4462 = vmatprep.mubr.msk.f32.mxu0 %vm995_vm9, %v6209_v15 }
 0x1d1   : > { %4463 = vmatmul.mubr.msk.f32.gmra.mrb[22].mxu0 %vm995_vm9, %v6206_v18 }
 0x1d2   : > { %4465 = vmatprep.mubr.msk.f32.mxu0 %vm995_vm9, %v6223_v11 }
 0x1d5   : > { %4466 = vmatmul.mubr.msk.f32.gmra.mrb[24].mxu0 %vm995_vm9, %v6220_v58 }
 0x1d6   : > { %4468 = vmatprep.mubr.msk.f32.mxu0 %vm995_vm9, %v6237_v9 }
 0x1d9   : > { %4469 = vmatmul.mubr.msk.f32.gmra.mrb[26].mxu0 %vm995_vm9, %v6234_v7 }
 0x1da   : > { %4471 = vmatprep.mubr.msk.f32.mxu0 %vm995_vm9, %v6251_v27 }
 0x1dd   : > { %4472 = vmatmul.mubr.msk.f32.gmra.mrb[28].mxu0 %vm995_vm9, %v6248_v48 }
 0x1de   : > { %4474 = vmatprep.mubr.msk.f32.mxu0 %vm995_vm9, %v6265_v25 }
 0x1e1   : > { %4475 = vmatmul.mubr.msk.f32.gmra.mrb[30].mxu0 %vm995_vm9, %v6262_v40 }
 0x1e2   : > { %4481 = vmatprep.mubr.msk.f32.mxu0 %vm995_vm9, %v6065_v50  ;;  %v885_v50 = vpop.permute.xlu1 %884 }
 0x1e5   : > { %4482 = vmatmul.mubr.msk.f32.vlgmr.msra.gmra.mrb[0].mxu0 %vm995_vm9, %v6062_v57  ;;  %v957_v57 = vsel %vm383_vm2, %v6059_v43, %v686_v20 }
 0x1e6   : > { %4484 = vmatprep.mubr.msk.f32.mxu0 %vm995_vm9, %v6091_v3  ;;  %v994_v45 = vsel %vm958_vm8, %v957_v57, %v885_v50 }
 0x1e9   : > { %4485 = vmatmul.mubr.msk.f32.gmra.mrb[2].mxu0 %vm995_vm9, %v6088_v63  ;;  %v2128_v63 = vld [vmem:[#allocation2 + $0x10] sm:$0x3] }
 0x1ea   : > { %4487 = vmatprep.mubr.msk.f32.mxu0 %vm995_vm9, %v6111_v0  ;;  %v2237_v3 = vrot.slane %v2128_v63, 1  ;;  %v2126_v0 = vld [vmem:[#allocation2] sm:$0xff] }
 0x1ed   : > { %4488 = vmatmul.mubr.msk.f32.gmra.mrb[4].mxu0 %vm995_vm9, %v6108_v41  ;;  %v2238_v41 = vsel %vm524_vm4, %v6029_v8, %v2237_v3 }
 0x1ee   : > { %4490 = vmatprep.mubr.msk.f32.mxu0 %vm995_vm9, %v6125_v56  ;;  %2326 = vrot.lane.b32.xlu1 %v2238_v41, %s5167_s26 }
 0x1f1   : > { %4491 = vmatmul.mubr.msk.f32.gmra.mrb[6].mxu0 %vm995_vm9, %v6122_v30  ;;  %v2234_v30 = vrot.slane %v2126_v0, 1 }
 0x1f2   : > { %4493 = vmatprep.mubr.msk.f32.mxu0 %vm995_vm9, %v6139_v42 }
 0x1f3   : > { %v2236_v43 = vsel %vm524_vm4, %v2234_v30, %v6029_v8 }
 0x1f4   : > { %2324 = vrot.lane.b32.xlu0 %v2236_v43, %s5167_s26 }
 0x1f5   : > { %4494 = vmatmul.mubr.msk.f32.gmra.mrb[8].mxu0 %vm995_vm9, %v6136_v60 }
 0x1f6   : > { %4496 = vmatprep.mubr.msk.f32.mxu0 %vm995_vm9, %v6153_v62 }
 0x1f9   : > { %4497 = vmatmul.mubr.msk.f32.gmra.mrb[10].mxu0 %vm995_vm9, %v6150_v46 }
 0x1fa   : > { %4499 = vmatprep.mubr.msk.f32.mxu0 %vm995_vm9, %v6167_v14 }
 0x1fd   : > { %4500 = vmatmul.mubr.msk.f32.gmra.mrb[12].mxu0 %vm995_vm9, %v6164_v16 }
 0x1fe   : > { %4502 = vmatprep.mubr.msk.f32.mxu0 %vm995_vm9, %v6181_v1 }
 0x201   : > { %4503 = vmatmul.mubr.msk.f32.gmra.mrb[14].mxu0 %vm995_vm9, %v6178_v44 }
 0x202   : > { %4505 = vmatprep.mubr.msk.f32.mxu0 %vm995_vm9, %v6195_v31 }
 0x205   : > { %4506 = vmatmul.mubr.msk.f32.gmra.mrb[16].mxu0 %vm995_vm9, %v6192_v47 }
 0x206   : > { %4508 = vmatprep.mubr.msk.f32.mxu0 %vm995_vm9, %v6209_v15 }
 0x209   : > { %4509 = vmatmul.mubr.msk.f32.gmra.mrb[18].mxu0 %vm995_vm9, %v6206_v18 }
 0x20a   : > { %4511 = vmatprep.mubr.msk.f32.mxu0 %vm995_vm9, %v6223_v11 }
 0x20d   : > { %4512 = vmatmul.mubr.msk.f32.gmra.mrb[20].mxu0 %vm995_vm9, %v6220_v58 }
 0x20e   : > { %4514 = vmatprep.mubr.msk.f32.mxu0 %vm995_vm9, %v6237_v9 }
 0x211   : > { %4515 = vmatmul.mubr.msk.f32.gmra.mrb[22].mxu0 %vm995_vm9, %v6234_v7 }
 0x212   : > { %4517 = vmatprep.mubr.msk.f32.mxu0 %vm995_vm9, %v6251_v27 }
 0x215   : > { %4518 = vmatmul.mubr.msk.f32.gmra.mrb[24].mxu0 %vm995_vm9, %v6248_v48 }
 0x216   : > { %4520 = vmatprep.mubr.msk.f32.mxu0 %vm995_vm9, %v6265_v25 }
 0x219   : > { %4521 = vmatmul.mubr.msk.f32.gmra.mrb[26].mxu0 %vm995_vm9, %v6262_v40 }
 0x21a   : > { %4523 = vmatprep.mubr.msk.f32.mxu0 %vm995_vm9, %v6279_v55 }
 0x21d   : > { %4524 = vmatmul.mubr.msk.f32.gmra.mrb[28].mxu0 %vm995_vm9, %v6276_v61 }
 0x21e   : > { %4526 = vmatprep.mubr.msk.f32.mxu0 %vm995_vm9, %v993_v21 }
 0x221   : > { %4527 = vmatmul.mubr.msk.f32.gmra.mrb[30].mxu0 %vm995_vm9, %v994_v45 }
 0x2b8   : > { %v6430_v56 = vpop.f32.mrb[0].mxu0 }
 0x2b9   : > { %v1822_v60 = vsel %vm383_vm2, %v6430_v56, 0.0  ;;  %v1891_v42 = vmul.f32 %v6430_v56, %v6430_v56  ;;  %v6436_v46 = vpop.f32.mrb[1].mxu0 }
 0x2ba   : > { %v1821_v62 = vsel %vm383_vm2, %v6436_v46, 0.0  ;;  %v1890_v16 = vmul.f32 %v6436_v46, %v6436_v46 }
 0x2bb   : > { %v1923_v8 = vsel %vm383_vm2, %v1891_v42, 0.0  ;;  %v1823_v14 = vadd.f32 %v1822_v60, %v1821_v62 }
 0x2bc   : > { %v1922_v44 = vsel %vm383_vm2, %v1890_v16, 0.0  ;;  %v6444_v1 = vpop.f32.mrb[2].mxu0 }
 0x2bd   : > { %v1924_v47 = vadd.f32 %v1923_v8, %v1922_v44  ;;  %v6446_v31 = vpop.f32.mrb[3].mxu0  ;;  %v1893_v18 = vmul.f32 %v6444_v1, %v6444_v1  ;;  %v1826_v7 = vsel %vm383_vm2, %v6444_v1, 0.0 }
 0x2be   : > { %v1824_v15 = vsel %vm383_vm2, %v6446_v31, 0.0  ;;  %v1892_v58 = vmul.f32 %v6446_v31, %v6446_v31 }
 0x2bf   : > { %v1825_v11 = vadd.f32 %v1824_v15, %v1823_v14  ;;  %v1927_v12 = vsel %vm383_vm2, %v1893_v18, 0.0 }
 0x2c0   : > { %v1925_v9 = vsel %vm383_vm2, %v1892_v58, 0.0  ;;  %v6457_v48 = vpop.f32.mrb[4].mxu0 }
 0x2c1   : > { %v1926_v27 = vadd.f32 %v1925_v9, %v1924_v47  ;;  %v6459_v24 = vpop.f32.mrb[5].mxu0  ;;  %v1827_v5 = vadd.f32 %v1826_v7, %v1825_v11  ;;  %v1895_v40 = vmul.f32 %v6457_v48, %v6457_v48  ;;  %v1830_v54 = vsel %vm383_vm2, %v6457_v48, 0.0 }
 0x2c2   : > { %v1828_v25 = vsel %vm383_vm2, %v6459_v24, 0.0  ;;  %v1894_v28 = vmul.f32 %v6459_v24, %v6459_v24 }
 0x2c3   : > { %v1829_v2 = vadd.f32 %v1828_v25, %v1827_v5  ;;  %v1928_v51 = vadd.f32 %v1927_v12, %v1926_v27  ;;  %v1931_v17 = vsel %vm383_vm2, %v1895_v40, 0.0 }
 0x2c4   : > { %v1929_v59 = vsel %vm383_vm2, %v1894_v28, 0.0  ;;  %v6471_v23 = vpop.f32.mrb[6].mxu0 }
 0x2c5   : > { %v1930_v61 = vadd.f32 %v1929_v59, %v1928_v51  ;;  %v6473_v55 = vpop.f32.mrb[7].mxu0  ;;  %v1831_v26 = vadd.f32 %v1830_v54, %v1829_v2  ;;  %v1897_v49 = vmul.f32 %v6471_v23, %v6471_v23  ;;  %v1834_v53 = vsel %vm383_vm2, %v6471_v23, 0.0 }
 0x2c6   : > { %v1832_v52 = vsel %vm383_vm2, %v6473_v55, 0.0  ;;  %v1896_v19 = vmul.f32 %v6473_v55, %v6473_v55 }
 0x2c7   : > { %v1833_v4 = vadd.f32 %v1832_v52, %v1831_v26  ;;  %v1932_v29 = vadd.f32 %v1931_v17, %v1930_v61  ;;  %v1935_v57 = vsel %vm383_vm2, %v1897_v49, 0.0 }
 0x2c8   : > { %v1933_v6 = vsel %vm383_vm2, %v1896_v19, 0.0  ;;  %v6485_v20 = vpop.f32.mrb[8].mxu0 }
 0x2c9   : > { %v1934_v22 = vadd.f32 %v1933_v6, %v1932_v29  ;;  %v6487_v13 = vpop.f32.mrb[9].mxu0  ;;  %v1835_v21 = vadd.f32 %v1834_v53, %v1833_v4  ;;  %v1899_v50 = vmul.f32 %v6485_v20, %v6485_v20  ;;  %v1838_v0 = vsel %vm383_vm2, %v6485_v20, 0.0 }
 0x2ca   : > { %v1836_v45 = vsel %vm383_vm2, %v6487_v13, 0.0  ;;  %v1898_v63 = vmul.f32 %v6487_v13, %v6487_v13 }
 0x2cb   : > { %v1837_v3 = vadd.f32 %v1836_v45, %v1835_v21  ;;  %v1936_v41 = vadd.f32 %v1935_v57, %v1934_v22  ;;  %v1939_v16 = vsel %vm383_vm2, %v1899_v50, 0.0 }
 0x2cc   : > { %v1937_v30 = vsel %vm383_vm2, %v1898_v63, 0.0  ;;  %v6499_v43 = vpop.f32.mrb[10].mxu0 }
 0x2cd   : > { %v1938_v60 = vadd.f32 %v1937_v30, %v1936_v41  ;;  %v6501_v42 = vpop.f32.mrb[11].mxu0  ;;  %v1839_v62 = vadd.f32 %v1838_v0, %v1837_v3  ;;  %v1901_v8 = vmul.f32 %v6499_v43, %v6499_v43  ;;  %v1842_v15 = vsel %vm383_vm2, %v6499_v43, 0.0 }
 0x2ce   : > { %v1840_v14 = vsel %vm383_vm2, %v6501_v42, 0.0  ;;  %v1900_v44 = vmul.f32 %v6501_v42, %v6501_v42 }
 0x2cf   : > { %v1841_v47 = vadd.f32 %v1840_v14, %v1839_v62  ;;  %v1940_v18 = vadd.f32 %v1939_v16, %v1938_v60  ;;  %v1943_v5 = vsel %vm383_vm2, %v1901_v8, 0.0 }
 0x2d0   : > { %v1941_v58 = vsel %vm383_vm2, %v1900_v44, 0.0  ;;  %v6513_v11 = vpop.f32.mrb[12].mxu0 }
 0x2d1   : > { %v1942_v7 = vadd.f32 %v1941_v58, %v1940_v18  ;;  %v6515_v9 = vpop.f32.mrb[13].mxu0  ;;  %v1843_v27 = vadd.f32 %v1842_v15, %v1841_v47  ;;  %v1903_v12 = vmul.f32 %v6513_v11, %v6513_v11  ;;  %v1846_v51 = vsel %vm383_vm2, %v6513_v11, 0.0 }
 0x2d2   : > { %v1844_v40 = vsel %vm383_vm2, %v6515_v9, 0.0  ;;  %v1902_v25 = vmul.f32 %v6515_v9, %v6515_v9 }
 0x2d3   : > { %v1845_v28 = vadd.f32 %v1844_v40, %v1843_v27  ;;  %v1944_v2 = vadd.f32 %v1943_v5, %v1942_v7  ;;  %v1947_v49 = vsel %vm383_vm2, %v1903_v12, 0.0 }
 0x2d4   : > { %v1945_v54 = vsel %vm383_vm2, %v1902_v25, 0.0  ;;  %v6527_v59 = vpop.f32.mrb[14].mxu0 }
 0x2d5   : > { %v1946_v61 = vadd.f32 %v1945_v54, %v1944_v2  ;;  %v6529_v26 = vpop.f32.mrb[15].mxu0  ;;  %v1847_v17 = vadd.f32 %v1846_v51, %v1845_v28  ;;  %v1905_v52 = vmul.f32 %v6527_v59, %v6527_v59  ;;  %v1850_v6 = vsel %vm383_vm2, %v6527_v59, 0.0 }
 0x2d6   : > { %v1848_v19 = vsel %vm383_vm2, %v6529_v26, 0.0  ;;  %v1904_v4 = vmul.f32 %v6529_v26, %v6529_v26 }
 0x2d7   : > { %v1849_v29 = vadd.f32 %v1848_v19, %v1847_v17  ;;  %v1948_v53 = vadd.f32 %v1947_v49, %v1946_v61  ;;  %v1951_v63 = vsel %vm383_vm2, %v1905_v52, 0.0 }
 0x2d8   : > { %v1949_v22 = vsel %vm383_vm2, %v1904_v4, 0.0  ;;  %v6541_v21 = vpop.f32.mrb[16].mxu0 }
 0x2d9   : > { %v1950_v57 = vadd.f32 %v1949_v22, %v1948_v53  ;;  %v6543_v50 = vpop.f32.mrb[17].mxu0  ;;  %v1851_v45 = vadd.f32 %v1850_v6, %v1849_v29  ;;  %v1907_v3 = vmul.f32 %v6541_v21, %v6541_v21  ;;  %v1854_v62 = vsel %vm383_vm2, %v6541_v21, 0.0 }
 0x2da   : > { %v1852_v41 = vsel %vm383_vm2, %v6543_v50, 0.0  ;;  %v1906_v0 = vmul.f32 %v6543_v50, %v6543_v50 }
 0x2db   : > { %v1853_v30 = vadd.f32 %v1852_v41, %v1851_v45  ;;  %v1952_v60 = vadd.f32 %v1951_v63, %v1950_v57  ;;  %v1955_v18 = vsel %vm383_vm2, %v1907_v3, 0.0 }
 0x2dc   : > { %v1953_v16 = vsel %vm383_vm2, %v1906_v0, 0.0  ;;  %v6555_v8 = vpop.f32.mrb[18].mxu0 }
 0x2dd   : > { %v1954_v14 = vadd.f32 %v1953_v16, %v1952_v60  ;;  %v6557_v44 = vpop.f32.mrb[19].mxu0  ;;  %v1855_v47 = vadd.f32 %v1854_v62, %v1853_v30  ;;  %v1909_v15 = vmul.f32 %v6555_v8, %v6555_v8  ;;  %v1858_v12 = vsel %vm383_vm2, %v6555_v8, 0.0 }
 0x2de   : > { %v1856_v58 = vsel %vm383_vm2, %v6557_v44, 0.0  ;;  %v1908_v7 = vmul.f32 %v6557_v44, %v6557_v44 }
 0x2df   : > { %v1857_v27 = vadd.f32 %v1856_v58, %v1855_v47  ;;  %v1956_v5 = vadd.f32 %v1955_v18, %v1954_v14  ;;  %v1959_v54 = vsel %vm383_vm2, %v1909_v15, 0.0 }
 0x2e0   : > { %v1957_v40 = vsel %vm383_vm2, %v1908_v7, 0.0  ;;  %v6569_v25 = vpop.f32.mrb[20].mxu0 }
 0x2e1   : > { %v1958_v28 = vadd.f32 %v1957_v40, %v1956_v5  ;;  %v6571_v2 = vpop.f32.mrb[21].mxu0  ;;  %v1859_v51 = vadd.f32 %v1858_v12, %v1857_v27  ;;  %v1911_v61 = vmul.f32 %v6569_v25, %v6569_v25  ;;  %v1862_v4 = vsel %vm383_vm2, %v6569_v25, 0.0 }
 0x2e2   : > { %v1860_v17 = vsel %vm383_vm2, %v6571_v2, 0.0  ;;  %v1910_v49 = vmul.f32 %v6571_v2, %v6571_v2 }
 0x2e3   : > { %v1861_v52 = vadd.f32 %v1860_v17, %v1859_v51  ;;  %v1960_v19 = vadd.f32 %v1959_v54, %v1958_v28  ;;  %v1963_v45 = vsel %vm383_vm2, %v1911_v61, 0.0 }
 0x2e4   : > { %v1961_v29 = vsel %vm383_vm2, %v1910_v49, 0.0  ;;  %v6583_v53 = vpop.f32.mrb[22].mxu0 }
 0x2e5   : > { %v1962_v6 = vadd.f32 %v1961_v29, %v1960_v19  ;;  %v6585_v22 = vpop.f32.mrb[23].mxu0  ;;  %v1863_v57 = vadd.f32 %v1862_v4, %v1861_v52  ;;  %v1913_v63 = vmul.f32 %v6583_v53, %v6583_v53  ;;  %v1866_v60 = vsel %vm383_vm2, %v6583_v53, 0.0 }
 0x2e6   : > { %v1864_v3 = vsel %vm383_vm2, %v6585_v22, 0.0  ;;  %v1912_v41 = vmul.f32 %v6585_v22, %v6585_v22 }
 0x2e7   : > { %v1865_v0 = vadd.f32 %v1864_v3, %v1863_v57  ;;  %v1964_v30 = vadd.f32 %v1963_v45, %v1962_v6  ;;  %v1967_v15 = vsel %vm383_vm2, %v1913_v63, 0.0 }
 0x2e8   : > { %v1965_v62 = vsel %vm383_vm2, %v1912_v41, 0.0  ;;  %v6597_v16 = vpop.f32.mrb[24].mxu0 }
 0x2e9   : > { %v1966_v14 = vadd.f32 %v1965_v62, %v1964_v30  ;;  %v6599_v47 = vpop.f32.mrb[25].mxu0  ;;  %v1867_v18 = vadd.f32 %v1866_v60, %v1865_v0  ;;  %v1915_v58 = vmul.f32 %v6597_v16, %v6597_v16  ;;  %v1870_v40 = vsel %vm383_vm2, %v6597_v16, 0.0 }
 0x2ea   : > { %v1868_v7 = vsel %vm383_vm2, %v6599_v47, 0.0  ;;  %v1914_v27 = vmul.f32 %v6599_v47, %v6599_v47 }
 0x2eb   : > { %v1869_v5 = vadd.f32 %v1868_v7, %v1867_v18  ;;  %v1968_v12 = vadd.f32 %v1967_v15, %v1966_v14  ;;  %v1971_v49 = vsel %vm383_vm2, %v1915_v58, 0.0 }
 0x2ec   : > { %v1969_v28 = vsel %vm383_vm2, %v1914_v27, 0.0  ;;  %v6611_v51 = vpop.f32.mrb[26].mxu0 }
 0x2ed   : > { %v1970_v54 = vadd.f32 %v1969_v28, %v1968_v12  ;;  %v6613_v61 = vpop.f32.mrb[27].mxu0  ;;  %v1871_v17 = vadd.f32 %v1870_v40, %v1869_v5  ;;  %v1917_v52 = vmul.f32 %v6611_v51, %v6611_v51  ;;  %v1874_v57 = vsel %vm383_vm2, %v6611_v51, 0.0 }
 0x2ee   : > { %v1872_v19 = vsel %vm383_vm2, %v6613_v61, 0.0  ;;  %v1916_v4 = vmul.f32 %v6613_v61, %v6613_v61 }
 0x2ef   : > { %v1873_v29 = vadd.f32 %v1872_v19, %v1871_v17  ;;  %v1972_v6 = vadd.f32 %v1971_v49, %v1970_v54  ;;  %v1975_v30 = vsel %vm383_vm2, %v1917_v52, 0.0 }
 0x2f0   : > { %v1973_v45 = vsel %vm383_vm2, %v1916_v4, 0.0  ;;  %v6625_v63 = vpop.f32.mrb[28].mxu0 }
 0x2f1   : > { %v1974_v3 = vadd.f32 %v1973_v45, %v1972_v6  ;;  %v6627_v41 = vpop.f32.mrb[29].mxu0  ;;  %v1875_v0 = vadd.f32 %v1874_v57, %v1873_v29  ;;  %v1919_v60 = vmul.f32 %v6625_v63, %v6625_v63  ;;  %v1878_v58 = vsel %vm383_vm2, %v6625_v63, 0.0 }
 0x2f2   : > { %v1876_v62 = vsel %vm383_vm2, %v6627_v41, 0.0  ;;  %v1918_v14 = vmul.f32 %v6627_v41, %v6627_v41 }
 0x2f3   : > { %v1877_v18 = vadd.f32 %v1876_v62, %v1875_v0  ;;  %v1976_v15 = vadd.f32 %v1975_v30, %v1974_v3  ;;  %v1979_v28 = vsel %vm383_vm2, %v1919_v60, 0.0 }
 0x2f4   : > { %v1977_v7 = vsel %vm383_vm2, %v1918_v14, 0.0  ;;  %v6639_v27 = vpop.f32.mrb[30].mxu0 }
 0x2f5   : > { %v1978_v5 = vadd.f32 %v1977_v7, %v1976_v15  ;;  %v6641_v12 = vpop.f32.mrb[31].mxu0  ;;  %v1879_v40 = vadd.f32 %v1878_v58, %v1877_v18  ;;  %v1921_v54 = vmul.f32 %v6639_v27, %v6639_v27  ;;  %v1882_v4 = vsel %vm383_vm2, %v6639_v27, 0.0 }
 0x2f6   : > { %v1880_v17 = vsel %vm383_vm2, %v6641_v12, 0.0  ;;  %v1920_v49 = vmul.f32 %v6641_v12, %v6641_v12 }
 0x2f7   : > { %v1881_v52 = vadd.f32 %v1880_v17, %v1879_v40  ;;  %v1980_v19 = vadd.f32 %v1979_v28, %v1978_v5  ;;  %v1983_v45 = vsel %vm383_vm2, %v1921_v54, 0.0 }
 0x2f8   : > { %v1981_v29 = vsel %vm383_vm2, %v1920_v49, 0.0 }
 0x2f9   : > { %v1883_v6 = vadd.f32 %v1882_v4, %v1881_v52  ;;  %v1982_v57 = vadd.f32 %v1981_v29, %v1980_v19 }
 0x2fb   : > { %v1884_v3 = vrot.slane %v1883_v6, 4  ;;  %v1984_v0 = vadd.f32 %v1983_v45, %v1982_v57 }
 0x2fd   : > { %v1885_v30 = vadd.f32 %v1884_v3, %v1883_v6  ;;  %v1985_v60 = vrot.slane %v1984_v0, 4 }
 0x2ff   : > { %v1886_v62 = vrot.slane %v1885_v30, 2  ;;  %v1986_v14 = vadd.f32 %v1985_v60, %v1984_v0 }
 0x301   : > { %v1887_v18 = vadd.f32 %v1886_v62, %v1885_v30  ;;  %v1987_v15 = vrot.slane %v1986_v14, 2 }
 0x303   : > { %v1888_v58 = vrot.slane %v1887_v18, 1  ;;  %v1988_v7 = vadd.f32 %v1987_v15, %v1986_v14 }
 0x305   : > { %v1889_v5 = vadd.f32 %v1888_v58, %v1887_v18  ;;  %v1989_v40 = vrot.slane %v1988_v7, 1 }
 0x307   : > { %v1990_v28 = vadd.f32 %v1989_v40, %v1988_v7  ;;  %v6654_v17 = vmul.f32 0.00390625, %v1889_v5 }
 0x309   : > { %v1992_v49 = vmul.f32 0.00390625, %v1990_v28  ;;  %v1993_v52 = vmul.f32 %v6654_v17, %v6654_v17  ;;  %v2026_v54 = vsub.f32 %v6641_v12, %v6654_v17  ;;  %v1996_v19 = vsub.f32 %v6436_v46, %v6654_v17 }
 0x30a   : > { %v1997_v4 = vsub.f32 %v6430_v56, %v6654_v17  ;;  %v1998_v29 = vsub.f32 %v6446_v31, %v6654_v17  ;;  %v1999_v6 = vsub.f32 %v6444_v1, %v6654_v17  ;;  %v2000_v57 = vsub.f32 %v6459_v24, %v6654_v17 }
 0x30b   : > { %v1994_v45 = vsub.f32 %v1992_v49, %v1993_v52  ;;  %v2001_v3 = vsub.f32 %v6457_v48, %v6654_v17  ;;  %v2002_v12 = vsub.f32 %v6473_v55, %v6654_v17  ;;  %v2003_v46 = vsub.f32 %v6471_v23, %v6654_v17 }
 0x30c   : > { %v2004_v56 = vsub.f32 %v6487_v13, %v6654_v17  ;;  %v2005_v31 = vsub.f32 %v6485_v20, %v6654_v17  ;;  %v2006_v1 = vsub.f32 %v6501_v42, %v6654_v17  ;;  %v2007_v24 = vsub.f32 %v6499_v43, %v6654_v17 }
 0x30d   : > { %v1995_v0 = vmax.f32 %v1994_v45, 0.0  ;;  %v2008_v48 = vsub.f32 %v6515_v9, %v6654_v17  ;;  %v2009_v55 = vsub.f32 %v6513_v11, %v6654_v17  ;;  %v2010_v23 = vsub.f32 %v6529_v26, %v6654_v17 }
 0x30e   : > { %v2011_v13 = vsub.f32 %v6527_v59, %v6654_v17  ;;  %v2012_v20 = vsub.f32 %v6543_v50, %v6654_v17  ;;  %v2013_v42 = vsub.f32 %v6541_v21, %v6654_v17  ;;  %v2014_v43 = vsub.f32 %v6557_v44, %v6654_v17 }
 0x30f   : > { %v2028_v30 = vadd.f32 1e-05, %v1995_v0  ;;  %v2015_v9 = vsub.f32 %v6555_v8, %v6654_v17  ;;  %v2016_v11 = vsub.f32 %v6571_v2, %v6654_v17  ;;  %v2017_v26 = vsub.f32 %v6569_v25, %v6654_v17 }
 0x310   : > { %v2018_v59 = vsub.f32 %v6585_v22, %v6654_v17  ;;  %v2019_v50 = vsub.f32 %v6583_v53, %v6654_v17  ;;  %v2020_v21 = vsub.f32 %v6599_v47, %v6654_v17  ;;  %v2021_v44 = vsub.f32 %v6597_v16, %v6654_v17 }
 0x311   : > { %4966 = vrsqrt.f32 %v2028_v30  ;;  %v2022_v8 = vsub.f32 %v6613_v61, %v6654_v17  ;;  %v2023_v2 = vsub.f32 %v6611_v51, %v6654_v17  ;;  %v2024_v25 = vsub.f32 %v6627_v41, %v6654_v17 }
 0x312   : > { %v2025_v22 = vsub.f32 %v6625_v63, %v6654_v17  ;;  %v2027_v53 = vsub.f32 %v6639_v27, %v6654_v17 }
 0x31b   : > { %v4967_v47 = vpop.eup %4966 }
 0x31c   : > { %v2060_v60 = vmul.f32 %v4967_v47, %v2026_v54  ;;  %v2030_v62 = vmul.f32 %v4967_v47, %v1996_v19  ;;  %v2031_v16 = vmul.f32 %v4967_v47, %v1997_v4  ;;  %v2032_v14 = vmul.f32 %v4967_v47, %v1998_v29 }
 0x31d   : > { %v2033_v18 = vmul.f32 %v4967_v47, %v1999_v6  ;;  %v2034_v15 = vmul.f32 %v4967_v47, %v2000_v57  ;;  %v2035_v61 = vmul.f32 %v4967_v47, %v2001_v3  ;;  %v2036_v58 = vmul.f32 %v4967_v47, %v2002_v12 }
 0x31e   : > { %v2092_v7 = vmax.f32 %v2060_v60, 0.0  ;;  %v2037_v51 = vmul.f32 %v4967_v47, %v2003_v46  ;;  %v2038_v5 = vmul.f32 %v4967_v47, %v2004_v56  ;;  %v2039_v40 = vmul.f32 %v4967_v47, %v2005_v31 }
 0x31f   : > { %v2040_v41 = vmul.f32 %v4967_v47, %v2006_v1  ;;  %v2041_v28 = vmul.f32 %v4967_v47, %v2007_v24  ;;  %v2042_v49 = vmul.f32 %v4967_v47, %v2008_v48  ;;  %v2043_v63 = vmul.f32 %v4967_v47, %v2009_v55 }
 0x320   : > { %2124 = vst.msk [vmem:[#allocation2 + $0x181] sm:$0xff] %vm383_vm2, %v2092_v7  ;;  %v2044_v27 = vmul.f32 %v4967_v47, %v2010_v23  ;;  %v2045_v17 = vmul.f32 %v4967_v47, %v2011_v13  ;;  %v2046_v52 = vmul.f32 %v4967_v47, %v2012_v20  ;;  %v2047_v54 = vmul.f32 %v4967_v47, %v2013_v42 }
 0x321   : > { %v2048_v19 = vmul.f32 %v4967_v47, %v2014_v43  ;;  %v6723_v4 = vmul.f32 %v4967_v47, %v2015_v9  ;;  %v6725_v29 = vmul.f32 %v4967_v47, %v2016_v11  ;;  %v6727_v6 = vmul.f32 %v4967_v47, %v2017_v26 }
 0x322   : > { %v6729_v57 = vmul.f32 %v4967_v47, %v2018_v59  ;;  %v6731_v45 = vmul.f32 %v4967_v47, %v2019_v50  ;;  %v6733_v3 = vmul.f32 %v4967_v47, %v2020_v21  ;;  %v6735_v12 = vmul.f32 %v4967_v47, %v2021_v44 }
 0x323   : > { %v6737_v46 = vmul.f32 %v4967_v47, %v2022_v8  ;;  %v6739_v56 = vmul.f32 %v4967_v47, %v2023_v2  ;;  %v6741_v31 = vmul.f32 %v4967_v47, %v2024_v25  ;;  %v6743_v1 = vmul.f32 %v4967_v47, %v2025_v22  ;;  %v346_v22 = vld [vmem:[%s5422_s7 + $0x40] sm:$0xff] }
 0x324   : > { %v6745_v24 = vmul.f32 %v4967_v47, %v2027_v53  ;;  %v2062_v0 = vmax.f32 %v2030_v62, 0.0  ;;  %v2063_v48 = vmax.f32 %v2031_v16, 0.0  ;;  %v2064_v55 = vmax.f32 %v2032_v14, 0.0  ;;  %v347_v16 = vld [vmem:[%s5422_s7 + $0x48] sm:$0xf] }
 0x325   : > { %v2065_v23 = vmax.f32 %v2033_v18, 0.0  ;;  %v2066_v13 = vmax.f32 %v2034_v15, 0.0  ;;  %v2067_v20 = vmax.f32 %v2035_v61, 0.0  ;;  %v2068_v42 = vmax.f32 %v2036_v58, 0.0 }
 0x326   : > { %v2069_v43 = vmax.f32 %v2037_v51, 0.0  ;;  %v2070_v30 = vmax.f32 %v2038_v5, 0.0  ;;  %v2071_v9 = vmax.f32 %v2039_v40, 0.0  ;;  %v2072_v11 = vmax.f32 %v2040_v41, 0.0  ;;  %2094 = vst.msk [vmem:[#allocation2 + $0x19] sm:$0xff] %vm383_vm2, %v2062_v0  ;;  %2095 = vst.msk [vmem:[#allocation2 + $0x21] sm:$0xff] %vm383_vm2, %v2063_v48 }
 0x327   : > { %2096 = vst.msk [vmem:[#allocation2 + $0x31] sm:$0xff] %vm383_vm2, %v2064_v55  ;;  %v2073_v26 = vmax.f32 %v2041_v28, 0.0  ;;  %v2074_v59 = vmax.f32 %v2042_v49, 0.0  ;;  %v2075_v50 = vmax.f32 %v2043_v63, 0.0  ;;  %v2076_v21 = vmax.f32 %v2044_v27, 0.0  ;;  %2097 = vst.msk [vmem:[#allocation2 + $0x39] sm:$0xff] %vm383_vm2, %v2065_v23 }
 0x328   : > { %2098 = vst.msk [vmem:[#allocation2 + $0x49] sm:$0xff] %vm383_vm2, %v2066_v13  ;;  %2099 = vst.msk [vmem:[#allocation2 + $0x51] sm:$0xff] %vm383_vm2, %v2067_v20  ;;  %v2077_v44 = vmax.f32 %v2045_v17, 0.0  ;;  %v2078_v8 = vmax.f32 %v2046_v52, 0.0  ;;  %v2079_v2 = vmax.f32 %v2047_v54, 0.0  ;;  %v2080_v25 = vmax.f32 %v2048_v19, 0.0 }
 0x329   : > { %2100 = vst.msk [vmem:[#allocation2 + $0x61] sm:$0xff] %vm383_vm2, %v2068_v42  ;;  %2101 = vst.msk [vmem:[#allocation2 + $0x69] sm:$0xff] %vm383_vm2, %v2069_v43  ;;  %v2081_v53 = vmax.f32 %v6723_v4, 0.0  ;;  %v2082_v47 = vmax.f32 %v6725_v29, 0.0  ;;  %v2083_v60 = vmax.f32 %v6727_v6, 0.0  ;;  %v2084_v62 = vmax.f32 %v6729_v57, 0.0 }
 0x32a   : > { %2102 = vst.msk [vmem:[#allocation2 + $0x79] sm:$0xff] %vm383_vm2, %v2070_v30  ;;  %2103 = vst.msk [vmem:[#allocation2 + $0x81] sm:$0xff] %vm383_vm2, %v2071_v9  ;;  %v2085_v14 = vmax.f32 %v6731_v45, 0.0  ;;  %v2086_v18 = vmax.f32 %v6733_v3, 0.0  ;;  %v2087_v15 = vmax.f32 %v6735_v12, 0.0  ;;  %v2088_v61 = vmax.f32 %v6737_v46, 0.0 }
 0x32b   : > { %2104 = vst.msk [vmem:[#allocation2 + $0x91] sm:$0xff] %vm383_vm2, %v2072_v11  ;;  %2105 = vst.msk [vmem:[#allocation2 + $0x99] sm:$0xff] %vm383_vm2, %v2073_v26  ;;  %v2089_v58 = vmax.f32 %v6739_v56, 0.0  ;;  %v2090_v7 = vmax.f32 %v6741_v31, 0.0  ;;  %v2091_v51 = vmax.f32 %v6743_v1, 0.0  ;;  %v2093_v5 = vmax.f32 %v6745_v24, 0.0 }
 0x32c   : > { %2106 = vst.msk [vmem:[#allocation2 + $0xa9] sm:$0xff] %vm383_vm2, %v2074_v59  ;;  %2107 = vst.msk [vmem:[#allocation2 + $0xb1] sm:$0xff] %vm383_vm2, %v2075_v50  ;;  %v4703_v40 = vpack.c.bf16 %v347_v16, %v346_v22 }
 0x32d   : > { %2108 = vst.msk [vmem:[#allocation2 + $0xc1] sm:$0xff] %vm383_vm2, %v2076_v21  ;;  %2109 = vst.msk [vmem:[#allocation2 + $0xc9] sm:$0xff] %vm383_vm2, %v2077_v44  ;;  %v6788_v41 = vld [vmem:[#allocation2 + $0x20] sm:$0xff]  ;;  %v2131_v28 = vld [vmem:[#allocation2 + $0x28] sm:$0x3] }
 0x32e   : > { %2110 = vst.msk [vmem:[#allocation2 + $0xd9] sm:$0xff] %vm383_vm2, %v2078_v8  ;;  %2111 = vst.msk [vmem:[#allocation2 + $0xe1] sm:$0xff] %vm383_vm2, %v2079_v2  ;;  %v6794_v49 = vld [vmem:[#allocation2 + $0x18] sm:$0xff]  ;;  %v2240_v63 = vrot.slane %v6788_v41, 1  ;;  %v2242_v27 = vrot.slane %v2131_v28, 1  ;;  %4705 = vmatprep.subr.msk.bf16.mxu1 %vm5825_vm7, %v4703_v40  ;;  %v2438_v52 = vrot.slane %v6788_v41, 2 }
 0x32f   : > { %2112 = vst.msk [vmem:[#allocation2 + $0xf1] sm:$0xff] %vm383_vm2, %v2080_v25  ;;  %2113 = vst.msk [vmem:[#allocation2 + $0xf9] sm:$0xff] %vm383_vm2, %v2081_v53  ;;  %v2239_v17 = vrot.slane %v6794_v49, 1  ;;  %4708 = vmatpush3.bf16.msk.msra.mxu1 %vm5825_vm7, %v4703_v40  ;;  %v2440_v4 = vrot.slane %v2131_v28, 2  ;;  %v2437_v29 = vrot.slane %v6794_v49, 2  ;;  %v6806_v6 = vld [vmem:[#allocation2 + $0x38] sm:$0xff] }
 0x330   : > { %2114 = vst.msk [vmem:[#allocation2 + $0x109] sm:$0xff] %vm383_vm2, %v2082_v47  ;;  %2115 = vst.msk [vmem:[#allocation2 + $0x111] sm:$0xff] %vm383_vm2, %v2083_v60  ;;  %v2243_v54 = vsel %vm524_vm4, %v2240_v63, %v2242_v27  ;;  %v2134_v57 = vld [vmem:[#allocation2 + $0x40] sm:$0x3]  ;;  %v6810_v45 = vld [vmem:[#allocation2 + $0x30] sm:$0xff]  ;;  %v2245_v3 = vrot.slane %v6806_v6, 1 }
 0x331   : > { %2116 = vst.msk [vmem:[#allocation2 + $0x121] sm:$0xff] %vm383_vm2, %v2084_v62  ;;  %2117 = vst.msk [vmem:[#allocation2 + $0x129] sm:$0xff] %vm383_vm2, %v2085_v14  ;;  %v2241_v19 = vsel %vm524_vm4, %v2239_v17, %v2240_v63  ;;  %2330 = vrot.lane.b32.xlu1 %v2243_v54, %s5167_s26  ;;  %v2441_v12 = vsel %vm723_vm3, %v2438_v52, %v2440_v4  ;;  %v2439_v46 = vsel %vm723_vm3, %v2437_v29, %v2438_v52  ;;  %v6822_v23 = vld [vmem:[#allocation2 + $0x50] sm:$0xff]  ;;  %v2137_v13 = vld [vmem:[#allocation2 + $0x58] sm:$0x3] }
 0x332   : > { %2118 = vst.msk [vmem:[#allocation2 + $0x139] sm:$0xff] %vm383_vm2, %v2086_v18  ;;  %2119 = vst.msk [vmem:[#allocation2 + $0x141] sm:$0xff] %vm383_vm2, %v2087_v15  ;;  %2328 = vrot.lane.b32.xlu0 %v2241_v19, %s5167_s26  ;;  %v2247_v56 = vrot.slane %v2134_v57, 1  ;;  %v2244_v31 = vrot.slane %v6810_v45, 1  ;;  %v2443_v1 = vrot.slane %v6806_v6, 2  ;;  %v2445_v48 = vrot.slane %v2134_v57, 2 }
 0x333   : > { %2120 = vst.msk [vmem:[#allocation2 + $0x151] sm:$0xff] %vm383_vm2, %v2088_v61  ;;  %2121 = vst.msk [vmem:[#allocation2 + $0x159] sm:$0xff] %vm383_vm2, %v2089_v58  ;;  %v2442_v55 = vrot.slane %v6810_v45, 2  ;;  %v6826_v20 = vld [vmem:[#allocation2 + $0x48] sm:$0xff]  ;;  %v2250_v42 = vrot.slane %v6822_v23, 1  ;;  %v2252_v9 = vrot.slane %v2137_v13, 1 }
 0x334   : > { %2122 = vst.msk [vmem:[#allocation2 + $0x169] sm:$0xff] %vm383_vm2, %v2090_v7  ;;  %2123 = vst.msk [vmem:[#allocation2 + $0x171] sm:$0xff] %vm383_vm2, %v2091_v51  ;;  %v2248_v24 = vsel %vm524_vm4, %v2245_v3, %v2247_v56  ;;  %v2246_v0 = vsel %vm524_vm4, %v2244_v31, %v2245_v3  ;;  %v2446_v43 = vsel %vm723_vm3, %v2443_v1, %v2445_v48  ;;  %v2249_v11 = vrot.slane %v6826_v20, 1  ;;  %v6838_v8 = vld [vmem:[#allocation2 + $0x68] sm:$0xff]  ;;  %v2140_v2 = vld [vmem:[#allocation2 + $0x70] sm:$0x3] }
 0x335   : > { %2125 = vst.msk [vmem:[#allocation2 + $0x189] sm:$0xff] %vm383_vm2, %v2093_v5  ;;  %2528 = vrot.lane.b32.xlu1 %v2441_v12, %s5166_s15  ;;  %v2444_v30 = vsel %vm723_vm3, %v2442_v55, %v2443_v1  ;;  %v2448_v26 = vrot.slane %v6822_v23, 2  ;;  %v2253_v59 = vsel %vm524_vm4, %v2250_v42, %v2252_v9  ;;  %v2450_v21 = vrot.slane %v2137_v13, 2  ;;  %v6842_v25 = vld [vmem:[#allocation2 + $0x60] sm:$0xff]  ;;  %v2143_v7 = vld [vmem:[#allocation2 + $0x88] sm:$0x3] }
 0x336   : > { %2526 = vrot.lane.b32.xlu0 %v2439_v46, %s5166_s15  ;;  %v2251_v50 = vsel %vm524_vm4, %v2249_v11, %v2250_v42  ;;  %v2447_v44 = vrot.slane %v6826_v20, 2  ;;  %v2255_v22 = vrot.slane %v6838_v8, 1  ;;  %v2257_v60 = vrot.slane %v2140_v2, 1  ;;  %v6854_v58 = vld [vmem:[#allocation2 + $0x80] sm:$0xff]  ;;  %v6858_v51 = vld [vmem:[#allocation2 + $0x78] sm:$0xff]  ;;  %v6874_v3 = vld [vmem:[#allocation2 + $0x90] sm:$0xff] }
 0x337   : > { %v2451_v53 = vsel %vm723_vm3, %v2448_v26, %v2450_v21  ;;  %v2254_v62 = vrot.slane %v6842_v25, 1  ;;  %v2453_v16 = vrot.slane %v6838_v8, 2  ;;  %v2455_v15 = vrot.slane %v2140_v2, 2  ;;  %v6870_v29 = vld [vmem:[#allocation2 + $0x98] sm:$0xff]  ;;  %v2146_v57 = vld [vmem:[#allocation2 + $0xa0] sm:$0x3] }
 0x338   : > { %v2449_v47 = vsel %vm723_vm3, %v2447_v44, %v2448_v26  ;;  %v2258_v14 = vsel %vm524_vm4, %v2255_v22, %v2257_v60  ;;  %v2452_v61 = vrot.slane %v6842_v25, 2  ;;  %v2260_v5 = vrot.slane %v6854_v58, 1  ;;  %v6886_v42 = vld [vmem:[#allocation2 + $0xb0] sm:$0xff] }
 0x339   : > { %2334 = vrot.lane.b32.xlu1 %v2248_v24, %s5167_s26  ;;  %v2256_v18 = vsel %vm524_vm4, %v2254_v62, %v2255_v22  ;;  %v2456_v40 = vsel %vm723_vm3, %v2453_v16, %v2455_v15  ;;  %v2262_v63 = vrot.slane %v2143_v7, 1  ;;  %v2259_v27 = vrot.slane %v6858_v51, 1  ;;  %v2152_v60 = vld [vmem:[#allocation2 + $0xd0] sm:$0x3]  ;;  %v6906_v62 = vld [vmem:[#allocation2 + $0xc0] sm:$0xff] }
 0x33a   : > { %2332 = vrot.lane.b32.xlu0 %v2246_v0, %s5167_s26  ;;  %v2454_v28 = vsel %vm723_vm3, %v2452_v61, %v2453_v16  ;;  %v2458_v17 = vrot.slane %v6854_v58, 2  ;;  %v2460_v19 = vrot.slane %v2143_v7, 2  ;;  %v2457_v4 = vrot.slane %v6858_v51, 2  ;;  %v344_v7 = vld [vmem:[%s5422_s7 + $0x30] sm:$0xff] }
 0x33b   : > { %v2263_v52 = vsel %vm524_vm4, %v2260_v5, %v2262_v63  ;;  %v2261_v54 = vsel %vm524_vm4, %v2259_v27, %v2260_v5  ;;  %v2265_v12 = vrot.slane %v6870_v29, 1  ;;  %v2267_v31 = vrot.slane %v2146_v57, 1  ;;  %v345_v5 = vld [vmem:[%s5422_s7 + $0x38] sm:$0xf] }
 0x33c   : > { %v2461_v46 = vsel %vm723_vm3, %v2458_v17, %v2460_v19  ;;  %v2459_v56 = vsel %vm723_vm3, %v2457_v4, %v2458_v17  ;;  %v2264_v1 = vrot.slane %v6874_v3, 1  ;;  %v2463_v24 = vrot.slane %v6870_v29, 2  ;;  %v2155_v19 = vld [vmem:[#allocation2 + $0xe8] sm:$0x3]  ;;  %v6929_v4 = vld [vmem:[#allocation2 + $0xd8] sm:$0xff] }
 0x33d   : > { %2532 = vrot.lane.b32.xlu1 %v2446_v43, %s5166_s15  ;;  %v2268_v0 = vsel %vm524_vm4, %v2265_v12, %v2267_v31  ;;  %v2465_v55 = vrot.slane %v2146_v57, 2  ;;  %v2462_v13 = vrot.slane %v6874_v3, 2  ;;  %v2149_v43 = vld [vmem:[#allocation2 + $0xb8] sm:$0x3]  ;;  %v2270_v9 = vrot.slane %v6886_v42, 1 }
 0x33e   : > { %2530 = vrot.lane.b32.xlu0 %v2444_v30, %s5166_s15  ;;  %v2266_v48 = vsel %vm524_vm4, %v2264_v1, %v2265_v12  ;;  %v6890_v30 = vld [vmem:[#allocation2 + $0xa8] sm:$0xff]  ;;  %v2468_v21 = vrot.slane %v6886_v42, 2  ;;  %v2470_v22 = vrot.slane %v2149_v43, 2  ;;  %v2277_v15 = vrot.slane %v2152_v60, 1 }
 0x33f   : > { %v2466_v11 = vsel %vm723_vm3, %v2463_v24, %v2465_v55  ;;  %v2464_v26 = vsel %vm723_vm3, %v2462_v13, %v2463_v24  ;;  %v2274_v61 = vrot.slane %v6906_v62, 1  ;;  %v2475_v17 = vrot.slane %v2152_v60, 2  ;;  %v6941_v13 = vld [vmem:[#allocation2 + $0xf8] sm:$0xff] }
 0x340   : > { %v2279_v31 = vrot.slane %v6929_v4, 1  ;;  %v2477_v55 = vrot.slane %v6929_v4, 2 }
 0x341   : > { %2338 = vrot.lane.b32.xlu1 %v2253_v59, %s5167_s26  ;;  %v2272_v59 = vrot.slane %v2149_v43, 1  ;;  %v2158_v43 = vld [vmem:[#allocation2 + $0x100] sm:$0x3] }
 0x342   : > { %2336 = vrot.lane.b32.xlu0 %v2251_v50, %s5167_s26  ;;  %v2269_v50 = vrot.slane %v6890_v30, 1 }
 0x343   : > { %v2273_v44 = vsel %vm524_vm4, %v2270_v9, %v2272_v59 }
 0x344   : > { %v2271_v2 = vsel %vm524_vm4, %v2269_v50, %v2270_v9  ;;  %v6945_v9 = vld [vmem:[#allocation2 + $0xf0] sm:$0xff]  ;;  %v2287_v50 = vrot.slane %v2158_v43, 1 }
 0x345   : > { %2536 = vrot.lane.b32.xlu1 %v2451_v53, %s5166_s15  ;;  %v2467_v53 = vrot.slane %v6890_v30, 2  ;;  %v2482_v60 = vrot.slane %v6945_v9, 2 }
 0x346   : > { %2534 = vrot.lane.b32.xlu0 %v2449_v47, %s5166_s15  ;;  %v6902_v47 = vld [vmem:[#allocation2 + $0xc8] sm:$0xff] }
 0x347   : > { %v2275_v16 = vrot.slane %v6902_v47, 1 }
 0x349   : > { %2342 = vrot.lane.b32.xlu1 %v2258_v14, %s5167_s26  ;;  %v2471_v14 = vsel %vm723_vm3, %v2468_v21, %v2470_v22  ;;  %v2278_v63 = vsel %vm524_vm4, %v2275_v16, %v2277_v15  ;;  %v2276_v27 = vsel %vm524_vm4, %v2274_v61, %v2275_v16  ;;  %v6957_v16 = vld [vmem:[#allocation2 + $0x110] sm:$0xff] }
 0x34a   : > { %2340 = vrot.lane.b32.xlu0 %v2256_v18, %s5167_s26  ;;  %v2469_v18 = vsel %vm723_vm3, %v2467_v53, %v2468_v21  ;;  %v2284_v21 = vrot.slane %v6945_v9, 1  ;;  %v2485_v53 = vrot.slane %v2158_v43, 2  ;;  %v2290_v15 = vrot.slane %v6957_v16, 1 }
 0x34d   : > { %2540 = vrot.lane.b32.xlu1 %v2456_v40, %s5166_s15  ;;  %v6916_v40 = vpack.c.bf16 %v345_v5, %v344_v7 }
 0x34e   : > { %2538 = vrot.lane.b32.xlu0 %v2454_v28, %s5166_s15  ;;  %v2473_v28 = vrot.slane %v6902_v47, 2 }
 0x34f   : > { %4711 = vmatprep.subr.msk.bf16.mxu1 %vm5825_vm7, %v6916_v40 }
 0x350   : > { %v2476_v12 = vsel %vm723_vm3, %v2473_v28, %v2475_v17 }
 0x351   : > { %2346 = vrot.lane.b32.xlu1 %v2263_v52, %s5167_s26  ;;  %v2472_v52 = vrot.slane %v6906_v62, 2 }
 0x352   : > { %2344 = vrot.lane.b32.xlu0 %v2261_v54, %s5167_s26  ;;  %v6925_v54 = vld [vmem:[#allocation2 + $0xe0] sm:$0xff] }
 0x353   : > { %v2280_v57 = vrot.slane %v6925_v54, 1  ;;  %v2478_v1 = vrot.slane %v6925_v54, 2 }
 0x355   : > { %2544 = vrot.lane.b32.xlu1 %v2461_v46, %s5166_s15  ;;  %v2474_v46 = vsel %vm723_vm3, %v2472_v52, %v2473_v28  ;;  %v2479_v59 = vsel %vm723_vm3, %v2477_v55, %v2478_v1 }
 0x356   : > { %2542 = vrot.lane.b32.xlu0 %v2459_v56, %s5166_s15  ;;  %v2282_v56 = vrot.slane %v2155_v19, 1 }
 0x358   : > { %v2283_v24 = vsel %vm524_vm4, %v2280_v57, %v2282_v56 }
 0x359   : > { %2350 = vrot.lane.b32.xlu1 %v2268_v0, %s5167_s26  ;;  %v2281_v0 = vsel %vm524_vm4, %v2279_v31, %v2280_v57  ;;  %v6973_v57 = vld [vmem:[#allocation2 + $0x128] sm:$0xff] }
 0x35a   : > { %2348 = vrot.lane.b32.xlu0 %v2266_v48, %s5167_s26  ;;  %v2480_v48 = vrot.slane %v2155_v19, 2  ;;  %v2295_v56 = vrot.slane %v6973_v57, 1 }
 0x35d   : > { %2548 = vrot.lane.b32.xlu1 %v2466_v11, %s5166_s15  ;;  %v2285_v11 = vrot.slane %v6941_v13, 1 }
 0x35e   : > { %2546 = vrot.lane.b32.xlu0 %v2464_v26, %s5166_s15  ;;  %v2481_v26 = vsel %vm723_vm3, %v2478_v1, %v2480_v48  ;;  %v2493_v48 = vrot.slane %v6973_v57, 2 }
 0x35f   : > { %v2286_v22 = vsel %vm524_vm4, %v2284_v21, %v2285_v11  ;;  %v6993_v21 = vld [vmem:[#allocation2 + $0x138] sm:$0xff] }
 0x361   : > { %2354 = vrot.lane.b32.xlu1 %v2273_v44, %s5167_s26  ;;  %v2483_v44 = vrot.slane %v6941_v13, 2 }
 0x362   : > { %2352 = vrot.lane.b32.xlu0 %v2271_v2, %s5167_s26  ;;  %v2288_v2 = vsel %vm524_vm4, %v2285_v11, %v2287_v50  ;;  %v2167_v50 = vld [vmem:[#allocation2 + $0x148] sm:$0x3] }
 0x363   : > { %v2486_v61 = vsel %vm723_vm3, %v2483_v44, %v2485_v53  ;;  %v2484_v7 = vsel %vm723_vm3, %v2482_v60, %v2483_v44  ;;  %v2302_v53 = vrot.slane %v2167_v50, 1  ;;  %v2299_v60 = vrot.slane %v6993_v21, 1 }
 0x365   : > { %2552 = vrot.lane.b32.xlu1 %v2471_v14, %s5166_s15  ;;  %v2161_v14 = vld [vmem:[#allocation2 + $0x118] sm:$0x3] }
 0x366   : > { %2550 = vrot.lane.b32.xlu0 %v2469_v18, %s5166_s15  ;;  %v6961_v18 = vld [vmem:[#allocation2 + $0x108] sm:$0xff]  ;;  %v2292_v5 = vrot.slane %v2161_v14, 1  ;;  %v2490_v52 = vrot.slane %v2161_v14, 2 }
 0x367   : > { %v2289_v28 = vrot.slane %v6961_v18, 1  ;;  %v2487_v19 = vrot.slane %v6961_v18, 2 }
 0x369   : > { %2358 = vrot.lane.b32.xlu1 %v2278_v63, %s5167_s26  ;;  %v2488_v63 = vrot.slane %v6957_v16, 2  ;;  %v2291_v17 = vsel %vm524_vm4, %v2289_v28, %v2290_v15  ;;  %v7005_v28 = vld [vmem:[#allocation2 + $0x158] sm:$0xff] }
 0x36a   : > { %2356 = vrot.lane.b32.xlu0 %v2276_v27, %s5167_s26  ;;  %v2293_v27 = vsel %vm524_vm4, %v2290_v15, %v2292_v5  ;;  %v2497_v5 = vrot.slane %v6993_v21, 2 }
 0x36b   : > { %v2491_v31 = vsel %vm723_vm3, %v2488_v63, %v2490_v52  ;;  %v2489_v1 = vsel %vm723_vm3, %v2487_v19, %v2488_v63  ;;  %v2170_v63 = vld [vmem:[#allocation2 + $0x160] sm:$0x3] }
 0x36d   : > { %2556 = vrot.lane.b32.xlu1 %v2476_v12, %s5166_s15  ;;  %v2164_v12 = vld [vmem:[#allocation2 + $0x130] sm:$0x3] }
 0x36e   : > { %2554 = vrot.lane.b32.xlu0 %v2474_v46, %s5166_s15  ;;  %v6977_v46 = vld [vmem:[#allocation2 + $0x120] sm:$0xff]  ;;  %v2495_v11 = vrot.slane %v2164_v12, 2 }
 0x371   : > { %2362 = vrot.lane.b32.xlu1 %v2283_v24, %s5167_s26  ;;  %v2297_v24 = vrot.slane %v2164_v12, 1  ;;  %v2307_v12 = vrot.slane %v2170_v63, 1 }
 0x372   : > { %2360 = vrot.lane.b32.xlu0 %v2281_v0, %s5167_s26  ;;  %v2294_v0 = vrot.slane %v6977_v46, 1 }
 0x373   : > { %v2298_v55 = vsel %vm524_vm4, %v2295_v56, %v2297_v24 }
 0x374   : > { %v2296_v43 = vsel %vm524_vm4, %v2294_v0, %v2295_v56  ;;  %v2505_v0 = vrot.slane %v2170_v63, 2  ;;  %v7041_v63 = vld [vmem:[#allocation2 + $0x180] sm:$0xff] }
 0x375   : > { %2560 = vrot.lane.b32.xlu1 %v2481_v26, %s5166_s15  ;;  %v2492_v26 = vrot.slane %v6977_v46, 2 }
 0x376   : > { %2558 = vrot.lane.b32.xlu0 %v2479_v59, %s5166_s15  ;;  %v6989_v59 = vld [vmem:[#allocation2 + $0x140] sm:$0xff] }
 0x377   : > { %v2300_v44 = vrot.slane %v6989_v59, 1  ;;  %v2498_v14 = vrot.slane %v6989_v59, 2 }
 0x379   : > { %2366 = vrot.lane.b32.xlu1 %v2288_v2, %s5167_s26  ;;  %v2496_v2 = vsel %vm723_vm3, %v2493_v48, %v2495_v11  ;;  %v2303_v15 = vsel %vm524_vm4, %v2300_v44, %v2302_v53  ;;  %v2499_v19 = vsel %vm723_vm3, %v2497_v5, %v2498_v14  ;;  %v7025_v11 = vld [vmem:[#allocation2 + $0x168] sm:$0xff]  ;;  %v7033_v53 = vpop.permute.xlu1 %2326 }
 0x37a   : > { %2364 = vrot.lane.b32.xlu0 %v2286_v22, %s5167_s26  ;;  %v2494_v22 = vsel %vm723_vm3, %v2492_v26, %v2493_v48  ;;  %v2507_v5 = vrot.slane %v7025_v11, 2 }
 0x37d   : > { %2564 = vrot.lane.b32.xlu1 %v2486_v61, %s5166_s15  ;;  %v2301_v61 = vsel %vm524_vm4, %v2299_v60, %v2300_v44  ;;  %v7035_v60 = vpop.permute.xlu0 %2324 }
 0x37e   : > { %2562 = vrot.lane.b32.xlu0 %v2484_v7, %s5166_s15  ;;  %v2500_v7 = vrot.slane %v2167_v50, 2 }
 0x380   : > { %v2501_v52 = vsel %vm723_vm3, %v2498_v14, %v2500_v7 }
 0x381   : > { %2370 = vrot.lane.b32.xlu1 %v2293_v27, %s5167_s26  ;;  %v7009_v27 = vld [vmem:[#allocation2 + $0x150] sm:$0xff] }
 0x382   : > { %2368 = vrot.lane.b32.xlu0 %v2291_v17, %s5167_s26  ;;  %v2305_v17 = vrot.slane %v7005_v28, 1  ;;  %v2304_v56 = vrot.slane %v7009_v27, 1  ;;  %v2502_v48 = vrot.slane %v7009_v27, 2 }
 0x384   : > { %v2306_v24 = vsel %vm524_vm4, %v2304_v56, %v2305_v17  ;;  %v2314_v56 = vrot.slane %v7041_v63, 1 }
 0x385   : > { %2568 = vrot.lane.b32.xlu1 %v2491_v31, %s5166_s15  ;;  %v2503_v31 = vrot.slane %v7005_v28, 2 }
 0x386   : > { %2566 = vrot.lane.b32.xlu0 %v2489_v1, %s5166_s15  ;;  %v2308_v1 = vsel %vm524_vm4, %v2305_v17, %v2307_v12  ;;  %v7045_v17 = vld [vmem:[#allocation2 + $0x188] sm:$0xff] }
 0x387   : > { %v2506_v50 = vsel %vm723_vm3, %v2503_v31, %v2505_v0  ;;  %v2504_v44 = vsel %vm723_vm3, %v2502_v48, %v2503_v31  ;;  %v2512_v48 = vrot.slane %v7041_v63, 2 }
 0x389   : > { %2374 = vrot.lane.b32.xlu1 %v2298_v55, %s5167_s26  ;;  %v7021_v55 = vld [vmem:[#allocation2 + $0x170] sm:$0xff] }
 0x38a   : > { %2372 = vrot.lane.b32.xlu0 %v2296_v43, %s5167_s26  ;;  %v2173_v43 = vld [vmem:[#allocation2 + $0x178] sm:$0x3]  ;;  %v2310_v26 = vrot.slane %v7021_v55, 1  ;;  %v2508_v14 = vrot.slane %v7021_v55, 2 }
 0x38b   : > { %v2510_v7 = vrot.slane %v2173_v43, 2 }
 0x38d   : > { %2572 = vrot.lane.b32.xlu1 %v2496_v2, %s5166_s15  ;;  %v2312_v2 = vrot.slane %v2173_v43, 1  ;;  %v2511_v31 = vsel %vm723_vm3, %v2508_v14, %v2510_v7 }
 0x38e   : > { %2570 = vrot.lane.b32.xlu0 %v2494_v22, %s5166_s15  ;;  %v2309_v22 = vrot.slane %v7025_v11, 1 }
 0x391   : > { %2378 = vrot.lane.b32.xlu1 %v2303_v15, %s5167_s26  ;;  %v2313_v15 = vsel %vm524_vm4, %v2310_v26, %v2312_v2  ;;  %v2513_v2 = vrot.slane %v7045_v17, 2 }
 0x392   : > { %2376 = vrot.lane.b32.xlu0 %v2301_v61, %s5167_s26  ;;  %v2311_v61 = vsel %vm524_vm4, %v2309_v22, %v2310_v26 }
 0x395   : > { %2576 = vrot.lane.b32.xlu1 %v2501_v52, %s5166_s15  ;;  %v2176_v52 = vld [vmem:[#allocation2 + $0x190] sm:$0x3] }
 0x396   : > { %2574 = vrot.lane.b32.xlu0 %v2499_v19, %s5166_s15  ;;  %v2317_v0 = vrot.slane %v2176_v52, 1  ;;  %v2515_v22 = vrot.slane %v2176_v52, 2  ;;  %v4971_v52 = vld [vmem:[#allocation2 + $0x10] sm:$0x3] }
 0x399   : > { %2382 = vrot.lane.b32.xlu1 %v2308_v1, %s5167_s26  ;;  %v2509_v1 = vsel %vm723_vm3, %v2507_v5, %v2508_v14  ;;  %v348_v14 = vld [vmem:[%s5422_s7 + $0x50] sm:$0xff] }
 0x39a   : > { %2380 = vrot.lane.b32.xlu0 %v2306_v24, %s5167_s26  ;;  %v2315_v24 = vrot.slane %v7045_v17, 1 }
 0x39c   : > { %v2318_v7 = vsel %vm524_vm4, %v2315_v24, %v2317_v0  ;;  %v2316_v5 = vsel %vm524_vm4, %v2314_v56, %v2315_v24 }
 0x39d   : > { %2580 = vrot.lane.b32.xlu1 %v2506_v50, %s5166_s15 }
 0x39e   : > { %2578 = vrot.lane.b32.xlu0 %v2504_v44, %s5166_s15 }
 0x3a1   : > { %2386 = vrot.lane.b32.xlu1 %v2313_v15, %s5167_s26  ;;  %v349_v15 = vld [vmem:[%s5422_s7 + $0x58] sm:$0xf] }
 0x3a2   : > { %2384 = vrot.lane.b32.xlu0 %v2311_v61, %s5167_s26 }
 0x3a3   : > { %v2331_v19 = vpop.permute.xlu1 %2330 }
 0x3a4   : > { %v2329_v12 = vpop.permute.xlu0 %2328  ;;  %v2633_v43 = vsel %vm383_vm2, %v6788_v41, %v2331_v19  ;;  %v7071_v41 = vld [vmem:[#allocation2 + $0x8] sm:$0xff]  ;;  %v2435_v19 = vrot.slane %v4971_v52, 2 }
 0x3a5   : > { %2584 = vrot.lane.b32.xlu1 %v2511_v31, %s5166_s15  ;;  %v2632_v26 = vsel %vm383_vm2, %v6794_v49, %v2329_v12  ;;  %v2433_v49 = vrot.slane %v7071_v41, 2  ;;  %v7076_v12 = vld [vmem:[#allocation2] sm:$0xff] }
 0x3a6   : > { %2582 = vrot.lane.b32.xlu0 %v2509_v1, %s5166_s15  ;;  %v2432_v56 = vrot.slane %v7076_v12, 2  ;;  %v7079_v1 = vpack.c.bf16 %v349_v15, %v348_v14 }
 0x3a7   : > { %v2529_v50 = vpop.permute.xlu1 %2528  ;;  %v2436_v14 = vsel %vm723_vm3, %v2433_v49, %v2435_v19 }
 0x3a8   : > { %v2527_v44 = vpop.permute.xlu0 %2526  ;;  %v7062_v61 = vsel %vm958_vm8, %v2633_v43, %v2529_v50  ;;  %v7083_v43 = vld [vmem:[#allocation2 + $0x198] sm:$0xff]  ;;  %v2179_v50 = vld [vmem:[#allocation2 + $0x1a8] sm:$0x3]  ;;  %v2434_v15 = vsel %vm723_vm3, %v2432_v56, %v2433_v49 }
 0x3a9   : > { %v7067_v31 = vsel %vm958_vm8, %v2632_v26, %v2527_v44  ;;  %2390 = vrot.lane.b32.xlu1 %v2318_v7, %s5167_s26  ;;  %v7085_v26 = vld [vmem:[#allocation2 + $0x1a0] sm:$0xff]  ;;  %v2516_v44 = vsel %vm723_vm3, %v2513_v2, %v2515_v22  ;;  %v2514_v7 = vsel %vm723_vm3, %v2512_v48, %v2513_v2  ;;  %v2319_v22 = vrot.slane %v7083_v43, 1 }
 0x3aa   : > { %2388 = vrot.lane.b32.xlu0 %v2316_v5, %s5167_s26  ;;  %4533 = vmatprep.mubr.msk.f32.mxu1 %vm995_vm9, %v7067_v31  ;;  %v2320_v48 = vrot.slane %v7085_v26, 1  ;;  %v2322_v2 = vrot.slane %v2179_v50, 1 }
 0x3ab   : > { %4534 = vmatmul.mubr.msk.f32.vlgmr.msra.gmra.mrb[0].mxu1 %vm995_vm9, %v7062_v61  ;;  %v2335_v24 = vpop.permute.xlu1 %2334 }
 0x3ac   : > { %v2333_v0 = vpop.permute.xlu0 %2332  ;;  %4714 = vmatpush3.bf16.msk.msra.mxu1 %vm5825_vm7, %v6916_v40  ;;  %v2635_v40 = vsel %vm383_vm2, %v6806_v6, %v2335_v24  ;;  %v2321_v6 = vsel %vm524_vm4, %v2319_v22, %v2320_v48  ;;  %v2323_v56 = vsel %vm524_vm4, %v2320_v48, %v2322_v2  ;;  %v2518_v24 = vrot.slane %v7085_v26, 2 }
 0x3ad   : > { %2588 = vrot.lane.b32.xlu1 %v2516_v44, %s5166_s15  ;;  %4717 = vmatprep.subr.msk.bf16.mxu1 %vm5825_vm7, %v7079_v1  ;;  %v2634_v5 = vsel %vm383_vm2, %v6810_v45, %v2333_v0  ;;  %v2517_v45 = vrot.slane %v7083_v43, 2 }
 0x3ae   : > { %2586 = vrot.lane.b32.xlu0 %v2514_v7, %s5166_s15 }
 0x3af   : > { %v2533_v52 = vpop.permute.xlu1 %2532 }
 0x3b0   : > { %v2531_v44 = vpop.permute.xlu0 %2530  ;;  %v7106_v19 = vsel %vm958_vm8, %v2635_v40, %v2533_v52  ;;  %v2520_v40 = vrot.slane %v2179_v50, 2 }
 0x3b1   : > { %v7109_v49 = vsel %vm958_vm8, %v2634_v5, %v2531_v44  ;;  %2524 = vrot.lane.b32.xlu1 %v2436_v14, %s5166_s15  ;;  %v2519_v14 = vsel %vm723_vm3, %v2517_v45, %v2518_v24 }
 0x3b2   : > { %2522 = vrot.lane.b32.xlu0 %v2434_v15, %s5166_s15  ;;  %4536 = vmatprep.mubr.msk.f32.mxu1 %vm995_vm9, %v7109_v49  ;;  %v2521_v5 = vsel %vm723_vm3, %v2518_v24, %v2520_v40 }
 0x3b3   : > { %4537 = vmatmul.mubr.msk.f32.gmra.mrb[2].mxu1 %vm995_vm9, %v7106_v19  ;;  %v2339_v0 = vpop.permute.xlu1 %2338 }
 0x3b4   : > { %v2337_v7 = vpop.permute.xlu0 %2336  ;;  %v2637_v15 = vsel %vm383_vm2, %v6822_v23, %v2339_v0 }
 0x3b5   : > { %2394 = vrot.lane.b32.xlu1 %v2323_v56, %s5167_s26  ;;  %v2636_v22 = vsel %vm383_vm2, %v6826_v20, %v2337_v7 }
 0x3b6   : > { %2392 = vrot.lane.b32.xlu0 %v2321_v6, %s5167_s26 }
 0x3b7   : > { %v2537_v48 = vpop.permute.xlu1 %2536 }
 0x3b8   : > { %v2535_v2 = vpop.permute.xlu0 %2534  ;;  %v7130_v52 = vsel %vm958_vm8, %v2637_v15, %v2537_v48 }
 0x3b9   : > { %v7133_v50 = vsel %vm958_vm8, %v2636_v22, %v2535_v2  ;;  %2592 = vrot.lane.b32.xlu1 %v2521_v5, %s5166_s15 }
 0x3ba   : > { %4539 = vmatprep.mubr.msk.f32.mxu1 %vm995_vm9, %v7133_v50  ;;  %2590 = vrot.lane.b32.xlu0 %v2519_v14, %s5166_s15 }
 0x3bb   : > { %4540 = vmatmul.mubr.msk.f32.gmra.mrb[4].mxu1 %vm995_vm9, %v7130_v52  ;;  %v2343_v23 = vpop.permute.xlu1 %2342 }
 0x3bc   : > { %v2341_v20 = vpop.permute.xlu0 %2340  ;;  %v2639_v44 = vsel %vm383_vm2, %v6838_v8, %v2343_v23 }
 0x3bd   : > { %v2638_v6 = vsel %vm383_vm2, %v6842_v25, %v2341_v20 }
 0x3bf   : > { %v2541_v56 = vpop.permute.xlu1 %2540 }
 0x3c0   : > { %v2539_v45 = vpop.permute.xlu0 %2538  ;;  %v7146_v24 = vsel %vm958_vm8, %v2639_v44, %v2541_v56 }
 0x3c1   : > { %v7149_v0 = vsel %vm958_vm8, %v2638_v6, %v2539_v45 }
 0x3c2   : > { %4542 = vmatprep.mubr.msk.f32.mxu1 %vm995_vm9, %v7149_v0 }
 0x3c3   : > { %4543 = vmatmul.mubr.msk.f32.gmra.mrb[6].mxu1 %vm995_vm9, %v7146_v24  ;;  %v2347_v7 = vpop.permute.xlu1 %2346 }
 0x3c4   : > { %v2345_v40 = vpop.permute.xlu0 %2344  ;;  %v2641_v8 = vsel %vm383_vm2, %v6854_v58, %v2347_v7 }
 0x3c5   : > { %v2640_v25 = vsel %vm383_vm2, %v6858_v51, %v2345_v40 }
 0x3c7   : > { %v2545_v14 = vpop.permute.xlu1 %2544 }
 0x3c8   : > { %v2543_v15 = vpop.permute.xlu0 %2542  ;;  %v7160_v22 = vsel %vm958_vm8, %v2641_v8, %v2545_v14 }
 0x3c9   : > { %v7163_v48 = vsel %vm958_vm8, %v2640_v25, %v2543_v15 }
 0x3ca   : > { %4545 = vmatprep.mubr.msk.f32.mxu1 %vm995_vm9, %v7163_v48 }
 0x3cb   : > { %4546 = vmatmul.mubr.msk.f32.gmra.mrb[8].mxu1 %vm995_vm9, %v7160_v22  ;;  %v2351_v2 = vpop.permute.xlu1 %2350 }
 0x3cc   : > { %v2349_v5 = vpop.permute.xlu0 %2348  ;;  %v2643_v58 = vsel %vm383_vm2, %v6870_v29, %v2351_v2 }
 0x3cd   : > { %v2642_v51 = vsel %vm383_vm2, %v6874_v3, %v2349_v5 }
 0x3cf   : > { %v2549_v23 = vpop.permute.xlu1 %2548 }
 0x3d0   : > { %v2547_v20 = vpop.permute.xlu0 %2546  ;;  %v7174_v44 = vsel %vm958_vm8, %v2643_v58, %v2549_v23 }
 0x3d1   : > { %v7177_v6 = vsel %vm958_vm8, %v2642_v51, %v2547_v20 }
 0x3d2   : > { %4548 = vmatprep.mubr.msk.f32.mxu1 %vm995_vm9, %v7177_v6 }
 0x3d3   : > { %4549 = vmatmul.mubr.msk.f32.gmra.mrb[10].mxu1 %vm995_vm9, %v7174_v44  ;;  %v2355_v56 = vpop.permute.xlu1 %2354 }
 0x3d4   : > { %v2353_v45 = vpop.permute.xlu0 %2352  ;;  %v2645_v29 = vsel %vm383_vm2, %v6886_v42, %v2355_v56 }
 0x3d5   : > { %v2644_v3 = vsel %vm383_vm2, %v6890_v30, %v2353_v45 }
 0x3d7   : > { %v2553_v7 = vpop.permute.xlu1 %2552 }
 0x3d8   : > { %v2551_v40 = vpop.permute.xlu0 %2550  ;;  %v7188_v8 = vsel %vm958_vm8, %v2645_v29, %v2553_v7 }
 0x3d9   : > { %v7191_v25 = vsel %vm958_vm8, %v2644_v3, %v2551_v40 }
 0x3da   : > { %4551 = vmatprep.mubr.msk.f32.mxu1 %vm995_vm9, %v7191_v25 }
 0x3db   : > { %4552 = vmatmul.mubr.msk.f32.gmra.mrb[12].mxu1 %vm995_vm9, %v7188_v8  ;;  %v2359_v14 = vpop.permute.xlu1 %2358 }
 0x3dc   : > { %v2357_v15 = vpop.permute.xlu0 %2356  ;;  %v2647_v42 = vsel %vm383_vm2, %v6902_v47, %v2359_v14 }
 0x3dd   : > { %v2646_v30 = vsel %vm383_vm2, %v6906_v62, %v2357_v15 }
 0x3df   : > { %v2557_v2 = vpop.permute.xlu1 %2556 }
 0x3e0   : > { %v2555_v5 = vpop.permute.xlu0 %2554  ;;  %v7202_v58 = vsel %vm958_vm8, %v2647_v42, %v2557_v2 }
 0x3e1   : > { %v7205_v51 = vsel %vm958_vm8, %v2646_v30, %v2555_v5 }
 0x3e2   : > { %4554 = vmatprep.mubr.msk.f32.mxu1 %vm995_vm9, %v7205_v51 }
 0x3e3   : > { %4555 = vmatmul.mubr.msk.f32.gmra.mrb[14].mxu1 %vm995_vm9, %v7202_v58  ;;  %v2363_v23 = vpop.permute.xlu1 %2362 }
 0x3e4   : > { %v2361_v20 = vpop.permute.xlu0 %2360  ;;  %v2649_v47 = vsel %vm383_vm2, %v6925_v54, %v2363_v23 }
 0x3e5   : > { %v2648_v62 = vsel %vm383_vm2, %v6929_v4, %v2361_v20 }
 0x3e7   : > { %v2561_v56 = vpop.permute.xlu1 %2560 }
 0x3e8   : > { %v2559_v45 = vpop.permute.xlu0 %2558  ;;  %v7216_v29 = vsel %vm958_vm8, %v2649_v47, %v2561_v56 }
 0x3e9   : > { %v7219_v3 = vsel %vm958_vm8, %v2648_v62, %v2559_v45 }
 0x3ea   : > { %4557 = vmatprep.mubr.msk.f32.mxu1 %vm995_vm9, %v7219_v3 }
 0x3eb   : > { %4558 = vmatmul.mubr.msk.f32.gmra.mrb[16].mxu1 %vm995_vm9, %v7216_v29  ;;  %v2367_v7 = vpop.permute.xlu1 %2366 }
 0x3ec   : > { %v2365_v40 = vpop.permute.xlu0 %2364  ;;  %v2651_v54 = vsel %vm383_vm2, %v6941_v13, %v2367_v7 }
 0x3ed   : > { %v2650_v4 = vsel %vm383_vm2, %v6945_v9, %v2365_v40 }
 0x3ef   : > { %v2565_v14 = vpop.permute.xlu1 %2564 }
 0x3f0   : > { %v2563_v15 = vpop.permute.xlu0 %2562  ;;  %v7230_v42 = vsel %vm958_vm8, %v2651_v54, %v2565_v14 }
 0x3f1   : > { %v7233_v30 = vsel %vm958_vm8, %v2650_v4, %v2563_v15 }
 0x3f2   : > { %4560 = vmatprep.mubr.msk.f32.mxu1 %vm995_vm9, %v7233_v30 }
 0x3f3   : > { %4561 = vmatmul.mubr.msk.f32.gmra.mrb[18].mxu1 %vm995_vm9, %v7230_v42  ;;  %v2371_v2 = vpop.permute.xlu1 %2370 }
 0x3f4   : > { %v2369_v5 = vpop.permute.xlu0 %2368  ;;  %v2653_v13 = vsel %vm383_vm2, %v6957_v16, %v2371_v2 }
 0x3f5   : > { %v2652_v9 = vsel %vm383_vm2, %v6961_v18, %v2369_v5 }
 0x3f7   : > { %v2569_v23 = vpop.permute.xlu1 %2568 }
 0x3f8   : > { %v2567_v20 = vpop.permute.xlu0 %2566  ;;  %v7244_v47 = vsel %vm958_vm8, %v2653_v13, %v2569_v23 }
 0x3f9   : > { %v7247_v62 = vsel %vm958_vm8, %v2652_v9, %v2567_v20 }
 0x3fa   : > { %4563 = vmatprep.mubr.msk.f32.mxu1 %vm995_vm9, %v7247_v62 }
 0x3fb   : > { %4564 = vmatmul.mubr.msk.f32.gmra.mrb[20].mxu1 %vm995_vm9, %v7244_v47  ;;  %v2375_v56 = vpop.permute.xlu1 %2374 }
 0x3fc   : > { %v2373_v45 = vpop.permute.xlu0 %2372  ;;  %v2655_v16 = vsel %vm383_vm2, %v6973_v57, %v2375_v56 }
 0x3fd   : > { %v2654_v18 = vsel %vm383_vm2, %v6977_v46, %v2373_v45 }
 0x3ff   : > { %v2573_v7 = vpop.permute.xlu1 %2572 }
 0x400   : > { %v2571_v40 = vpop.permute.xlu0 %2570  ;;  %v7258_v54 = vsel %vm958_vm8, %v2655_v16, %v2573_v7 }
 0x401   : > { %v7261_v4 = vsel %vm958_vm8, %v2654_v18, %v2571_v40 }
 0x402   : > { %4566 = vmatprep.mubr.msk.f32.mxu1 %vm995_vm9, %v7261_v4 }
 0x403   : > { %4567 = vmatmul.mubr.msk.f32.gmra.mrb[22].mxu1 %vm995_vm9, %v7258_v54  ;;  %v2379_v14 = vpop.permute.xlu1 %2378 }
 0x404   : > { %v2377_v15 = vpop.permute.xlu0 %2376  ;;  %v2657_v57 = vsel %vm383_vm2, %v6989_v59, %v2379_v14 }
 0x405   : > { %v2656_v46 = vsel %vm383_vm2, %v6993_v21, %v2377_v15 }
 0x407   : > { %v2577_v2 = vpop.permute.xlu1 %2576 }
 0x408   : > { %v2575_v5 = vpop.permute.xlu0 %2574  ;;  %v7272_v13 = vsel %vm958_vm8, %v2657_v57, %v2577_v2 }
 0x409   : > { %v7275_v9 = vsel %vm958_vm8, %v2656_v46, %v2575_v5 }
 0x40a   : > { %4569 = vmatprep.mubr.msk.f32.mxu1 %vm995_vm9, %v7275_v9 }
 0x40b   : > { %4570 = vmatmul.mubr.msk.f32.gmra.mrb[24].mxu1 %vm995_vm9, %v7272_v13  ;;  %v2383_v23 = vpop.permute.xlu1 %2382 }
 0x40c   : > { %v2381_v20 = vpop.permute.xlu0 %2380  ;;  %v2659_v59 = vsel %vm383_vm2, %v7005_v28, %v2383_v23 }
 0x40d   : > { %v2658_v21 = vsel %vm383_vm2, %v7009_v27, %v2381_v20 }
 0x40f   : > { %v2581_v56 = vpop.permute.xlu1 %2580 }
 0x410   : > { %v2579_v45 = vpop.permute.xlu0 %2578  ;;  %v7286_v16 = vsel %vm958_vm8, %v2659_v59, %v2581_v56 }
 0x411   : > { %v7289_v18 = vsel %vm958_vm8, %v2658_v21, %v2579_v45 }
 0x412   : > { %4572 = vmatprep.mubr.msk.f32.mxu1 %vm995_vm9, %v7289_v18 }
 0x413   : > { %4573 = vmatmul.mubr.msk.f32.gmra.mrb[26].mxu1 %vm995_vm9, %v7286_v16  ;;  %v2387_v7 = vpop.permute.xlu1 %2386 }
 0x414   : > { %v2385_v40 = vpop.permute.xlu0 %2384  ;;  %v2661_v28 = vsel %vm383_vm2, %v7021_v55, %v2387_v7 }
 0x415   : > { %v2660_v27 = vsel %vm383_vm2, %v7025_v11, %v2385_v40 }
 0x417   : > { %v2585_v14 = vpop.permute.xlu1 %2584 }
 0x418   : > { %v2583_v15 = vpop.permute.xlu0 %2582  ;;  %v7300_v57 = vsel %vm958_vm8, %v2661_v28, %v2585_v14 }
 0x419   : > { %v7303_v46 = vsel %vm958_vm8, %v2660_v27, %v2583_v15 }
 0x41a   : > { %4575 = vmatprep.mubr.msk.f32.mxu1 %vm995_vm9, %v7303_v46 }
 0x41b   : > { %4576 = vmatmul.mubr.msk.f32.gmra.mrb[28].mxu1 %vm995_vm9, %v7300_v57  ;;  %v2391_v2 = vpop.permute.xlu1 %2390 }
 0x41c   : > { %v2389_v5 = vpop.permute.xlu0 %2388  ;;  %v2663_v55 = vsel %vm383_vm2, %v7045_v17, %v2391_v2  ;;  %v2631_v17 = vsel %vm383_vm2, %v7071_v41, %v7033_v53 }
 0x41d   : > { %v2662_v11 = vsel %vm383_vm2, %v7041_v63, %v2389_v5  ;;  %v2630_v63 = vsel %vm383_vm2, %v7076_v12, %v7035_v60 }
 0x41f   : > { %v2589_v23 = vpop.permute.xlu1 %2588 }
 0x420   : > { %v2587_v20 = vpop.permute.xlu0 %2586  ;;  %v7314_v59 = vsel %vm958_vm8, %v2663_v55, %v2589_v23 }
 0x421   : > { %v7317_v21 = vsel %vm958_vm8, %v2662_v11, %v2587_v20 }
 0x422   : > { %4578 = vmatprep.mubr.msk.f32.mxu1 %vm995_vm9, %v7317_v21 }
 0x423   : > { %4579 = vmatmul.mubr.msk.f32.gmra.mrb[30].mxu1 %vm995_vm9, %v7314_v59  ;;  %v2525_v56 = vpop.permute.xlu1 %2524 }
 0x424   : > { %v2523_v45 = vpop.permute.xlu0 %2522  ;;  %v2667_v7 = vsel %vm958_vm8, %v2631_v17, %v2525_v56 }
 0x425   : > { %v2666_v40 = vsel %vm958_vm8, %v2630_v63, %v2523_v45 }
 0x426   : > { %4585 = vmatprep.mubr.msk.f32.mxu1 %vm995_vm9, %v2666_v40 }
 0x427   : > { %4586 = vmatmul.mubr.msk.f32.vlgmr.msra.gmra.mrb[0].mxu1 %vm995_vm9, %v2667_v7  ;;  %v2395_v53 = vpop.permute.xlu1 %2394 }
 0x428   : > { %4720 = vmatpush3.bf16.msk.msra.mxu1 %vm5825_vm7, %v7079_v1  ;;  %4588 = vmatprep.mubr.msk.f32.mxu1 %vm995_vm9, %v7067_v31  ;;  %v2393_v10 = vpop.permute.xlu0 %2392  ;;  %v2665_v41 = vsel %vm383_vm2, %v7085_v26, %v2395_v53 }
 0x429   : > { %v2664_v60 = vsel %vm383_vm2, %v7083_v43, %v2393_v10 }
 0x42b   : > { %4589 = vmatmul.mubr.msk.f32.gmra.mrb[2].mxu1 %vm995_vm9, %v7062_v61  ;;  %v2593_v12 = vpop.permute.xlu1 %2592 }
 0x42c   : > { %4591 = vmatprep.mubr.msk.f32.mxu1 %vm995_vm9, %v7109_v49  ;;  %v2591_v61 = vpop.permute.xlu0 %2590  ;;  %v2701_v1 = vsel %vm958_vm8, %v2665_v41, %v2593_v12 }
 0x42d   : > { %v2700_v31 = vsel %vm958_vm8, %v2664_v60, %v2591_v61 }
 0x42f   : > { %4592 = vmatmul.mubr.msk.f32.gmra.mrb[4].mxu1 %vm995_vm9, %v7106_v19 }
 0x430   : > { %4594 = vmatprep.mubr.msk.f32.mxu1 %vm995_vm9, %v7133_v50 }
 0x433   : > { %4595 = vmatmul.mubr.msk.f32.gmra.mrb[6].mxu1 %vm995_vm9, %v7130_v52 }
 0x434   : > { %4597 = vmatprep.mubr.msk.f32.mxu1 %vm995_vm9, %v7149_v0 }
 0x437   : > { %4598 = vmatmul.mubr.msk.f32.gmra.mrb[8].mxu1 %vm995_vm9, %v7146_v24 }
 0x438   : > { %4600 = vmatprep.mubr.msk.f32.mxu1 %vm995_vm9, %v7163_v48 }
 0x43b   : > { %4601 = vmatmul.mubr.msk.f32.gmra.mrb[10].mxu1 %vm995_vm9, %v7160_v22 }
 0x43c   : > { %4603 = vmatprep.mubr.msk.f32.mxu1 %vm995_vm9, %v7177_v6 }
 0x43f   : > { %4604 = vmatmul.mubr.msk.f32.gmra.mrb[12].mxu1 %vm995_vm9, %v7174_v44 }
 0x440   : > { %4606 = vmatprep.mubr.msk.f32.mxu1 %vm995_vm9, %v7191_v25 }
 0x443   : > { %4607 = vmatmul.mubr.msk.f32.gmra.mrb[14].mxu1 %vm995_vm9, %v7188_v8 }
 0x444   : > { %4609 = vmatprep.mubr.msk.f32.mxu1 %vm995_vm9, %v7205_v51 }
 0x447   : > { %4610 = vmatmul.mubr.msk.f32.gmra.mrb[16].mxu1 %vm995_vm9, %v7202_v58 }
 0x448   : > { %4612 = vmatprep.mubr.msk.f32.mxu1 %vm995_vm9, %v7219_v3 }
 0x44b   : > { %4613 = vmatmul.mubr.msk.f32.gmra.mrb[18].mxu1 %vm995_vm9, %v7216_v29 }
 0x44c   : > { %4615 = vmatprep.mubr.msk.f32.mxu1 %vm995_vm9, %v7233_v30 }
 0x44f   : > { %4616 = vmatmul.mubr.msk.f32.gmra.mrb[20].mxu1 %vm995_vm9, %v7230_v42 }
 0x450   : > { %4618 = vmatprep.mubr.msk.f32.mxu1 %vm995_vm9, %v7247_v62 }
 0x453   : > { %4619 = vmatmul.mubr.msk.f32.gmra.mrb[22].mxu1 %vm995_vm9, %v7244_v47 }
 0x454   : > { %4621 = vmatprep.mubr.msk.f32.mxu1 %vm995_vm9, %v7261_v4 }
 0x457   : > { %4622 = vmatmul.mubr.msk.f32.gmra.mrb[24].mxu1 %vm995_vm9, %v7258_v54 }
 0x458   : > { %4624 = vmatprep.mubr.msk.f32.mxu1 %vm995_vm9, %v7275_v9 }
 0x45b   : > { %4625 = vmatmul.mubr.msk.f32.gmra.mrb[26].mxu1 %vm995_vm9, %v7272_v13 }
 0x45c   : > { %4627 = vmatprep.mubr.msk.f32.mxu1 %vm995_vm9, %v7289_v18 }
 0x45f   : > { %4628 = vmatmul.mubr.msk.f32.gmra.mrb[28].mxu1 %vm995_vm9, %v7286_v16 }
 0x460   : > { %4630 = vmatprep.mubr.msk.f32.mxu1 %vm995_vm9, %v7303_v46 }
 0x463   : > { %4631 = vmatmul.mubr.msk.f32.gmra.mrb[30].mxu1 %vm995_vm9, %v7300_v57 }
 0x464   : > { %4637 = vmatprep.mubr.msk.f32.mxu1 %vm995_vm9, %v7109_v49 }
 0x467   : > { %4638 = vmatmul.mubr.msk.f32.vlgmr.msra.gmra.mrb[0].mxu1 %vm995_vm9, %v7106_v19 }
 0x468   : > { %4640 = vmatprep.mubr.msk.f32.mxu1 %vm995_vm9, %v7133_v50 }
 0x46b   : > { %4641 = vmatmul.mubr.msk.f32.gmra.mrb[2].mxu1 %vm995_vm9, %v7130_v52 }
 0x46c   : > { %4643 = vmatprep.mubr.msk.f32.mxu1 %vm995_vm9, %v7149_v0 }
 0x46f   : > { %4644 = vmatmul.mubr.msk.f32.gmra.mrb[4].mxu1 %vm995_vm9, %v7146_v24 }
 0x470   : > { %4646 = vmatprep.mubr.msk.f32.mxu1 %vm995_vm9, %v7163_v48 }
 0x473   : > { %4647 = vmatmul.mubr.msk.f32.gmra.mrb[6].mxu1 %vm995_vm9, %v7160_v22 }
 0x474   : > { %4649 = vmatprep.mubr.msk.f32.mxu1 %vm995_vm9, %v7177_v6 }
 0x477   : > { %4650 = vmatmul.mubr.msk.f32.gmra.mrb[8].mxu1 %vm995_vm9, %v7174_v44 }
 0x478   : > { %4652 = vmatprep.mubr.msk.f32.mxu1 %vm995_vm9, %v7191_v25 }
 0x47b   : > { %4653 = vmatmul.mubr.msk.f32.gmra.mrb[10].mxu1 %vm995_vm9, %v7188_v8 }
 0x47c   : > { %4655 = vmatprep.mubr.msk.f32.mxu1 %vm995_vm9, %v7205_v51 }
 0x47f   : > { %4656 = vmatmul.mubr.msk.f32.gmra.mrb[12].mxu1 %vm995_vm9, %v7202_v58 }
 0x480   : > { %4658 = vmatprep.mubr.msk.f32.mxu1 %vm995_vm9, %v7219_v3 }
 0x483   : > { %4659 = vmatmul.mubr.msk.f32.gmra.mrb[14].mxu1 %vm995_vm9, %v7216_v29 }
 0x484   : > { %4661 = vmatprep.mubr.msk.f32.mxu1 %vm995_vm9, %v7233_v30 }
 0x487   : > { %4662 = vmatmul.mubr.msk.f32.gmra.mrb[16].mxu1 %vm995_vm9, %v7230_v42 }
 0x488   : > { %4664 = vmatprep.mubr.msk.f32.mxu1 %vm995_vm9, %v7247_v62 }
 0x48b   : > { %4665 = vmatmul.mubr.msk.f32.gmra.mrb[18].mxu1 %vm995_vm9, %v7244_v47 }
 0x48c   : > { %4667 = vmatprep.mubr.msk.f32.mxu1 %vm995_vm9, %v7261_v4 }
 0x48f   : > { %4668 = vmatmul.mubr.msk.f32.gmra.mrb[20].mxu1 %vm995_vm9, %v7258_v54 }
 0x490   : > { %4670 = vmatprep.mubr.msk.f32.mxu1 %vm995_vm9, %v7275_v9 }
 0x493   : > { %4671 = vmatmul.mubr.msk.f32.gmra.mrb[22].mxu1 %vm995_vm9, %v7272_v13 }
 0x494   : > { %4673 = vmatprep.mubr.msk.f32.mxu1 %vm995_vm9, %v7289_v18 }
 0x497   : > { %4674 = vmatmul.mubr.msk.f32.gmra.mrb[24].mxu1 %vm995_vm9, %v7286_v16 }
 0x498   : > { %4676 = vmatprep.mubr.msk.f32.mxu1 %vm995_vm9, %v7303_v46 }
 0x49b   : > { %4677 = vmatmul.mubr.msk.f32.gmra.mrb[26].mxu1 %vm995_vm9, %v7300_v57 }
 0x49c   : > { %4679 = vmatprep.mubr.msk.f32.mxu1 %vm995_vm9, %v7317_v21 }
 0x49f   : > { %4680 = vmatmul.mubr.msk.f32.gmra.mrb[28].mxu1 %vm995_vm9, %v7314_v59 }
 0x4a0   : > { %4682 = vmatprep.mubr.msk.f32.mxu1 %vm995_vm9, %v2700_v31 }
 0x4a3   : > { %4683 = vmatmul.mubr.msk.f32.gmra.mrb[30].mxu1 %vm995_vm9, %v2701_v1 }
 0x53a   : > { %v7464_v43 = vpop.f32.mrb[0].mxu1 }
 0x53b   : > { %v3527_v19 = vsel %vm383_vm2, %v7464_v43, 0.0  ;;  %v3596_v49 = vmul.f32 %v7464_v43, %v7464_v43  ;;  %v7470_v52 = vpop.f32.mrb[1].mxu1 }
 0x53c   : > { %v3526_v26 = vsel %vm383_vm2, %v7470_v52, 0.0  ;;  %v3595_v50 = vmul.f32 %v7470_v52, %v7470_v52 }
 0x53d   : > { %v3628_v24 = vsel %vm383_vm2, %v3596_v49, 0.0  ;;  %v3528_v0 = vadd.f32 %v3527_v19, %v3526_v26 }
 0x53e   : > { %v3627_v22 = vsel %vm383_vm2, %v3595_v50, 0.0  ;;  %v7478_v48 = vpop.f32.mrb[2].mxu1 }
 0x53f   : > { %v3629_v44 = vadd.f32 %v3628_v24, %v3627_v22  ;;  %v7480_v6 = vpop.f32.mrb[3].mxu1  ;;  %v3598_v8 = vmul.f32 %v7478_v48, %v7478_v48  ;;  %v3531_v29 = vsel %vm383_vm2, %v7478_v48, 0.0 }
 0x540   : > { %v3529_v25 = vsel %vm383_vm2, %v7480_v6, 0.0  ;;  %v3597_v58 = vmul.f32 %v7480_v6, %v7480_v6 }
 0x541   : > { %v3530_v51 = vadd.f32 %v3529_v25, %v3528_v0  ;;  %v3632_v54 = vsel %vm383_vm2, %v3598_v8, 0.0 }
 0x542   : > { %v3630_v3 = vsel %vm383_vm2, %v3597_v58, 0.0  ;;  %v7491_v42 = vpop.f32.mrb[4].mxu1 }
 0x543   : > { %v3631_v30 = vadd.f32 %v3630_v3, %v3629_v44  ;;  %v7493_v47 = vpop.f32.mrb[5].mxu1  ;;  %v3532_v62 = vadd.f32 %v3531_v29, %v3530_v51  ;;  %v3600_v4 = vmul.f32 %v7491_v42, %v7491_v42  ;;  %v3535_v28 = vsel %vm383_vm2, %v7491_v42, 0.0 }
 0x544   : > { %v3533_v13 = vsel %vm383_vm2, %v7493_v47, 0.0  ;;  %v3599_v9 = vmul.f32 %v7493_v47, %v7493_v47 }
 0x545   : > { %v3534_v16 = vadd.f32 %v3533_v13, %v3532_v62  ;;  %v3633_v18 = vadd.f32 %v3632_v54, %v3631_v30  ;;  %v3636_v2 = vsel %vm383_vm2, %v3600_v4, 0.0 }
 0x546   : > { %v3634_v27 = vsel %vm383_vm2, %v3599_v9, 0.0  ;;  %v7505_v14 = vpop.f32.mrb[6].mxu1 }
 0x547   : > { %v3635_v15 = vadd.f32 %v3634_v27, %v3633_v18  ;;  %v7507_v57 = vpop.f32.mrb[7].mxu1  ;;  %v3536_v46 = vadd.f32 %v3535_v28, %v3534_v16  ;;  %v3602_v5 = vmul.f32 %v7505_v14, %v7505_v14  ;;  %v3539_v59 = vsel %vm383_vm2, %v7505_v14, 0.0 }
 0x548   : > { %v3537_v55 = vsel %vm383_vm2, %v7507_v57, 0.0  ;;  %v3601_v11 = vmul.f32 %v7507_v57, %v7507_v57 }
 0x549   : > { %v3538_v23 = vadd.f32 %v3537_v55, %v3536_v46  ;;  %v3637_v20 = vadd.f32 %v3636_v2, %v3635_v15  ;;  %v3640_v7 = vsel %vm383_vm2, %v3602_v5, 0.0 }
 0x54a   : > { %v3638_v21 = vsel %vm383_vm2, %v3601_v11, 0.0  ;;  %v7519_v17 = vpop.f32.mrb[8].mxu1 }
 0x54b   : > { %v3639_v63 = vadd.f32 %v3638_v21, %v3637_v20  ;;  %v7521_v56 = vpop.f32.mrb[9].mxu1  ;;  %v3540_v45 = vadd.f32 %v3539_v59, %v3538_v23  ;;  %v3604_v40 = vmul.f32 %v7519_v17, %v7519_v17  ;;  %v3543_v31 = vsel %vm383_vm2, %v7519_v17, 0.0 }
 0x54c   : > { %v3541_v10 = vsel %vm383_vm2, %v7521_v56, 0.0  ;;  %v3603_v53 = vmul.f32 %v7521_v56, %v7521_v56 }
 0x54d   : > { %v3542_v60 = vadd.f32 %v3541_v10, %v3540_v45  ;;  %v3641_v61 = vadd.f32 %v3640_v7, %v3639_v63  ;;  %v3644_v26 = vsel %vm383_vm2, %v3604_v40, 0.0 }
 0x54e   : > { %v3642_v41 = vsel %vm383_vm2, %v3603_v53, 0.0  ;;  %v7533_v12 = vpop.f32.mrb[10].mxu1 }
 0x54f   : > { %v3643_v1 = vadd.f32 %v3642_v41, %v3641_v61  ;;  %v7535_v19 = vpop.f32.mrb[11].mxu1  ;;  %v3544_v49 = vadd.f32 %v3543_v31, %v3542_v60  ;;  %v3606_v50 = vmul.f32 %v7533_v12, %v7533_v12  ;;  %v3547_v8 = vsel %vm383_vm2, %v7533_v12, 0.0 }
 0x550   : > { %v3545_v24 = vsel %vm383_vm2, %v7535_v19, 0.0  ;;  %v3605_v0 = vmul.f32 %v7535_v19, %v7535_v19 }
 0x551   : > { %v3546_v22 = vadd.f32 %v3545_v24, %v3544_v49  ;;  %v3645_v44 = vadd.f32 %v3644_v26, %v3643_v1  ;;  %v3648_v30 = vsel %vm383_vm2, %v3606_v50, 0.0 }
 0x552   : > { %v3646_v25 = vsel %vm383_vm2, %v3605_v0, 0.0  ;;  %v7547_v58 = vpop.f32.mrb[12].mxu1 }
 0x553   : > { %v3647_v51 = vadd.f32 %v3646_v25, %v3645_v44  ;;  %v7549_v29 = vpop.f32.mrb[13].mxu1  ;;  %v3548_v3 = vadd.f32 %v3547_v8, %v3546_v22  ;;  %v3608_v62 = vmul.f32 %v7547_v58, %v7547_v58  ;;  %v3551_v16 = vsel %vm383_vm2, %v7547_v58, 0.0 }
 0x554   : > { %v3549_v54 = vsel %vm383_vm2, %v7549_v29, 0.0  ;;  %v3607_v4 = vmul.f32 %v7549_v29, %v7549_v29 }
 0x555   : > { %v3550_v13 = vadd.f32 %v3549_v54, %v3548_v3  ;;  %v3649_v9 = vadd.f32 %v3648_v30, %v3647_v51  ;;  %v3652_v2 = vsel %vm383_vm2, %v3608_v62, 0.0 }
 0x556   : > { %v3650_v18 = vsel %vm383_vm2, %v3607_v4, 0.0  ;;  %v7561_v28 = vpop.f32.mrb[14].mxu1 }
 0x557   : > { %v3651_v27 = vadd.f32 %v3650_v18, %v3649_v9  ;;  %v7563_v15 = vpop.f32.mrb[15].mxu1  ;;  %v3552_v46 = vadd.f32 %v3551_v16, %v3550_v13  ;;  %v3610_v5 = vmul.f32 %v7561_v28, %v7561_v28  ;;  %v3555_v59 = vsel %vm383_vm2, %v7561_v28, 0.0 }
 0x558   : > { %v3553_v55 = vsel %vm383_vm2, %v7563_v15, 0.0  ;;  %v3609_v11 = vmul.f32 %v7563_v15, %v7563_v15 }
 0x559   : > { %v3554_v23 = vadd.f32 %v3553_v55, %v3552_v46  ;;  %v3653_v20 = vadd.f32 %v3652_v2, %v3651_v27  ;;  %v3656_v10 = vsel %vm383_vm2, %v3610_v5, 0.0 }
 0x55a   : > { %v3654_v21 = vsel %vm383_vm2, %v3609_v11, 0.0  ;;  %v7575_v63 = vpop.f32.mrb[16].mxu1 }
 0x55b   : > { %v3655_v45 = vadd.f32 %v3654_v21, %v3653_v20  ;;  %v7577_v7 = vpop.f32.mrb[17].mxu1  ;;  %v3556_v40 = vadd.f32 %v3555_v59, %v3554_v23  ;;  %v3612_v53 = vmul.f32 %v7575_v63, %v7575_v63  ;;  %v3559_v1 = vsel %vm383_vm2, %v7575_v63, 0.0 }
 0x55c   : > { %v3557_v60 = vsel %vm383_vm2, %v7577_v7, 0.0  ;;  %v3611_v61 = vmul.f32 %v7577_v7, %v7577_v7 }
 0x55d   : > { %v3558_v31 = vadd.f32 %v3557_v60, %v3556_v40  ;;  %v3657_v41 = vadd.f32 %v3656_v10, %v3655_v45  ;;  %v3660_v22 = vsel %vm383_vm2, %v3612_v53, 0.0 }
 0x55e   : > { %v3658_v49 = vsel %vm383_vm2, %v3611_v61, 0.0  ;;  %v7589_v26 = vpop.f32.mrb[18].mxu1 }
 0x55f   : > { %v3659_v50 = vadd.f32 %v3658_v49, %v3657_v41  ;;  %v7591_v24 = vpop.f32.mrb[19].mxu1  ;;  %v3560_v0 = vadd.f32 %v3559_v1, %v3558_v31  ;;  %v3614_v44 = vmul.f32 %v7589_v26, %v7589_v26  ;;  %v3563_v30 = vsel %vm383_vm2, %v7589_v26, 0.0 }
 0x560   : > { %v3561_v8 = vsel %vm383_vm2, %v7591_v24, 0.0  ;;  %v3613_v25 = vmul.f32 %v7591_v24, %v7591_v24 }
 0x561   : > { %v3562_v51 = vadd.f32 %v3561_v8, %v3560_v0  ;;  %v3661_v3 = vadd.f32 %v3660_v22, %v3659_v50  ;;  %v3664_v16 = vsel %vm383_vm2, %v3614_v44, 0.0 }
 0x562   : > { %v3662_v62 = vsel %vm383_vm2, %v3613_v25, 0.0  ;;  %v7603_v54 = vpop.f32.mrb[20].mxu1 }
 0x563   : > { %v3663_v4 = vadd.f32 %v3662_v62, %v3661_v3  ;;  %v7605_v13 = vpop.f32.mrb[21].mxu1  ;;  %v3564_v9 = vadd.f32 %v3563_v30, %v3562_v51  ;;  %v3616_v18 = vmul.f32 %v7603_v54, %v7603_v54  ;;  %v3567_v55 = vsel %vm383_vm2, %v7603_v54, 0.0 }
 0x564   : > { %v3565_v27 = vsel %vm383_vm2, %v7605_v13, 0.0  ;;  %v3615_v46 = vmul.f32 %v7605_v13, %v7605_v13 }
 0x565   : > { %v3566_v2 = vadd.f32 %v3565_v27, %v3564_v9  ;;  %v3665_v5 = vadd.f32 %v3664_v16, %v3663_v4  ;;  %v3668_v45 = vsel %vm383_vm2, %v3616_v18, 0.0 }
 0x566   : > { %v3666_v11 = vsel %vm383_vm2, %v3615_v46, 0.0  ;;  %v7617_v23 = vpop.f32.mrb[22].mxu1 }
 0x567   : > { %v3667_v20 = vadd.f32 %v3666_v11, %v3665_v5  ;;  %v7619_v59 = vpop.f32.mrb[23].mxu1  ;;  %v3568_v21 = vadd.f32 %v3567_v55, %v3566_v2  ;;  %v3618_v40 = vmul.f32 %v7617_v23, %v7617_v23  ;;  %v3571_v31 = vsel %vm383_vm2, %v7617_v23, 0.0 }
 0x568   : > { %v3569_v10 = vsel %vm383_vm2, %v7619_v59, 0.0  ;;  %v3617_v53 = vmul.f32 %v7619_v59, %v7619_v59 }
 0x569   : > { %v3570_v60 = vadd.f32 %v3569_v10, %v3568_v21  ;;  %v3669_v61 = vadd.f32 %v3668_v45, %v3667_v20  ;;  %v3672_v22 = vsel %vm383_vm2, %v3618_v40, 0.0 }
 0x56a   : > { %v3670_v41 = vsel %vm383_vm2, %v3617_v53, 0.0  ;;  %v7631_v1 = vpop.f32.mrb[24].mxu1 }
 0x56b   : > { %v3671_v49 = vadd.f32 %v3670_v41, %v3669_v61  ;;  %v7633_v50 = vpop.f32.mrb[25].mxu1  ;;  %v3572_v0 = vadd.f32 %v3571_v31, %v3570_v60  ;;  %v3620_v44 = vmul.f32 %v7631_v1, %v7631_v1  ;;  %v3575_v30 = vsel %vm383_vm2, %v7631_v1, 0.0 }
 0x56c   : > { %v3573_v8 = vsel %vm383_vm2, %v7633_v50, 0.0  ;;  %v3619_v25 = vmul.f32 %v7633_v50, %v7633_v50 }
 0x56d   : > { %v3574_v51 = vadd.f32 %v3573_v8, %v3572_v0  ;;  %v3673_v3 = vadd.f32 %v3672_v22, %v3671_v49  ;;  %v3676_v27 = vsel %vm383_vm2, %v3620_v44, 0.0 }
 0x56e   : > { %v3674_v62 = vsel %vm383_vm2, %v3619_v25, 0.0  ;;  %v7645_v4 = vpop.f32.mrb[26].mxu1 }
 0x56f   : > { %v3675_v9 = vadd.f32 %v3674_v62, %v3673_v3  ;;  %v7647_v16 = vpop.f32.mrb[27].mxu1  ;;  %v3576_v18 = vadd.f32 %v3575_v30, %v3574_v51  ;;  %v3622_v46 = vmul.f32 %v7645_v4, %v7645_v4  ;;  %v3579_v20 = vsel %vm383_vm2, %v7645_v4, 0.0 }
 0x570   : > { %v3577_v2 = vsel %vm383_vm2, %v7647_v16, 0.0  ;;  %v3621_v5 = vmul.f32 %v7647_v16, %v7647_v16 }
 0x571   : > { %v3578_v55 = vadd.f32 %v3577_v2, %v3576_v18  ;;  %v3677_v11 = vadd.f32 %v3676_v27, %v3675_v9  ;;  %v3680_v60 = vsel %vm383_vm2, %v3622_v46, 0.0 }
 0x572   : > { %v3678_v21 = vsel %vm383_vm2, %v3621_v5, 0.0  ;;  %v7659_v45 = vpop.f32.mrb[28].mxu1 }
 0x573   : > { %v3679_v40 = vadd.f32 %v3678_v21, %v3677_v11  ;;  %v7661_v10 = vpop.f32.mrb[29].mxu1  ;;  %v3580_v53 = vadd.f32 %v3579_v20, %v3578_v55  ;;  %v3624_v61 = vmul.f32 %v7659_v45, %v7659_v45  ;;  %v3583_v22 = vsel %vm383_vm2, %v7659_v45, 0.0 }
 0x574   : > { %v3581_v31 = vsel %vm383_vm2, %v7661_v10, 0.0  ;;  %v3623_v41 = vmul.f32 %v7661_v10, %v7661_v10 }
 0x575   : > { %v3582_v49 = vadd.f32 %v3581_v31, %v3580_v53  ;;  %v3681_v0 = vadd.f32 %v3680_v60, %v3679_v40  ;;  %v3684_v30 = vsel %vm383_vm2, %v3624_v61, 0.0 }
 0x576   : > { %v3682_v44 = vsel %vm383_vm2, %v3623_v41, 0.0  ;;  %v7673_v8 = vpop.f32.mrb[30].mxu1 }
 0x577   : > { %v3683_v25 = vadd.f32 %v3682_v44, %v3681_v0  ;;  %v7675_v51 = vpop.f32.mrb[31].mxu1  ;;  %v3584_v3 = vadd.f32 %v3583_v22, %v3582_v49  ;;  %v3626_v62 = vmul.f32 %v7673_v8, %v7673_v8  ;;  %v3587_v2 = vsel %vm383_vm2, %v7673_v8, 0.0 }
 0x578   : > { %v3585_v9 = vsel %vm383_vm2, %v7675_v51, 0.0  ;;  %v3625_v18 = vmul.f32 %v7675_v51, %v7675_v51 }
 0x579   : > { %v3586_v27 = vadd.f32 %v3585_v9, %v3584_v3  ;;  %v3685_v46 = vadd.f32 %v3684_v30, %v3683_v25  ;;  %v3688_v20 = vsel %vm383_vm2, %v3626_v62, 0.0 }
 0x57a   : > { %v3686_v5 = vsel %vm383_vm2, %v3625_v18, 0.0 }
 0x57b   : > { %v3588_v55 = vadd.f32 %v3587_v2, %v3586_v27  ;;  %v3687_v11 = vadd.f32 %v3686_v5, %v3685_v46 }
 0x57d   : > { %v3589_v21 = vrot.slane %v3588_v55, 4  ;;  %v3689_v40 = vadd.f32 %v3688_v20, %v3687_v11 }
 0x57f   : > { %v3590_v53 = vadd.f32 %v3589_v21, %v3588_v55  ;;  %v3690_v60 = vrot.slane %v3689_v40, 4 }
 0x581   : > { %v3591_v61 = vrot.slane %v3590_v53, 2  ;;  %v3691_v31 = vadd.f32 %v3690_v60, %v3689_v40 }
 0x583   : > { %v3592_v41 = vadd.f32 %v3591_v61, %v3590_v53  ;;  %v3692_v49 = vrot.slane %v3691_v31, 2 }
 0x585   : > { %v3593_v0 = vrot.slane %v3592_v41, 1  ;;  %v3693_v22 = vadd.f32 %v3692_v49, %v3691_v31 }
 0x587   : > { %v3594_v44 = vadd.f32 %v3593_v0, %v3592_v41  ;;  %v3694_v25 = vrot.slane %v3693_v22, 1 }
 0x589   : > { %v3695_v3 = vadd.f32 %v3694_v25, %v3693_v22  ;;  %v7688_v30 = vmul.f32 0.00390625, %v3594_v44 }
 0x58b   : > { %v3697_v9 = vmul.f32 0.00390625, %v3695_v3  ;;  %v3698_v18 = vmul.f32 %v7688_v30, %v7688_v30  ;;  %v3731_v62 = vsub.f32 %v7675_v51, %v7688_v30  ;;  %v3701_v27 = vsub.f32 %v7470_v52, %v7688_v30 }
 0x58c   : > { %v3702_v46 = vsub.f32 %v7464_v43, %v7688_v30  ;;  %v3703_v2 = vsub.f32 %v7480_v6, %v7688_v30  ;;  %v3704_v5 = vsub.f32 %v7478_v48, %v7688_v30  ;;  %v3705_v55 = vsub.f32 %v7493_v47, %v7688_v30 }
 0x58d   : > { %v3699_v11 = vsub.f32 %v3697_v9, %v3698_v18  ;;  %v3706_v20 = vsub.f32 %v7491_v42, %v7688_v30  ;;  %v3707_v51 = vsub.f32 %v7507_v57, %v7688_v30  ;;  %v3708_v52 = vsub.f32 %v7505_v14, %v7688_v30 }
 0x58e   : > { %v3709_v43 = vsub.f32 %v7521_v56, %v7688_v30  ;;  %v3710_v6 = vsub.f32 %v7519_v17, %v7688_v30  ;;  %v3711_v48 = vsub.f32 %v7535_v19, %v7688_v30  ;;  %v3712_v47 = vsub.f32 %v7533_v12, %v7688_v30 }
 0x58f   : > { %v3700_v21 = vmax.f32 %v3699_v11, 0.0  ;;  %v3713_v42 = vsub.f32 %v7549_v29, %v7688_v30  ;;  %v3714_v57 = vsub.f32 %v7547_v58, %v7688_v30  ;;  %v3715_v14 = vsub.f32 %v7563_v15, %v7688_v30 }
 0x590   : > { %v3716_v56 = vsub.f32 %v7561_v28, %v7688_v30  ;;  %v3717_v17 = vsub.f32 %v7577_v7, %v7688_v30  ;;  %v3718_v19 = vsub.f32 %v7575_v63, %v7688_v30  ;;  %v3719_v12 = vsub.f32 %v7591_v24, %v7688_v30 }
 0x591   : > { %v3733_v40 = vadd.f32 1e-05, %v3700_v21  ;;  %v3720_v29 = vsub.f32 %v7589_v26, %v7688_v30  ;;  %v3721_v58 = vsub.f32 %v7605_v13, %v7688_v30  ;;  %v3722_v15 = vsub.f32 %v7603_v54, %v7688_v30 }
 0x592   : > { %v3723_v28 = vsub.f32 %v7619_v59, %v7688_v30  ;;  %v3724_v7 = vsub.f32 %v7617_v23, %v7688_v30  ;;  %v3725_v63 = vsub.f32 %v7633_v50, %v7688_v30  ;;  %v3726_v24 = vsub.f32 %v7631_v1, %v7688_v30 }
 0x593   : > { %4968 = vrsqrt.f32 %v3733_v40  ;;  %v3727_v26 = vsub.f32 %v7647_v16, %v7688_v30  ;;  %v3728_v13 = vsub.f32 %v7645_v4, %v7688_v30  ;;  %v3729_v54 = vsub.f32 %v7661_v10, %v7688_v30 }
 0x594   : > { %v3730_v59 = vsub.f32 %v7659_v45, %v7688_v30  ;;  %v3732_v23 = vsub.f32 %v7673_v8, %v7688_v30 }
 0x59d   : > { %v4969_v50 = vpop.eup %4968 }
 0x59e   : > { %v3765_v53 = vmul.f32 %v4969_v50, %v3731_v62  ;;  %v3735_v1 = vmul.f32 %v4969_v50, %v3701_v27  ;;  %v3736_v60 = vmul.f32 %v4969_v50, %v3702_v46  ;;  %v3737_v61 = vmul.f32 %v4969_v50, %v3703_v2 }
 0x59f   : > { %v3738_v31 = vmul.f32 %v4969_v50, %v3704_v5  ;;  %v3739_v16 = vmul.f32 %v4969_v50, %v3705_v55  ;;  %v3740_v41 = vmul.f32 %v4969_v50, %v3706_v20  ;;  %v3741_v49 = vmul.f32 %v4969_v50, %v3707_v51 }
 0x5a0   : > { %v3797_v4 = vadd.f32 %v3765_v53, %v5771_v32  ;;  %v3742_v0 = vmul.f32 %v4969_v50, %v3708_v52  ;;  %v3743_v10 = vmul.f32 %v4969_v50, %v3709_v43  ;;  %v3744_v22 = vmul.f32 %v4969_v50, %v3710_v6  ;;  %v8018_v53 = vld [vmem:[#allocation27_spill] sm:$0xff] }
 0x5a1   : > { %v3745_v44 = vmul.f32 %v4969_v50, %v3711_v48  ;;  %v3746_v45 = vmul.f32 %v4969_v50, %v3712_v47  ;;  %v3747_v25 = vmul.f32 %v4969_v50, %v3713_v42  ;;  %v3748_v3 = vmul.f32 %v4969_v50, %v3714_v57 }
 0x5a2   : > { %3829 = vst.msk [vmem:[%s5428_s21 + $0xf0] sm:$0xff] %vm383_vm2, %v3797_v4  ;;  %v3749_v8 = vmul.f32 %v4969_v50, %v3715_v14  ;;  %v3750_v30 = vmul.f32 %v4969_v50, %v3716_v56  ;;  %v3751_v9 = vmul.f32 %v4969_v50, %v3717_v17  ;;  %v3752_v18 = vmul.f32 %v4969_v50, %v3718_v19  ;;  %v8006_v17 = vld [vmem:[#allocation15_spill] sm:$0xff] }
 0x5a3   : > { %v3753_v62 = vmul.f32 %v4969_v50, %v3719_v12  ;;  %v3754_v27 = vmul.f32 %v4969_v50, %v3720_v29  ;;  %v3755_v46 = vmul.f32 %v4969_v50, %v3721_v58  ;;  %v3756_v2 = vmul.f32 %v4969_v50, %v3722_v15  ;;  %v8012_v58 = vld [vmem:[#allocation21_spill] sm:$0xff]  ;;  %v8022_v4 = vld [vmem:[#allocation31_spill] sm:$0xff] }
 0x5a4   : > { %v3757_v5 = vmul.f32 %v4969_v50, %v3723_v28  ;;  %v3758_v55 = vmul.f32 %v4969_v50, %v3724_v7  ;;  %v3759_v32 = vmul.f32 %v4969_v50, %v3725_v63  ;;  %v3760_v11 = vmul.f32 %v4969_v50, %v3726_v24  ;;  %v8013_v28 = vld [vmem:[#allocation22_spill] sm:$0xff]  ;;  %v8014_v63 = vld [vmem:[#allocation23_spill] sm:$0xff] }
 0x5a5   : > { %v3761_v20 = vmul.f32 %v4969_v50, %v3727_v26  ;;  %v3762_v51 = vmul.f32 %v4969_v50, %v3728_v13  ;;  %v3763_v52 = vmul.f32 %v4969_v50, %v3729_v54  ;;  %v3764_v43 = vmul.f32 %v4969_v50, %v3730_v59  ;;  %v8015_v26 = vld [vmem:[#allocation24_spill] sm:$0xff]  ;;  %v8016_v54 = vld [vmem:[#allocation25_spill] sm:$0xff] }
 0x5a6   : > { %v3766_v6 = vmul.f32 %v4969_v50, %v3732_v23  ;;  %v3767_v48 = vadd.f32 %v3735_v1, %v5582_v33  ;;  %v3768_v47 = vadd.f32 %v3736_v60, %v5585_v34  ;;  %v3769_v21 = vadd.f32 %v3737_v61, %v5592_v35  ;;  %v8007_v33 = vld [vmem:[#allocation16_spill] sm:$0xff]  ;;  %v8008_v34 = vld [vmem:[#allocation17_spill] sm:$0xff]  ;;  %v8009_v35 = vld [vmem:[#allocation18_spill] sm:$0xff] }
 0x5a7   : > { %v3770_v42 = vadd.f32 %v3738_v31, %v5595_v36  ;;  %v3771_v57 = vadd.f32 %v3739_v16, %v5598_v37  ;;  %v3772_v14 = vadd.f32 %v3740_v41, %v5605_v38  ;;  %v3773_v56 = vadd.f32 %v3741_v49, %v5610_v39  ;;  %v8010_v36 = vld [vmem:[#allocation19_spill] sm:$0xff]  ;;  %v8011_v38 = vld [vmem:[#allocation20_spill] sm:$0xff]  ;;  %v8017_v23 = vld [vmem:[#allocation26_spill] sm:$0xff] }
 0x5a8   : > { %v3774_v19 = vadd.f32 %v3742_v0, %v8006_v17  ;;  %v3775_v12 = vadd.f32 %v3743_v10, %v8007_v33  ;;  %v3776_v40 = vadd.f32 %v3744_v22, %v8008_v34  ;;  %v3777_v29 = vadd.f32 %v3745_v44, %v8009_v35  ;;  %3799 = vst.msk [vmem:[%s5428_s21] sm:$0xff] %vm383_vm2, %v3767_v48  ;;  %v8019_v60 = vld [vmem:[#allocation28_spill] sm:$0xff]  ;;  %v8020_v31 = vld [vmem:[#allocation29_spill] sm:$0xff]  ;;  %v8021_v41 = vld [vmem:[#allocation30_spill] sm:$0xff] }
 0x5a9   : > { %3800 = vst.msk [vmem:[%s5428_s21 + $0x8] sm:$0xff] %vm383_vm2, %v3768_v47  ;;  %3801 = vst.msk [vmem:[%s5428_s21 + $0x10] sm:$0xff] %vm383_vm2, %v3769_v21  ;;  %v3778_v37 = vadd.f32 %v3746_v45, %v8010_v36  ;;  %v3779_v39 = vadd.f32 %v3747_v25, %v8011_v38  ;;  %v3780_v15 = vadd.f32 %v3748_v3, %v8012_v58  ;;  %v8023_v10 = vld [vmem:[#allocation32_spill] sm:$0xff]  ;;  %v8024_v44 = vld [vmem:[#allocation33_spill] sm:$0xff] }
 0x5aa   : > { %v3781_v7 = vadd.f32 %v3749_v8, %v8013_v28  ;;  %3802 = vst.msk [vmem:[%s5428_s21 + $0x18] sm:$0xff] %vm383_vm2, %v3770_v42  ;;  %3803 = vst.msk [vmem:[%s5428_s21 + $0x20] sm:$0xff] %vm383_vm2, %v3771_v57  ;;  %v3782_v24 = vadd.f32 %v3750_v30, %v8014_v63  ;;  %v3783_v13 = vadd.f32 %v3751_v9, %v8015_v26  ;;  %v8025_v25 = vld [vmem:[#allocation34_spill] sm:$0xff]  ;;  %v8026_v8 = vld [vmem:[#allocation35_spill] sm:$0xff] }
 0x5ab   : > { %3804 = vst.msk [vmem:[%s5428_s21 + $0x28] sm:$0xff] %vm383_vm2, %v3772_v14  ;;  %3805 = vst.msk [vmem:[%s5428_s21 + $0x30] sm:$0xff] %vm383_vm2, %v3773_v56  ;;  %v3784_v59 = vadd.f32 %v3752_v18, %v8016_v54  ;;  %v3785_v50 = vadd.f32 %v3753_v62, %v8017_v23  ;;  %v3786_v1 = vadd.f32 %v3754_v27, %v8018_v53  ;;  %v8027_v9 = vld [vmem:[#allocation36_spill] sm:$0xff]  ;;  %v8028_v62 = vld [vmem:[#allocation37_spill] sm:$0xff] }
 0x5ac   : > { %3806 = vst.msk [vmem:[%s5428_s21 + $0x38] sm:$0xff] %vm383_vm2, %v3774_v19  ;;  %3807 = vst.msk [vmem:[%s5428_s21 + $0x40] sm:$0xff] %vm383_vm2, %v3775_v12  ;;  %v3787_v61 = vadd.f32 %v3755_v46, %v8019_v60  ;;  %v3788_v16 = vadd.f32 %v3756_v2, %v8020_v31  ;;  %v3789_v49 = vadd.f32 %v3757_v5, %v8021_v41  ;;  %v8029_v46 = vld [vmem:[#allocation38_spill] sm:$0xff] }
 0x5ad   : > { %3808 = vst.msk [vmem:[%s5428_s21 + $0x48] sm:$0xff] %vm383_vm2, %v3776_v40  ;;  %3809 = vst.msk [vmem:[%s5428_s21 + $0x50] sm:$0xff] %vm383_vm2, %v3777_v29  ;;  %v3790_v0 = vadd.f32 %v3758_v55, %v8022_v4  ;;  %v3791_v22 = vadd.f32 %v3759_v32, %v8023_v10  ;;  %v3792_v45 = vadd.f32 %v3760_v11, %v8024_v44 }
 0x5ae   : > { %3810 = vst.msk [vmem:[%s5428_s21 + $0x58] sm:$0xff] %vm383_vm2, %v3778_v37  ;;  %3811 = vst.msk [vmem:[%s5428_s21 + $0x60] sm:$0xff] %vm383_vm2, %v3779_v39  ;;  %v3793_v3 = vadd.f32 %v3761_v20, %v8025_v25  ;;  %v3794_v30 = vadd.f32 %v3762_v51, %v8026_v8  ;;  %v3795_v18 = vadd.f32 %v3763_v52, %v8027_v9 }
 0x5af   : > { %3812 = vst.msk [vmem:[%s5428_s21 + $0x68] sm:$0xff] %vm383_vm2, %v3780_v15  ;;  %3813 = vst.msk [vmem:[%s5428_s21 + $0x70] sm:$0xff] %vm383_vm2, %v3781_v7  ;;  %v3796_v27 = vadd.f32 %v3764_v43, %v8028_v62  ;;  %v3798_v2 = vadd.f32 %v3766_v6, %v8029_v46 }
 0x5b0   : > { %3814 = vst.msk [vmem:[%s5428_s21 + $0x78] sm:$0xff] %vm383_vm2, %v3782_v24  ;;  %3815 = vst.msk [vmem:[%s5428_s21 + $0x80] sm:$0xff] %vm383_vm2, %v3783_v13 }
 0x5b1   : > { %3816 = vst.msk [vmem:[%s5428_s21 + $0x88] sm:$0xff] %vm383_vm2, %v3784_v59  ;;  %3817 = vst.msk [vmem:[%s5428_s21 + $0x90] sm:$0xff] %vm383_vm2, %v3785_v50 }
 0x5b2   : > { %3818 = vst.msk [vmem:[%s5428_s21 + $0x98] sm:$0xff] %vm383_vm2, %v3786_v1  ;;  %3819 = vst.msk [vmem:[%s5428_s21 + $0xa0] sm:$0xff] %vm383_vm2, %v3787_v61 }
 0x5b3   : > { %3820 = vst.msk [vmem:[%s5428_s21 + $0xa8] sm:$0xff] %vm383_vm2, %v3788_v16  ;;  %3821 = vst.msk [vmem:[%s5428_s21 + $0xb0] sm:$0xff] %vm383_vm2, %v3789_v49 }
 0x5b4   : > { %3822 = vst.msk [vmem:[%s5428_s21 + $0xb8] sm:$0xff] %vm383_vm2, %v3790_v0  ;;  %3823 = vst.msk [vmem:[%s5428_s21 + $0xc0] sm:$0xff] %vm383_vm2, %v3791_v22 }
 0x5b5   : > { %3824 = vst.msk [vmem:[%s5428_s21 + $0xc8] sm:$0xff] %vm383_vm2, %v3792_v45  ;;  %3825 = vst.msk [vmem:[%s5428_s21 + $0xd0] sm:$0xff] %vm383_vm2, %v3793_v3 }
 0x5b6   : > { %3826 = vst.msk [vmem:[%s5428_s21 + $0xd8] sm:$0xff] %vm383_vm2, %v3794_v30  ;;  %3827 = vst.msk [vmem:[%s5428_s21 + $0xe0] sm:$0xff] %vm383_vm2, %v3795_v18 }
 0x5b7   : > { %3828 = vst.msk [vmem:[%s5428_s21 + $0xe8] sm:$0xff] %vm383_vm2, %v3796_v27  ;;  %3830 = vst.msk [vmem:[%s5428_s21 + $0xf8] sm:$0xff] %vm383_vm2, %v3798_v2 }
 0x5b8   : > { %5046 = shalt.err (!%p5043_p9)
}
 0x5b9   : > { %s5047_s0 = scalar_lea.hbm %s7829_s18, 4096  ;;  %s5051_s7 = scalar_lea.hbm %s7925_s2, 8192 }
 0x5ba   : > { %p5048_p2 = scmp.ne.s32.totalorder %s7829_s18, %s5047_s0  ;;  %p5052_p4 = scmp.lt.u32.totalorder %s7829_s18, %s7925_s2 }
 0x5bb   : > { %p5053_p8 = scmp.lt.u32.totalorder %s5051_s7, %s5047_s0  ;;  %p5055_p6 = scmp.lt.u32.totalorder %s5047_s0, %s7829_s18 }
 0x5bc   : > { %p5049_p11 = pnand %p5048_p2, %p8030_p13 }
 0x5bd   : > { %p5054_p1 = por %p5053_p8, %p5052_p4 }
 0x5be   : > { %p5050_p7 = pneg %p5049_p11 }
 0x5bf   : > { %p5056_p12 = por %p5055_p6, %p5054_p1 }
 0x5c1   : > { %p5057_p0 = pnand %p5056_p12, %p5050_p7 }
 0x5c3   : > { %5060 = shalt.err (!%p5057_p0)
}
 0x5c4   : > { %s5170_s8 = smov 128  }
 0x5c5   : > { %4856 = dma.vmem_to_hbm [thread:$0]  (%p8030_p13), %s7843_s16, 4096, %s7829_s18, %s3832_s29, %s5170_s8, %s5170_s8, %s5166_s15  }
 0x5c6 PF: > { %p4870_p5 = scmp.ge.s32.totalorder %s5159_s19, 2  ;;  %s3860_s3 = sand.u32 1, %s5131_s12  }
 0x5c7   : > { %p8031_p10 = scmp.ne.s32.totalorder %s7966_s28, 0  ;;  %s3861_s25 = scalar_lea.sflag [#allocation5], %s3860_s3 }
 0x5c9   : > { %p4866_p3 = pnand %p4870_p5, %p8031_p10 }
 0x5cb   : > { %5114 = dma.done.wait (!%p4866_p3), %s3861_s25, 4096  }
 0x5cc   : > { %5116 = vsyncadd (!%p4866_p3), %s3861_s25, 4294963200  ;;  %s21_s19 = sadd.s32 1, %s5159_s19   ;;  %s8032_s27 = smov %s5354_s9 }
 0x5cd   : > { %p18_p9 = scmp.ge.s32.totalorder %s21_s19, 6   ;;  %s8033_s16 = sld [smem:[#allocation12_spill]] }
 0x5ce   : > { %s8034_s4 = sld [smem:[#allocation13_spill]]  ;;  %s8035_s18 = sld [smem:[#allocation14_spill]] }
 0x5cf   : > { %s8036_s9 = smov %s5123_s10  ;;  %s8037_s10 = smov %s5127_s11 }
 0x5d0   : > { %s8038_s11 = smov %s8032_s27  ;;  %s8039_s12 = smov %s5135_s13 }
 0x5d1   : > { %s8040_s13 = smov %s5139_s14  ;;  %s8041_s14 = smov %s5368_s24 }
 0x5d2   : > { %s8042_s15 = smov %s5151_s17  ;;  %20 = sbr.rel (!%p18_p9) target bundleno = 13 (0xd), region = 91 }
 0x5d4   : > { %s8043_s17 = smov %s8034_s4 }
 0x5d9   :  { %3866 = vsyncpa [#allocation4], 1 }
 0x5da   :  { %3868 = vsyncpa [#allocation4 + $0x1], 1 }
 0x5db   :  { %3869 = vsyncpa [#allocation7], 1 }
 0x5dc   :  { %3871 = vsyncpa [#allocation7 + $0x1], 1 }
 0x5dd   :  { %3872 = vsyncpa [#allocation5], 1 }
 0x5de   :  { %3874 = vsyncpa [#allocation5 + $0x1], 1 }

</bundles_post_ra>
